<compile_context>
chip_gen: v7x
topology: tpu7x:2x2x1
jax: 0.10.0
libtpu: 0.0.40
codegen_flags: <defaults>
</compile_context>

<pallas_src>
import functools

import jax
import jax.numpy as jnp
import numpy as np
from jax.experimental import pallas as pl
from jax.experimental.pallas import tpu as pltpu

_VMEM_LIMIT = 32 * 1024 * 1024  # conservative: leaves headroom on v7x's 64 MiB physical VMEM


def _row_tile(n):
    """Largest row tile (multiple of 8) that divides n; fall back to the full extent."""
    for t in (512, 256, 128, 64, 32, 16, 8):
        if n % t == 0:
            return t
    return n


def _time_tile(t):
    for c in (16, 8, 4, 2):
        if t % c == 0:
            return c
    return 1


# ---------------------------------------------------------------------------
# Fused multi-part Linear:  out = sum_i x_i @ w_i + bias  (MXU, tiled over rows)
# ---------------------------------------------------------------------------
def fused_linear(x_parts, w_parts, bias_row):
    """x_parts[i]: (rows, K_i), w_parts[i]: (K_i, N), bias_row: (1, N) -> (rows, N).

    Implements Linear over feature-concatenated inputs without materializing the concat.
    """
    rows = x_parts[0].shape[0]
    n_out = w_parts[0].shape[1]
    n_parts = len(x_parts)
    tm = _row_tile(rows)

    def kernel(*refs):
        xs = refs[:n_parts]
        ws = refs[n_parts:2 * n_parts]
        b_ref = refs[2 * n_parts]
        o_ref = refs[2 * n_parts + 1]
        acc = jnp.dot(xs[0][...], ws[0][...], preferred_element_type=jnp.float32)
        for x_ref, w_ref in zip(xs[1:], ws[1:]):
            acc = acc + jnp.dot(x_ref[...], w_ref[...], preferred_element_type=jnp.float32)
        o_ref[...] = acc + b_ref[...]

    in_specs = (
        [pl.BlockSpec((tm, x.shape[1]), lambda i: (i, 0)) for x in x_parts]
        + [pl.BlockSpec(w.shape, lambda i: (0, 0)) for w in w_parts]
        + [pl.BlockSpec((1, n_out), lambda i: (0, 0))]
    )
    return pl.pallas_call(
        kernel,
        out_shape=jax.ShapeDtypeStruct((rows, n_out), jnp.float32),
        grid=(rows // tm,),
        in_specs=in_specs,
        out_specs=pl.BlockSpec((tm, n_out), lambda i: (i, 0)),
        compiler_params=pltpu.CompilerParams(
            dimension_semantics=("parallel",),
            vmem_limit_bytes=_VMEM_LIMIT,
        ),
    )(*x_parts, *w_parts, bias_row)


# ---------------------------------------------------------------------------
# Fused multi-part head:  out[r] = sum_i <x_i[r, :], w_i> + b   (VPU reduce, no MXU)
# ---------------------------------------------------------------------------
def fused_head(x_parts, w_parts, bias_scalar):
    """x_parts[i]: (rows, K_i), w_parts[i]: (K_i,), bias_scalar: (1, 1) -> (rows, 1)."""
    rows = x_parts[0].shape[0]
    n_parts = len(x_parts)
    tm = _row_tile(rows)
    w_rows = [w.reshape(1, -1) for w in w_parts]

    def kernel(*refs):
        xs = refs[:n_parts]
        ws = refs[n_parts:2 * n_parts]
        b_ref = refs[2 * n_parts]       # SMEM (1, 1)
        o_ref = refs[2 * n_parts + 1]   # (tm, 1)
        acc = jnp.sum(xs[0][...] * ws[0][...], axis=-1, keepdims=True)
        for x_ref, w_ref in zip(xs[1:], ws[1:]):
            acc = acc + jnp.sum(x_ref[...] * w_ref[...], axis=-1, keepdims=True)
        o_ref[...] = acc + b_ref[0, 0]

    in_specs = (
        [pl.BlockSpec((tm, x.shape[1]), lambda i: (i, 0)) for x in x_parts]
        + [pl.BlockSpec(w.shape, lambda i: (0, 0)) for w in w_rows]
        + [pl.BlockSpec(memory_space=pltpu.MemorySpace.SMEM)]   # scalar bias in SMEM
    )
    return pl.pallas_call(
        kernel,
        out_shape=jax.ShapeDtypeStruct((rows, 1), jnp.float32),
        grid=(rows // tm,),
        in_specs=in_specs,
        out_specs=pl.BlockSpec((tm, 1), lambda i: (i, 0)),
        compiler_params=pltpu.CompilerParams(
            dimension_semantics=("parallel",),
            vmem_limit_bytes=_VMEM_LIMIT,
        ),
    )(*x_parts, *w_rows, bias_scalar)


# ---------------------------------------------------------------------------
# Bidirectional LSTM recurrence, both directions per step, tiled over time.
# ---------------------------------------------------------------------------
def bilstm_recurrence(xproj, w_hh):
    """xproj: (T, B, 8H) time-major fused gate projection ([fwd 4H | bwd 4H], gate order i,f,g,o)
    w_hh:  (2, H, 4H)  (already transposed, one slab per direction)
    -> (h_fwd, h_bwd), each (T, B, H) time-major.
    """
    T, B, _ = xproj.shape
    H = w_hh.shape[1]
    tT = _time_tile(T)
    Tb = T // tT

    def kernel(xf_ref, xb_ref, whh_ref, of_ref, ob_ref, h_scr, c_scr):
        # h/c persist across time-blocks; init only on the first grid step.
        @pl.when(pl.program_id(0) == 0)
        def _():
            h_scr[...] = jnp.zeros_like(h_scr)
            c_scr[...] = jnp.zeros_like(c_scr)

        def cell(gates, c_prev):
            # PyTorch gate order: i, f, g, o.  (Lane slices; aligned when H % 32 == 0.)
            i_g = jax.nn.sigmoid(gates[:, 0 * H:1 * H])
            f_g = jax.nn.sigmoid(gates[:, 1 * H:2 * H])
            g_g = jnp.tanh(gates[:, 2 * H:3 * H])
            o_g = jax.nn.sigmoid(gates[:, 3 * H:4 * H])
            c_new = f_g * c_prev + i_g * g_g
            h_new = o_g * jnp.tanh(c_new)
            return h_new, c_new

        def step(s, carry):
            tf = s             # forward local time index
            tb = tT - 1 - s    # backward direction walks its block in reverse
            rec = jnp.einsum("dbh,dhk->dbk", h_scr[...], whh_ref[...],
                             preferred_element_type=jnp.float32)       # (2, B, 4H)
            h_f, c_f = cell(xf_ref[tf] + rec[0], c_scr[0])
            h_b, c_b = cell(xb_ref[tb] + rec[1], c_scr[1])
            h_scr[0] = h_f
            h_scr[1] = h_b
            c_scr[0] = c_f
            c_scr[1] = c_b
            of_ref[tf] = h_f
            ob_ref[tb] = h_b
            return carry

        # Fully unrolled short loop -> LLO scheduler can overlap MXU push with gate math.
        jax.lax.fori_loop(0, tT, step, 0, unroll=True)

    out_shape = (jax.ShapeDtypeStruct((T, B, H), jnp.float32),
                 jax.ShapeDtypeStruct((T, B, H), jnp.float32))
    return pl.pallas_call(
        kernel,
        out_shape=out_shape,
        grid=(Tb,),
        in_specs=[
            # forward: time block t, gate columns [0:4H]
            pl.BlockSpec((tT, B, 4 * H), lambda t: (t, 0, 0)),
            # backward: time block Tb-1-t, gate columns [4H:8H]  (reversal via index_map)
            pl.BlockSpec((tT, B, 4 * H), lambda t: (Tb - 1 - t, 0, 1)),
            pl.BlockSpec((2, H, 4 * H), lambda t: (0, 0, 0)),
        ],
        out_specs=(
            pl.BlockSpec((tT, B, H), lambda t: (t, 0, 0)),
            pl.BlockSpec((tT, B, H), lambda t: (Tb - 1 - t, 0, 0)),
        ),
        scratch_shapes=[
            pltpu.VMEM((2, B, H), jnp.float32),  # h (both directions)
            pltpu.VMEM((2, B, H), jnp.float32),  # c (both directions)
        ],
        compiler_params=pltpu.CompilerParams(
            dimension_semantics=("arbitrary",),   # sequential recurrence over time
            vmem_limit_bytes=_VMEM_LIMIT,
        ),
    )(xproj, xproj, w_hh)


# ---------------------------------------------------------------------------
# Parameter initialization (deterministic, PyTorch-default-style uniform) + packing
# ---------------------------------------------------------------------------
def init_params(key, hidden_size):
    H = hidden_size
    assert H % 32 == 0, "H must be a multiple of 32 so 4H is lane-aligned (128)."
    keys = iter(jax.random.split(key, 64))

    def unif(shape, bound):
        return jax.random.uniform(next(keys), shape, jnp.float32, -bound, bound)

    lin_bound = 1.0 / float(np.sqrt(10 * H))
    lstm_bound = 1.0 / float(np.sqrt(H))

    params = {
        "H": H,
        "w_start": unif((10 * H,), lin_bound),
        "b_start": unif((1, 1), lin_bound),
        "w_end": unif((10 * H,), lin_bound),
        "b_end": unif((1, 1), lin_bound),
        "lstm": [],
    }
    # 2 layers x 2 directions; input size is 2H for both layers.
    for _layer in range(2):
        raw = []
        for _d in range(2):
            w_ih = unif((4 * H, 2 * H), lstm_bound)
            w_hh = unif((4 * H, H), lstm_bound)
            b_ih = unif((4 * H,), lstm_bound)
            b_hh = unif((4 * H,), lstm_bound)
            raw.append((w_ih, w_hh, b_ih, b_hh))
        (w_ih_f, w_hh_f, b_ih_f, b_hh_f), (w_ih_b, w_hh_b, b_ih_b, b_hh_b) = raw
        params["lstm"].append({
            "raw": tuple(raw),
            # fused input projection (both directions in one matmul): (2H, 8H) / (1, 8H)
            "w_in": jnp.concatenate([w_ih_f.T, w_ih_b.T], axis=1),
            "b_in": jnp.concatenate([b_ih_f + b_hh_f, b_ih_b + b_hh_b]).reshape(1, 8 * H),
            # recurrent weights, one (H, 4H) slab per direction
            "w_hh": jnp.stack([w_hh_f.T, w_hh_b.T], axis=0),
        })
    return params


# ---------------------------------------------------------------------------
# OutputLayer forward (eval semantics)
# ---------------------------------------------------------------------------
def output_layer_forward(params, G, M):
    """G: (B, T, 8H), M: (B, T, 2H)  ->  (starts (1, B*T), ends (1, B*T))."""
    B, T, _ = M.shape
    H = params["H"]
    BT = B * T

    G2 = G.reshape(BT, 8 * H)
    M2 = M.reshape(BT, 2 * H)

    # ---- start head: Linear(cat([G, M], -1)) computed without the concat ----
    starts = fused_head(
        [G2, M2],
        [params["w_start"][: 8 * H], params["w_start"][8 * H:]],
        params["b_start"],
    ).reshape(1, BT)

    # ---- m_to_m2: 2-layer bidirectional LSTM over M ----
    # TODO(synk): nn.LSTM inter-layer dropout is training-only; omitted (eval semantics).
    Mt = jnp.transpose(M, (1, 0, 2))          # (T, B, 2H) time-major; one small copy for the stack
    x_parts = [Mt.reshape(T * B, 2 * H)]
    h_f = h_b = None
    for layer in range(2):
        p = params["lstm"][layer]
        if len(x_parts) == 1:
            w_parts = [p["w_in"]]
        else:
            # layer-1 input is [h_fwd | h_bwd]: split the fused weight rows instead of concatenating
            w_parts = [p["w_in"][:H], p["w_in"][H:]]
        xproj = fused_linear(x_parts, w_parts, p["b_in"]).reshape(T, B, 8 * H)
        h_f, h_b = bilstm_recurrence(xproj, p["w_hh"])        # each (T, B, H), time-major
        x_parts = [h_f.reshape(T * B, H), h_b.reshape(T * B, H)]

    # Only the two final direction outputs go back to batch-major (small copies).
    hf_bt = jnp.transpose(h_f, (1, 0, 2)).reshape(BT, H)
    hb_bt = jnp.transpose(h_b, (1, 0, 2)).reshape(BT, H)

    # ---- end head: Linear(cat([G, lstm_out], -1)) computed without the concat ----
    ends = fused_head(
        [G2, hf_bt, hb_bt],
        [params["w_end"][: 8 * H],
         params["w_end"][8 * H: 9 * H],
         params["w_end"][9 * H:]],
        params["b_end"],
    ).reshape(1, BT)

    return starts, ends


# ---------------------------------------------------------------------------
# Pure-JAX reference (PyTorch nn.LSTM / nn.Linear eval semantics)
# ---------------------------------------------------------------------------
def output_layer_reference(params, G, M):
    B, T, _ = M.shape
    H = params["H"]
    hi = jax.lax.Precision.HIGHEST

    def cell(x, h, c, w_ih, w_hh, b_ih, b_hh):
        gates = (jnp.dot(x, w_ih.T, precision=hi) + jnp.dot(h, w_hh.T, precision=hi)
                 + b_ih + b_hh)
        i_g = jax.nn.sigmoid(gates[:, 0 * H:1 * H])
        f_g = jax.nn.sigmoid(gates[:, 1 * H:2 * H])
        g_g = jnp.tanh(gates[:, 2 * H:3 * H])
        o_g = jax.nn.sigmoid(gates[:, 3 * H:4 * H])
        c = f_g * c + i_g * g_g
        h = o_g * jnp.tanh(c)
        return h, c

    x = M
    for layer in range(2):
        outs = []
        for d in range(2):
            w_ih, w_hh, b_ih, b_hh = params["lstm"][layer]["raw"][d]
            xs = x[:, ::-1, :] if d == 1 else x
            h = jnp.zeros((B, H), jnp.float32)
            c = jnp.zeros((B, H), jnp.float32)
            hs = []
            for t in range(T):
                h, c = cell(xs[:, t], h, c, w_ih, w_hh, b_ih, b_hh)
                hs.append(h)
            hseq = jnp.stack(hs, axis=1)
            if d == 1:
                hseq = hseq[:, ::-1, :]
            outs.append(hseq)
        x = jnp.concatenate(outs, axis=2)

    input1 = jnp.concatenate([G, M], axis=2).reshape(B * T, 10 * H)
    input2 = jnp.concatenate([G, x], axis=2).reshape(B * T, 10 * H)
    starts = (jnp.dot(input1, params["w_start"][:, None], precision=hi)
              + params["b_start"]).reshape(1, -1)
    ends = (jnp.dot(input2, params["w_end"][:, None], precision=hi)
            + params["b_end"]).reshape(1, -1)
    return starts, ends


# ---------------------------------------------------------------------------
# Driver
# ---------------------------------------------------------------------------
if __name__ == "__main__":
    hidden_size = 32
    B, T = 2, 8

    key = jax.random.PRNGKey(0)
    k_params, k_g, k_m = jax.random.split(key, 3)

    params = init_params(k_params, hidden_size)
    G = jax.random.normal(k_g, (B, T, 8 * hidden_size), jnp.float32)
    M = jax.random.normal(k_m, (B, T, 2 * hidden_size), jnp.float32)

    fwd = jax.jit(functools.partial(output_layer_forward, params))
    starts, ends = fwd(G, M)
    jax.block_until_ready((starts, ends))

    assert starts.shape == (1, B * T), starts.shape
    assert ends.shape == (1, B * T), ends.shape
    assert starts.dtype == jnp.float32 and ends.dtype == jnp.float32

    # Correctness check against a pure-JAX reference (loose tolerance covers MXU/EUP rounding).
    starts_ref, ends_ref = output_layer_reference(params, G, M)
    np.testing.assert_allclose(np.asarray(starts), np.asarray(starts_ref), rtol=2e-2, atol=2e-2)
    np.testing.assert_allclose(np.asarray(ends), np.asarray(ends_ref), rtol=2e-2, atol=2e-2)

    print("KERNEL_OK")
</pallas_src>

<mosaic_0001>
module attributes {stable_mosaic.version = 11 : i64} {
  func.func @kernel(%arg0: i32, %arg1: memref<16x64xf32, #tpu.memory_space<vmem>>, %arg2: memref<64x256xf32, #tpu.memory_space<vmem>>, %arg3: memref<1x256xf32, #tpu.memory_space<vmem>>, %arg4: memref<16x256xf32, #tpu.memory_space<vmem>>) attributes {dimension_semantics = [#tpu.dimension_semantics<parallel>], iteration_bounds = array<i64: 1>, scalar_prefetch = 0 : i64, scratch_operands = 0 : i64, tpu.core_type = #tpu.core_type<tc>, window_params = [{transform_indices = @transform_0, window_bounds = array<i64: 16, 64>}, {pipeline_mode = #tpu.pipeline_mode<synchronous>, transform_indices = @transform_1, window_bounds = array<i64: 64, 256>}, {pipeline_mode = #tpu.pipeline_mode<synchronous>, transform_indices = @transform_2, window_bounds = array<i64: 1, 256>}, {transform_indices = @transform_3, window_bounds = array<i64: 16, 256>}]} {
    %c0 = arith.constant 0 : index
    %c0_0 = arith.constant 0 : index
    %0 = vector.load %arg1[%c0, %c0_0] : memref<16x64xf32, #tpu.memory_space<vmem>>, vector<16x64xf32>
    %c0_1 = arith.constant 0 : index
    %c0_2 = arith.constant 0 : index
    %1 = vector.load %arg2[%c0_1, %c0_2] : memref<64x256xf32, #tpu.memory_space<vmem>>, vector<64x256xf32>
    %cst = arith.constant dense<0.000000e+00> : vector<16x256xf32>
    %2 = tpu.matmul %0, %1, %cst {dimension_numbers = #tpu.dot_dimension_numbers<[1], [0], [0], [1], [0, 0, 1, 1], [], []>} : vector<16x64xf32>, vector<64x256xf32>, vector<16x256xf32> -> vector<16x256xf32>
    %c0_3 = arith.constant 0 : index
    %c0_4 = arith.constant 0 : index
    %3 = vector.load %arg3[%c0_3, %c0_4] : memref<1x256xf32, #tpu.memory_space<vmem>>, vector<1x256xf32>
    %4 = vector.broadcast %3 : vector<1x256xf32> to vector<16x256xf32>
    %5 = arith.addf %2, %4 : vector<16x256xf32>
    %c0_5 = arith.constant 0 : index
    %c0_6 = arith.constant 0 : index
    %6 = vector.load %arg4[%c0_5, %c0_6] : memref<16x256xf32, #tpu.memory_space<vmem>>, vector<16x256xf32>
    tpu.vector_store %arg4[%c0_5, %c0_6], %5 {strides = array<i32>} : memref<16x256xf32, #tpu.memory_space<vmem>>, vector<16x256xf32>,
    return
  }
  func.func @transform_0(%arg0: i32) -> (i32, i32) {
    %c0_i32 = arith.constant 0 : i32
    %c0_i32_0 = arith.constant 0 : i32
    return %arg0, %c0_i32 : i32, i32
  }
  func.func @transform_1(%arg0: i32) -> (i32, i32) {
    %c0_i32 = arith.constant 0 : i32
    %c0_i32_0 = arith.constant 0 : i32
    %c0_i32_1 = arith.constant 0 : i32
    return %c0_i32, %c0_i32_0 : i32, i32
  }
  func.func @transform_2(%arg0: i32) -> (i32, i32) {
    %c0_i32 = arith.constant 0 : i32
    %c0_i32_0 = arith.constant 0 : i32
    %c0_i32_1 = arith.constant 0 : i32
    return %c0_i32, %c0_i32_0 : i32, i32
  }
  func.func @transform_3(%arg0: i32) -> (i32, i32) {
    %c0_i32 = arith.constant 0 : i32
    %c0_i32_0 = arith.constant 0 : i32
    return %arg0, %c0_i32 : i32, i32
  }
}

module attributes {stable_mosaic.version = 11 : i64} {
  func.func @kernel(%arg0: i32, %arg1: memref<8x2x128xf32, #tpu.memory_space<vmem>>, %arg2: memref<8x2x128xf32, #tpu.memory_space<vmem>>, %arg3: memref<2x32x128xf32, #tpu.memory_space<vmem>>, %arg4: memref<8x2x32xf32, #tpu.memory_space<vmem>>, %arg5: memref<8x2x32xf32, #tpu.memory_space<vmem>>, %arg6: memref<2x2x32xf32, #tpu.memory_space<vmem>>, %arg7: memref<2x2x32xf32, #tpu.memory_space<vmem>>) attributes {dimension_semantics = [#tpu.dimension_semantics<arbitrary>], iteration_bounds = array<i64: 1>, scalar_prefetch = 0 : i64, scratch_operands = 2 : i64, tpu.core_type = #tpu.core_type<tc>, window_params = [{transform_indices = @transform_0, window_bounds = array<i64: 8, 2, 128>}, {transform_indices = @transform_1, window_bounds = array<i64: 8, 2, 128>}, {pipeline_mode = #tpu.pipeline_mode<synchronous>, transform_indices = @transform_2, window_bounds = array<i64: 2, 32, 128>}, {transform_indices = @transform_3, window_bounds = array<i64: 8, 2, 32>}, {transform_indices = @transform_4, window_bounds = array<i64: 8, 2, 32>}]} {
    %c0_i32 = arith.constant 0 : i32
    %0 = arith.cmpi eq, %arg0, %c0_i32 : i32
    %1 = arith.extui %0 : i1 to i32
    %c0_i32_0 = arith.constant 0 : i32
    %2 = arith.cmpi ne, %1, %c0_i32_0 : i32
    scf.if %2 {
      %cst_319 = arith.constant 0.000000e+00 : f32
      %723 = vector.broadcast %cst_319 : f32 to vector<2x2x32xf32>
      %c0_320 = arith.constant 0 : index
      %c0_321 = arith.constant 0 : index
      %c0_322 = arith.constant 0 : index
      %724 = vector.load %arg6[%c0_320, %c0_321, %c0_322] : memref<2x2x32xf32, #tpu.memory_space<vmem>>, vector<2x2x32xf32>
      tpu.vector_store %arg6[%c0_320, %c0_321, %c0_322], %723 {strides = array<i32>} : memref<2x2x32xf32, #tpu.memory_space<vmem>>, vector<2x2x32xf32>,
      %cst_323 = arith.constant 0.000000e+00 : f32
      %725 = vector.broadcast %cst_323 : f32 to vector<2x2x32xf32>
      %c0_324 = arith.constant 0 : index
      %c0_325 = arith.constant 0 : index
      %c0_326 = arith.constant 0 : index
      %726 = vector.load %arg7[%c0_324, %c0_325, %c0_326] : memref<2x2x32xf32, #tpu.memory_space<vmem>>, vector<2x2x32xf32>
      tpu.vector_store %arg7[%c0_324, %c0_325, %c0_326], %725 {strides = array<i32>} : memref<2x2x32xf32, #tpu.memory_space<vmem>>, vector<2x2x32xf32>,
    } else {
    }
    %c0_i32_1 = arith.constant 0 : i32
    %c7_i32 = arith.constant 7 : i32
    %3 = arith.subi %c7_i32, %c0_i32_1 : i32
    %c0 = arith.constant 0 : index
    %c0_2 = arith.constant 0 : index
    %c0_3 = arith.constant 0 : index
    %4 = vector.load %arg6[%c0, %c0_2, %c0_3] : memref<2x2x32xf32, #tpu.memory_space<vmem>>, vector<2x2x32xf32>
    %c0_4 = arith.constant 0 : index
    %c0_5 = arith.constant 0 : index
    %c0_6 = arith.constant 0 : index
    %5 = vector.load %arg3[%c0_4, %c0_5, %c0_6] : memref<2x32x128xf32, #tpu.memory_space<vmem>>, vector<2x32x128xf32>
    "tpu.trace_start"() <{level = 10 : i32, message = "dbh,dhk->dbk"}> : () -> ()
    %cst = arith.constant dense<0.000000e+00> : vector<2x2x128xf32>
    %6 = tpu.matmul %4, %5, %cst {dimension_numbers = #tpu.dot_dimension_numbers<[2], [1], [1], [2], [0, 0, 0, 1, 1, 2], [0], [0]>} : vector<2x2x32xf32>, vector<2x32x128xf32>, vector<2x2x128xf32> -> vector<2x2x128xf32>
    "tpu.trace_stop"() : () -> ()
    %7 = arith.index_cast %c0_i32_1 : i32 to index
    %c0_7 = arith.constant 0 : index
    %c0_8 = arith.constant 0 : index
    %8 = vector.load %arg1[%7, %c0_7, %c0_8] : memref<8x2x128xf32, #tpu.memory_space<vmem>>, vector<1x2x128xf32>
    %9 = vector.shape_cast %8 : vector<1x2x128xf32> to vector<2x128xf32>
    %10 = vector.extract_strided_slice %6 {offsets = [0, 0, 0], sizes = [1, 2, 128], strides = [1, 1, 1]} : vector<2x2x128xf32> to vector<1x2x128xf32>
    %11 = vector.shape_cast %10 : vector<1x2x128xf32> to vector<2x128xf32>
    %12 = arith.addf %9, %11 : vector<2x128xf32>
    %c0_9 = arith.constant 0 : index
    %c0_10 = arith.constant 0 : index
    %c0_11 = arith.constant 0 : index
    %13 = vector.load %arg7[%c0_9, %c0_10, %c0_11] : memref<2x2x32xf32, #tpu.memory_space<vmem>>, vector<1x2x32xf32>
    %14 = vector.shape_cast %13 : vector<1x2x32xf32> to vector<2x32xf32>
    %15 = vector.extract_strided_slice %12 {offsets = [0, 0], sizes = [2, 32], strides = [1, 1]} : vector<2x128xf32> to vector<2x32xf32>
    %16 = arith.negf %15 : vector<2x32xf32>
    %17 = math.exp %16 : vector<2x32xf32>
    %cst_12 = arith.constant 1.000000e+00 : f32
    %18 = vector.broadcast %cst_12 : f32 to vector<2x32xf32>
    %19 = arith.addf %18, %17 : vector<2x32xf32>
    %20 = arith.divf %18, %19 : vector<2x32xf32>
    %21 = vector.extract_strided_slice %12 {offsets = [0, 32], sizes = [2, 32], strides = [1, 1]} : vector<2x128xf32> to vector<2x32xf32>
    %22 = arith.negf %21 : vector<2x32xf32>
    %23 = math.exp %22 : vector<2x32xf32>
    %cst_13 = arith.constant 1.000000e+00 : f32
    %24 = vector.broadcast %cst_13 : f32 to vector<2x32xf32>
    %25 = arith.addf %24, %23 : vector<2x32xf32>
    %26 = arith.divf %24, %25 : vector<2x32xf32>
    %27 = vector.extract_strided_slice %12 {offsets = [0, 64], sizes = [2, 32], strides = [1, 1]} : vector<2x128xf32> to vector<2x32xf32>
    %28 = math.tanh %27 : vector<2x32xf32>
    %29 = vector.extract_strided_slice %12 {offsets = [0, 96], sizes = [2, 32], strides = [1, 1]} : vector<2x128xf32> to vector<2x32xf32>
    %30 = arith.negf %29 : vector<2x32xf32>
    %31 = math.exp %30 : vector<2x32xf32>
    %cst_14 = arith.constant 1.000000e+00 : f32
    %32 = vector.broadcast %cst_14 : f32 to vector<2x32xf32>
    %33 = arith.addf %32, %31 : vector<2x32xf32>
    %34 = arith.divf %32, %33 : vector<2x32xf32>
    %35 = arith.mulf %26, %14 : vector<2x32xf32>
    %36 = arith.mulf %20, %28 : vector<2x32xf32>
    %37 = arith.addf %35, %36 : vector<2x32xf32>
    %38 = math.tanh %37 : vector<2x32xf32>
    %39 = arith.mulf %34, %38 : vector<2x32xf32>
    %40 = arith.index_cast %3 : i32 to index
    %c0_15 = arith.constant 0 : index
    %c0_16 = arith.constant 0 : index
    %41 = vector.load %arg2[%40, %c0_15, %c0_16] : memref<8x2x128xf32, #tpu.memory_space<vmem>>, vector<1x2x128xf32>
    %42 = vector.shape_cast %41 : vector<1x2x128xf32> to vector<2x128xf32>
    %43 = vector.extract_strided_slice %6 {offsets = [1, 0, 0], sizes = [1, 2, 128], strides = [1, 1, 1]} : vector<2x2x128xf32> to vector<1x2x128xf32>
    %44 = vector.shape_cast %43 : vector<1x2x128xf32> to vector<2x128xf32>
    %45 = arith.addf %42, %44 : vector<2x128xf32>
    %c1 = arith.constant 1 : index
    %c0_17 = arith.constant 0 : index
    %c0_18 = arith.constant 0 : index
    %46 = vector.load %arg7[%c1, %c0_17, %c0_18] : memref<2x2x32xf32, #tpu.memory_space<vmem>>, vector<1x2x32xf32>
    %47 = vector.shape_cast %46 : vector<1x2x32xf32> to vector<2x32xf32>
    %48 = vector.extract_strided_slice %45 {offsets = [0, 0], sizes = [2, 32], strides = [1, 1]} : vector<2x128xf32> to vector<2x32xf32>
    %49 = arith.negf %48 : vector<2x32xf32>
    %50 = math.exp %49 : vector<2x32xf32>
    %cst_19 = arith.constant 1.000000e+00 : f32
    %51 = vector.broadcast %cst_19 : f32 to vector<2x32xf32>
    %52 = arith.addf %51, %50 : vector<2x32xf32>
    %53 = arith.divf %51, %52 : vector<2x32xf32>
    %54 = vector.extract_strided_slice %45 {offsets = [0, 32], sizes = [2, 32], strides = [1, 1]} : vector<2x128xf32> to vector<2x32xf32>
    %55 = arith.negf %54 : vector<2x32xf32>
    %56 = math.exp %55 : vector<2x32xf32>
    %cst_20 = arith.constant 1.000000e+00 : f32
    %57 = vector.broadcast %cst_20 : f32 to vector<2x32xf32>
    %58 = arith.addf %57, %56 : vector<2x32xf32>
    %59 = arith.divf %57, %58 : vector<2x32xf32>
    %60 = vector.extract_strided_slice %45 {offsets = [0, 64], sizes = [2, 32], strides = [1, 1]} : vector<2x128xf32> to vector<2x32xf32>
    %61 = math.tanh %60 : vector<2x32xf32>
    %62 = vector.extract_strided_slice %45 {offsets = [0, 96], sizes = [2, 32], strides = [1, 1]} : vector<2x128xf32> to vector<2x32xf32>
    %63 = arith.negf %62 : vector<2x32xf32>
    %64 = math.exp %63 : vector<2x32xf32>
    %cst_21 = arith.constant 1.000000e+00 : f32
    %65 = vector.broadcast %cst_21 : f32 to vector<2x32xf32>
    %66 = arith.addf %65, %64 : vector<2x32xf32>
    %67 = arith.divf %65, %66 : vector<2x32xf32>
    %68 = arith.mulf %59, %47 : vector<2x32xf32>
    %69 = arith.mulf %53, %61 : vector<2x32xf32>
    %70 = arith.addf %68, %69 : vector<2x32xf32>
    %71 = math.tanh %70 : vector<2x32xf32>
    %72 = arith.mulf %67, %71 : vector<2x32xf32>
    %c0_22 = arith.constant 0 : index
    %c0_23 = arith.constant 0 : index
    %c0_24 = arith.constant 0 : index
    %73 = vector.load %arg6[%c0_22, %c0_23, %c0_24] : memref<2x2x32xf32, #tpu.memory_space<vmem>>, vector<1x2x32xf32>
    %74 = vector.shape_cast %73 : vector<1x2x32xf32> to vector<2x32xf32>
    %75 = vector.shape_cast %39 : vector<2x32xf32> to vector<1x2x32xf32>
    tpu.vector_store %arg6[%c0_22, %c0_23, %c0_24], %75 {strides = array<i32>} : memref<2x2x32xf32, #tpu.memory_space<vmem>>, vector<1x2x32xf32>,
    %c1_25 = arith.constant 1 : index
    %c0_26 = arith.constant 0 : index
    %c0_27 = arith.constant 0 : index
    %76 = vector.load %arg6[%c1_25, %c0_26, %c0_27] : memref<2x2x32xf32, #tpu.memory_space<vmem>>, vector<1x2x32xf32>
    %77 = vector.shape_cast %76 : vector<1x2x32xf32> to vector<2x32xf32>
    %78 = vector.shape_cast %72 : vector<2x32xf32> to vector<1x2x32xf32>
    tpu.vector_store %arg6[%c1_25, %c0_26, %c0_27], %78 {strides = array<i32>} : memref<2x2x32xf32, #tpu.memory_space<vmem>>, vector<1x2x32xf32>,
    %c0_28 = arith.constant 0 : index
    %c0_29 = arith.constant 0 : index
    %c0_30 = arith.constant 0 : index
    %79 = vector.load %arg7[%c0_28, %c0_29, %c0_30] : memref<2x2x32xf32, #tpu.memory_space<vmem>>, vector<1x2x32xf32>
    %80 = vector.shape_cast %79 : vector<1x2x32xf32> to vector<2x32xf32>
    %81 = vector.shape_cast %37 : vector<2x32xf32> to vector<1x2x32xf32>
    tpu.vector_store %arg7[%c0_28, %c0_29, %c0_30], %81 {strides = array<i32>} : memref<2x2x32xf32, #tpu.memory_space<vmem>>, vector<1x2x32xf32>,
    %c1_31 = arith.constant 1 : index
    %c0_32 = arith.constant 0 : index
    %c0_33 = arith.constant 0 : index
    %82 = vector.load %arg7[%c1_31, %c0_32, %c0_33] : memref<2x2x32xf32, #tpu.memory_space<vmem>>, vector<1x2x32xf32>
    %83 = vector.shape_cast %82 : vector<1x2x32xf32> to vector<2x32xf32>
    %84 = vector.shape_cast %70 : vector<2x32xf32> to vector<1x2x32xf32>
    tpu.vector_store %arg7[%c1_31, %c0_32, %c0_33], %84 {strides = array<i32>} : memref<2x2x32xf32, #tpu.memory_space<vmem>>, vector<1x2x32xf32>,
    %85 = arith.index_cast %c0_i32_1 : i32 to index
    %c0_34 = arith.constant 0 : index
    %c0_35 = arith.constant 0 : index
    %86 = vector.load %arg4[%85, %c0_34, %c0_35] : memref<8x2x32xf32, #tpu.memory_space<vmem>>, vector<1x2x32xf32>
    %87 = vector.shape_cast %86 : vector<1x2x32xf32> to vector<2x32xf32>
    %88 = vector.shape_cast %39 : vector<2x32xf32> to vector<1x2x32xf32>
    tpu.vector_store %arg4[%85, %c0_34, %c0_35], %88 {strides = array<i32>} : memref<8x2x32xf32, #tpu.memory_space<vmem>>, vector<1x2x32xf32>,
    %89 = arith.index_cast %3 : i32 to index
    %c0_36 = arith.constant 0 : index
    %c0_37 = arith.constant 0 : index
    %90 = vector.load %arg5[%89, %c0_36, %c0_37] : memref<8x2x32xf32, #tpu.memory_space<vmem>>, vector<1x2x32xf32>
    %91 = vector.shape_cast %90 : vector<1x2x32xf32> to vector<2x32xf32>
    %92 = vector.shape_cast %72 : vector<2x32xf32> to vector<1x2x32xf32>
    tpu.vector_store %arg5[%89, %c0_36, %c0_37], %92 {strides = array<i32>} : memref<8x2x32xf32, #tpu.memory_space<vmem>>, vector<1x2x32xf32>,
    %c1_i32 = arith.constant 1 : i32
    %c7_i32_38 = arith.constant 7 : i32
    %93 = arith.subi %c7_i32_38, %c1_i32 : i32
    %c0_39 = arith.constant 0 : index
    %c0_40 = arith.constant 0 : index
    %c0_41 = arith.constant 0 : index
    %94 = vector.load %arg6[%c0_39, %c0_40, %c0_41] : memref<2x2x32xf32, #tpu.memory_space<vmem>>, vector<2x2x32xf32>
    %c0_42 = arith.constant 0 : index
    %c0_43 = arith.constant 0 : index
    %c0_44 = arith.constant 0 : index
    %95 = vector.load %arg3[%c0_42, %c0_43, %c0_44] : memref<2x32x128xf32, #tpu.memory_space<vmem>>, vector<2x32x128xf32>
    "tpu.trace_start"() <{level = 10 : i32, message = "dbh,dhk->dbk"}> : () -> ()
    %cst_45 = arith.constant dense<0.000000e+00> : vector<2x2x128xf32>
    %96 = tpu.matmul %94, %95, %cst_45 {dimension_numbers = #tpu.dot_dimension_numbers<[2], [1], [1], [2], [0, 0, 0, 1, 1, 2], [0], [0]>} : vector<2x2x32xf32>, vector<2x32x128xf32>, vector<2x2x128xf32> -> vector<2x2x128xf32>
    "tpu.trace_stop"() : () -> ()
    %97 = arith.index_cast %c1_i32 : i32 to index
    %c0_46 = arith.constant 0 : index
    %c0_47 = arith.constant 0 : index
    %98 = vector.load %arg1[%97, %c0_46, %c0_47] : memref<8x2x128xf32, #tpu.memory_space<vmem>>, vector<1x2x128xf32>
    %99 = vector.shape_cast %98 : vector<1x2x128xf32> to vector<2x128xf32>
    %100 = vector.extract_strided_slice %96 {offsets = [0, 0, 0], sizes = [1, 2, 128], strides = [1, 1, 1]} : vector<2x2x128xf32> to vector<1x2x128xf32>
    %101 = vector.shape_cast %100 : vector<1x2x128xf32> to vector<2x128xf32>
    %102 = arith.addf %99, %101 : vector<2x128xf32>
    %c0_48 = arith.constant 0 : index
    %c0_49 = arith.constant 0 : index
    %c0_50 = arith.constant 0 : index
    %103 = vector.load %arg7[%c0_48, %c0_49, %c0_50] : memref<2x2x32xf32, #tpu.memory_space<vmem>>, vector<1x2x32xf32>
    %104 = vector.shape_cast %103 : vector<1x2x32xf32> to vector<2x32xf32>
    %105 = vector.extract_strided_slice %102 {offsets = [0, 0], sizes = [2, 32], strides = [1, 1]} : vector<2x128xf32> to vector<2x32xf32>
    %106 = arith.negf %105 : vector<2x32xf32>
    %107 = math.exp %106 : vector<2x32xf32>
    %cst_51 = arith.constant 1.000000e+00 : f32
    %108 = vector.broadcast %cst_51 : f32 to vector<2x32xf32>
    %109 = arith.addf %108, %107 : vector<2x32xf32>
    %110 = arith.divf %108, %109 : vector<2x32xf32>
    %111 = vector.extract_strided_slice %102 {offsets = [0, 32], sizes = [2, 32], strides = [1, 1]} : vector<2x128xf32> to vector<2x32xf32>
    %112 = arith.negf %111 : vector<2x32xf32>
    %113 = math.exp %112 : vector<2x32xf32>
    %cst_52 = arith.constant 1.000000e+00 : f32
    %114 = vector.broadcast %cst_52 : f32 to vector<2x32xf32>
    %115 = arith.addf %114, %113 : vector<2x32xf32>
    %116 = arith.divf %114, %115 : vector<2x32xf32>
    %117 = vector.extract_strided_slice %102 {offsets = [0, 64], sizes = [2, 32], strides = [1, 1]} : vector<2x128xf32> to vector<2x32xf32>
    %118 = math.tanh %117 : vector<2x32xf32>
    %119 = vector.extract_strided_slice %102 {offsets = [0, 96], sizes = [2, 32], strides = [1, 1]} : vector<2x128xf32> to vector<2x32xf32>
    %120 = arith.negf %119 : vector<2x32xf32>
    %121 = math.exp %120 : vector<2x32xf32>
    %cst_53 = arith.constant 1.000000e+00 : f32
    %122 = vector.broadcast %cst_53 : f32 to vector<2x32xf32>
    %123 = arith.addf %122, %121 : vector<2x32xf32>
    %124 = arith.divf %122, %123 : vector<2x32xf32>
    %125 = arith.mulf %116, %104 : vector<2x32xf32>
    %126 = arith.mulf %110, %118 : vector<2x32xf32>
    %127 = arith.addf %125, %126 : vector<2x32xf32>
    %128 = math.tanh %127 : vector<2x32xf32>
    %129 = arith.mulf %124, %128 : vector<2x32xf32>
    %130 = arith.index_cast %93 : i32 to index
    %c0_54 = arith.constant 0 : index
    %c0_55 = arith.constant 0 : index
    %131 = vector.load %arg2[%130, %c0_54, %c0_55] : memref<8x2x128xf32, #tpu.memory_space<vmem>>, vector<1x2x128xf32>
    %132 = vector.shape_cast %131 : vector<1x2x128xf32> to vector<2x128xf32>
    %133 = vector.extract_strided_slice %96 {offsets = [1, 0, 0], sizes = [1, 2, 128], strides = [1, 1, 1]} : vector<2x2x128xf32> to vector<1x2x128xf32>
    %134 = vector.shape_cast %133 : vector<1x2x128xf32> to vector<2x128xf32>
    %135 = arith.addf %132, %134 : vector<2x128xf32>
    %c1_56 = arith.constant 1 : index
    %c0_57 = arith.constant 0 : index
    %c0_58 = arith.constant 0 : index
    %136 = vector.load %arg7[%c1_56, %c0_57, %c0_58] : memref<2x2x32xf32, #tpu.memory_space<vmem>>, vector<1x2x32xf32>
    %137 = vector.shape_cast %136 : vector<1x2x32xf32> to vector<2x32xf32>
    %138 = vector.extract_strided_slice %135 {offsets = [0, 0], sizes = [2, 32], strides = [1, 1]} : vector<2x128xf32> to vector<2x32xf32>
    %139 = arith.negf %138 : vector<2x32xf32>
    %140 = math.exp %139 : vector<2x32xf32>
    %cst_59 = arith.constant 1.000000e+00 : f32
    %141 = vector.broadcast %cst_59 : f32 to vector<2x32xf32>
    %142 = arith.addf %141, %140 : vector<2x32xf32>
    %143 = arith.divf %141, %142 : vector<2x32xf32>
    %144 = vector.extract_strided_slice %135 {offsets = [0, 32], sizes = [2, 32], strides = [1, 1]} : vector<2x128xf32> to vector<2x32xf32>
    %145 = arith.negf %144 : vector<2x32xf32>
    %146 = math.exp %145 : vector<2x32xf32>
    %cst_60 = arith.constant 1.000000e+00 : f32
    %147 = vector.broadcast %cst_60 : f32 to vector<2x32xf32>
    %148 = arith.addf %147, %146 : vector<2x32xf32>
    %149 = arith.divf %147, %148 : vector<2x32xf32>
    %150 = vector.extract_strided_slice %135 {offsets = [0, 64], sizes = [2, 32], strides = [1, 1]} : vector<2x128xf32> to vector<2x32xf32>
    %151 = math.tanh %150 : vector<2x32xf32>
    %152 = vector.extract_strided_slice %135 {offsets = [0, 96], sizes = [2, 32], strides = [1, 1]} : vector<2x128xf32> to vector<2x32xf32>
    %153 = arith.negf %152 : vector<2x32xf32>
    %154 = math.exp %153 : vector<2x32xf32>
    %cst_61 = arith.constant 1.000000e+00 : f32
    %155 = vector.broadcast %cst_61 : f32 to vector<2x32xf32>
    %156 = arith.addf %155, %154 : vector<2x32xf32>
    %157 = arith.divf %155, %156 : vector<2x32xf32>
    %158 = arith.mulf %149, %137 : vector<2x32xf32>
    %159 = arith.mulf %143, %151 : vector<2x32xf32>
    %160 = arith.addf %158, %159 : vector<2x32xf32>
    %161 = math.tanh %160 : vector<2x32xf32>
    %162 = arith.mulf %157, %161 : vector<2x32xf32>
    %c0_62 = arith.constant 0 : index
    %c0_63 = arith.constant 0 : index
    %c0_64 = arith.constant 0 : index
    %163 = vector.load %arg6[%c0_62, %c0_63, %c0_64] : memref<2x2x32xf32, #tpu.memory_space<vmem>>, vector<1x2x32xf32>
    %164 = vector.shape_cast %163 : vector<1x2x32xf32> to vector<2x32xf32>
    %165 = vector.shape_cast %129 : vector<2x32xf32> to vector<1x2x32xf32>
    tpu.vector_store %arg6[%c0_62, %c0_63, %c0_64], %165 {strides = array<i32>} : memref<2x2x32xf32, #tpu.memory_space<vmem>>, vector<1x2x32xf32>,
    %c1_65 = arith.constant 1 : index
    %c0_66 = arith.constant 0 : index
    %c0_67 = arith.constant 0 : index
    %166 = vector.load %arg6[%c1_65, %c0_66, %c0_67] : memref<2x2x32xf32, #tpu.memory_space<vmem>>, vector<1x2x32xf32>
    %167 = vector.shape_cast %166 : vector<1x2x32xf32> to vector<2x32xf32>
    %168 = vector.shape_cast %162 : vector<2x32xf32> to vector<1x2x32xf32>
    tpu.vector_store %arg6[%c1_65, %c0_66, %c0_67], %168 {strides = array<i32>} : memref<2x2x32xf32, #tpu.memory_space<vmem>>, vector<1x2x32xf32>,
    %c0_68 = arith.constant 0 : index
    %c0_69 = arith.constant 0 : index
    %c0_70 = arith.constant 0 : index
    %169 = vector.load %arg7[%c0_68, %c0_69, %c0_70] : memref<2x2x32xf32, #tpu.memory_space<vmem>>, vector<1x2x32xf32>
    %170 = vector.shape_cast %169 : vector<1x2x32xf32> to vector<2x32xf32>
    %171 = vector.shape_cast %127 : vector<2x32xf32> to vector<1x2x32xf32>
    tpu.vector_store %arg7[%c0_68, %c0_69, %c0_70], %171 {strides = array<i32>} : memref<2x2x32xf32, #tpu.memory_space<vmem>>, vector<1x2x32xf32>,
    %c1_71 = arith.constant 1 : index
    %c0_72 = arith.constant 0 : index
    %c0_73 = arith.constant 0 : index
    %172 = vector.load %arg7[%c1_71, %c0_72, %c0_73] : memref<2x2x32xf32, #tpu.memory_space<vmem>>, vector<1x2x32xf32>
    %173 = vector.shape_cast %172 : vector<1x2x32xf32> to vector<2x32xf32>
    %174 = vector.shape_cast %160 : vector<2x32xf32> to vector<1x2x32xf32>
    tpu.vector_store %arg7[%c1_71, %c0_72, %c0_73], %174 {strides = array<i32>} : memref<2x2x32xf32, #tpu.memory_space<vmem>>, vector<1x2x32xf32>,
    %175 = arith.index_cast %c1_i32 : i32 to index
    %c0_74 = arith.constant 0 : index
    %c0_75 = arith.constant 0 : index
    %176 = vector.load %arg4[%175, %c0_74, %c0_75] : memref<8x2x32xf32, #tpu.memory_space<vmem>>, vector<1x2x32xf32>
    %177 = vector.shape_cast %176 : vector<1x2x32xf32> to vector<2x32xf32>
    %178 = vector.shape_cast %129 : vector<2x32xf32> to vector<1x2x32xf32>
    tpu.vector_store %arg4[%175, %c0_74, %c0_75], %178 {strides = array<i32>} : memref<8x2x32xf32, #tpu.memory_space<vmem>>, vector<1x2x32xf32>,
    %179 = arith.index_cast %93 : i32 to index
    %c0_76 = arith.constant 0 : index
    %c0_77 = arith.constant 0 : index
    %180 = vector.load %arg5[%179, %c0_76, %c0_77] : memref<8x2x32xf32, #tpu.memory_space<vmem>>, vector<1x2x32xf32>
    %181 = vector.shape_cast %180 : vector<1x2x32xf32> to vector<2x32xf32>
    %182 = vector.shape_cast %162 : vector<2x32xf32> to vector<1x2x32xf32>
    tpu.vector_store %arg5[%179, %c0_76, %c0_77], %182 {strides = array<i32>} : memref<8x2x32xf32, #tpu.memory_space<vmem>>, vector<1x2x32xf32>,
    %c2_i32 = arith.constant 2 : i32
    %c7_i32_78 = arith.constant 7 : i32
    %183 = arith.subi %c7_i32_78, %c2_i32 : i32
    %c0_79 = arith.constant 0 : index
    %c0_80 = arith.constant 0 : index
    %c0_81 = arith.constant 0 : index
    %184 = vector.load %arg6[%c0_79, %c0_80, %c0_81] : memref<2x2x32xf32, #tpu.memory_space<vmem>>, vector<2x2x32xf32>
    %c0_82 = arith.constant 0 : index
    %c0_83 = arith.constant 0 : index
    %c0_84 = arith.constant 0 : index
    %185 = vector.load %arg3[%c0_82, %c0_83, %c0_84] : memref<2x32x128xf32, #tpu.memory_space<vmem>>, vector<2x32x128xf32>
    "tpu.trace_start"() <{level = 10 : i32, message = "dbh,dhk->dbk"}> : () -> ()
    %cst_85 = arith.constant dense<0.000000e+00> : vector<2x2x128xf32>
    %186 = tpu.matmul %184, %185, %cst_85 {dimension_numbers = #tpu.dot_dimension_numbers<[2], [1], [1], [2], [0, 0, 0, 1, 1, 2], [0], [0]>} : vector<2x2x32xf32>, vector<2x32x128xf32>, vector<2x2x128xf32> -> vector<2x2x128xf32>
    "tpu.trace_stop"() : () -> ()
    %187 = arith.index_cast %c2_i32 : i32 to index
    %c0_86 = arith.constant 0 : index
    %c0_87 = arith.constant 0 : index
    %188 = vector.load %arg1[%187, %c0_86, %c0_87] : memref<8x2x128xf32, #tpu.memory_space<vmem>>, vector<1x2x128xf32>
    %189 = vector.shape_cast %188 : vector<1x2x128xf32> to vector<2x128xf32>
    %190 = vector.extract_strided_slice %186 {offsets = [0, 0, 0], sizes = [1, 2, 128], strides = [1, 1, 1]} : vector<2x2x128xf32> to vector<1x2x128xf32>
    %191 = vector.shape_cast %190 : vector<1x2x128xf32> to vector<2x128xf32>
    %192 = arith.addf %189, %191 : vector<2x128xf32>
    %c0_88 = arith.constant 0 : index
    %c0_89 = arith.constant 0 : index
    %c0_90 = arith.constant 0 : index
    %193 = vector.load %arg7[%c0_88, %c0_89, %c0_90] : memref<2x2x32xf32, #tpu.memory_space<vmem>>, vector<1x2x32xf32>
    %194 = vector.shape_cast %193 : vector<1x2x32xf32> to vector<2x32xf32>
    %195 = vector.extract_strided_slice %192 {offsets = [0, 0], sizes = [2, 32], strides = [1, 1]} : vector<2x128xf32> to vector<2x32xf32>
    %196 = arith.negf %195 : vector<2x32xf32>
    %197 = math.exp %196 : vector<2x32xf32>
    %cst_91 = arith.constant 1.000000e+00 : f32
    %198 = vector.broadcast %cst_91 : f32 to vector<2x32xf32>
    %199 = arith.addf %198, %197 : vector<2x32xf32>
    %200 = arith.divf %198, %199 : vector<2x32xf32>
    %201 = vector.extract_strided_slice %192 {offsets = [0, 32], sizes = [2, 32], strides = [1, 1]} : vector<2x128xf32> to vector<2x32xf32>
    %202 = arith.negf %201 : vector<2x32xf32>
    %203 = math.exp %202 : vector<2x32xf32>
    %cst_92 = arith.constant 1.000000e+00 : f32
    %204 = vector.broadcast %cst_92 : f32 to vector<2x32xf32>
    %205 = arith.addf %204, %203 : vector<2x32xf32>
    %206 = arith.divf %204, %205 : vector<2x32xf32>
    %207 = vector.extract_strided_slice %192 {offsets = [0, 64], sizes = [2, 32], strides = [1, 1]} : vector<2x128xf32> to vector<2x32xf32>
    %208 = math.tanh %207 : vector<2x32xf32>
    %209 = vector.extract_strided_slice %192 {offsets = [0, 96], sizes = [2, 32], strides = [1, 1]} : vector<2x128xf32> to vector<2x32xf32>
    %210 = arith.negf %209 : vector<2x32xf32>
    %211 = math.exp %210 : vector<2x32xf32>
    %cst_93 = arith.constant 1.000000e+00 : f32
    %212 = vector.broadcast %cst_93 : f32 to vector<2x32xf32>
    %213 = arith.addf %212, %211 : vector<2x32xf32>
    %214 = arith.divf %212, %213 : vector<2x32xf32>
    %215 = arith.mulf %206, %194 : vector<2x32xf32>
    %216 = arith.mulf %200, %208 : vector<2x32xf32>
    %217 = arith.addf %215, %216 : vector<2x32xf32>
    %218 = math.tanh %217 : vector<2x32xf32>
    %219 = arith.mulf %214, %218 : vector<2x32xf32>
    %220 = arith.index_cast %183 : i32 to index
    %c0_94 = arith.constant 0 : index
    %c0_95 = arith.constant 0 : index
    %221 = vector.load %arg2[%220, %c0_94, %c0_95] : memref<8x2x128xf32, #tpu.memory_space<vmem>>, vector<1x2x128xf32>
    %222 = vector.shape_cast %221 : vector<1x2x128xf32> to vector<2x128xf32>
    %223 = vector.extract_strided_slice %186 {offsets = [1, 0, 0], sizes = [1, 2, 128], strides = [1, 1, 1]} : vector<2x2x128xf32> to vector<1x2x128xf32>
    %224 = vector.shape_cast %223 : vector<1x2x128xf32> to vector<2x128xf32>
    %225 = arith.addf %222, %224 : vector<2x128xf32>
    %c1_96 = arith.constant 1 : index
    %c0_97 = arith.constant 0 : index
    %c0_98 = arith.constant 0 : index
    %226 = vector.load %arg7[%c1_96, %c0_97, %c0_98] : memref<2x2x32xf32, #tpu.memory_space<vmem>>, vector<1x2x32xf32>
    %227 = vector.shape_cast %226 : vector<1x2x32xf32> to vector<2x32xf32>
    %228 = vector.extract_strided_slice %225 {offsets = [0, 0], sizes = [2, 32], strides = [1, 1]} : vector<2x128xf32> to vector<2x32xf32>
    %229 = arith.negf %228 : vector<2x32xf32>
    %230 = math.exp %229 : vector<2x32xf32>
    %cst_99 = arith.constant 1.000000e+00 : f32
    %231 = vector.broadcast %cst_99 : f32 to vector<2x32xf32>
    %232 = arith.addf %231, %230 : vector<2x32xf32>
    %233 = arith.divf %231, %232 : vector<2x32xf32>
    %234 = vector.extract_strided_slice %225 {offsets = [0, 32], sizes = [2, 32], strides = [1, 1]} : vector<2x128xf32> to vector<2x32xf32>
    %235 = arith.negf %234 : vector<2x32xf32>
    %236 = math.exp %235 : vector<2x32xf32>
    %cst_100 = arith.constant 1.000000e+00 : f32
    %237 = vector.broadcast %cst_100 : f32 to vector<2x32xf32>
    %238 = arith.addf %237, %236 : vector<2x32xf32>
    %239 = arith.divf %237, %238 : vector<2x32xf32>
    %240 = vector.extract_strided_slice %225 {offsets = [0, 64], sizes = [2, 32], strides = [1, 1]} : vector<2x128xf32> to vector<2x32xf32>
    %241 = math.tanh %240 : vector<2x32xf32>
    %242 = vector.extract_strided_slice %225 {offsets = [0, 96], sizes = [2, 32], strides = [1, 1]} : vector<2x128xf32> to vector<2x32xf32>
    %243 = arith.negf %242 : vector<2x32xf32>
    %244 = math.exp %243 : vector<2x32xf32>
    %cst_101 = arith.constant 1.000000e+00 : f32
    %245 = vector.broadcast %cst_101 : f32 to vector<2x32xf32>
    %246 = arith.addf %245, %244 : vector<2x32xf32>
    %247 = arith.divf %245, %246 : vector<2x32xf32>
    %248 = arith.mulf %239, %227 : vector<2x32xf32>
    %249 = arith.mulf %233, %241 : vector<2x32xf32>
    %250 = arith.addf %248, %249 : vector<2x32xf32>
    %251 = math.tanh %250 : vector<2x32xf32>
    %252 = arith.mulf %247, %251 : vector<2x32xf32>
    %c0_102 = arith.constant 0 : index
    %c0_103 = arith.constant 0 : index
    %c0_104 = arith.constant 0 : index
    %253 = vector.load %arg6[%c0_102, %c0_103, %c0_104] : memref<2x2x32xf32, #tpu.memory_space<vmem>>, vector<1x2x32xf32>
    %254 = vector.shape_cast %253 : vector<1x2x32xf32> to vector<2x32xf32>
    %255 = vector.shape_cast %219 : vector<2x32xf32> to vector<1x2x32xf32>
    tpu.vector_store %arg6[%c0_102, %c0_103, %c0_104], %255 {strides = array<i32>} : memref<2x2x32xf32, #tpu.memory_space<vmem>>, vector<1x2x32xf32>,
    %c1_105 = arith.constant 1 : index
    %c0_106 = arith.constant 0 : index
    %c0_107 = arith.constant 0 : index
    %256 = vector.load %arg6[%c1_105, %c0_106, %c0_107] : memref<2x2x32xf32, #tpu.memory_space<vmem>>, vector<1x2x32xf32>
    %257 = vector.shape_cast %256 : vector<1x2x32xf32> to vector<2x32xf32>
    %258 = vector.shape_cast %252 : vector<2x32xf32> to vector<1x2x32xf32>
    tpu.vector_store %arg6[%c1_105, %c0_106, %c0_107], %258 {strides = array<i32>} : memref<2x2x32xf32, #tpu.memory_space<vmem>>, vector<1x2x32xf32>,
    %c0_108 = arith.constant 0 : index
    %c0_109 = arith.constant 0 : index
    %c0_110 = arith.constant 0 : index
    %259 = vector.load %arg7[%c0_108, %c0_109, %c0_110] : memref<2x2x32xf32, #tpu.memory_space<vmem>>, vector<1x2x32xf32>
    %260 = vector.shape_cast %259 : vector<1x2x32xf32> to vector<2x32xf32>
    %261 = vector.shape_cast %217 : vector<2x32xf32> to vector<1x2x32xf32>
    tpu.vector_store %arg7[%c0_108, %c0_109, %c0_110], %261 {strides = array<i32>} : memref<2x2x32xf32, #tpu.memory_space<vmem>>, vector<1x2x32xf32>,
    %c1_111 = arith.constant 1 : index
    %c0_112 = arith.constant 0 : index
    %c0_113 = arith.constant 0 : index
    %262 = vector.load %arg7[%c1_111, %c0_112, %c0_113] : memref<2x2x32xf32, #tpu.memory_space<vmem>>, vector<1x2x32xf32>
    %263 = vector.shape_cast %262 : vector<1x2x32xf32> to vector<2x32xf32>
    %264 = vector.shape_cast %250 : vector<2x32xf32> to vector<1x2x32xf32>
    tpu.vector_store %arg7[%c1_111, %c0_112, %c0_113], %264 {strides = array<i32>} : memref<2x2x32xf32, #tpu.memory_space<vmem>>, vector<1x2x32xf32>,
    %265 = arith.index_cast %c2_i32 : i32 to index
    %c0_114 = arith.constant 0 : index
    %c0_115 = arith.constant 0 : index
    %266 = vector.load %arg4[%265, %c0_114, %c0_115] : memref<8x2x32xf32, #tpu.memory_space<vmem>>, vector<1x2x32xf32>
    %267 = vector.shape_cast %266 : vector<1x2x32xf32> to vector<2x32xf32>
    %268 = vector.shape_cast %219 : vector<2x32xf32> to vector<1x2x32xf32>
    tpu.vector_store %arg4[%265, %c0_114, %c0_115], %268 {strides = array<i32>} : memref<8x2x32xf32, #tpu.memory_space<vmem>>, vector<1x2x32xf32>,
    %269 = arith.index_cast %183 : i32 to index
    %c0_116 = arith.constant 0 : index
    %c0_117 = arith.constant 0 : index
    %270 = vector.load %arg5[%269, %c0_116, %c0_117] : memref<8x2x32xf32, #tpu.memory_space<vmem>>, vector<1x2x32xf32>
    %271 = vector.shape_cast %270 : vector<1x2x32xf32> to vector<2x32xf32>
    %272 = vector.shape_cast %252 : vector<2x32xf32> to vector<1x2x32xf32>
    tpu.vector_store %arg5[%269, %c0_116, %c0_117], %272 {strides = array<i32>} : memref<8x2x32xf32, #tpu.memory_space<vmem>>, vector<1x2x32xf32>,
    %c3_i32 = arith.constant 3 : i32
    %c7_i32_118 = arith.constant 7 : i32
    %273 = arith.subi %c7_i32_118, %c3_i32 : i32
    %c0_119 = arith.constant 0 : index
    %c0_120 = arith.constant 0 : index
    %c0_121 = arith.constant 0 : index
    %274 = vector.load %arg6[%c0_119, %c0_120, %c0_121] : memref<2x2x32xf32, #tpu.memory_space<vmem>>, vector<2x2x32xf32>
    %c0_122 = arith.constant 0 : index
    %c0_123 = arith.constant 0 : index
    %c0_124 = arith.constant 0 : index
    %275 = vector.load %arg3[%c0_122, %c0_123, %c0_124] : memref<2x32x128xf32, #tpu.memory_space<vmem>>, vector<2x32x128xf32>
    "tpu.trace_start"() <{level = 10 : i32, message = "dbh,dhk->dbk"}> : () -> ()
    %cst_125 = arith.constant dense<0.000000e+00> : vector<2x2x128xf32>
    %276 = tpu.matmul %274, %275, %cst_125 {dimension_numbers = #tpu.dot_dimension_numbers<[2], [1], [1], [2], [0, 0, 0, 1, 1, 2], [0], [0]>} : vector<2x2x32xf32>, vector<2x32x128xf32>, vector<2x2x128xf32> -> vector<2x2x128xf32>
    "tpu.trace_stop"() : () -> ()
    %277 = arith.index_cast %c3_i32 : i32 to index
    %c0_126 = arith.constant 0 : index
    %c0_127 = arith.constant 0 : index
    %278 = vector.load %arg1[%277, %c0_126, %c0_127] : memref<8x2x128xf32, #tpu.memory_space<vmem>>, vector<1x2x128xf32>
    %279 = vector.shape_cast %278 : vector<1x2x128xf32> to vector<2x128xf32>
    %280 = vector.extract_strided_slice %276 {offsets = [0, 0, 0], sizes = [1, 2, 128], strides = [1, 1, 1]} : vector<2x2x128xf32> to vector<1x2x128xf32>
    %281 = vector.shape_cast %280 : vector<1x2x128xf32> to vector<2x128xf32>
    %282 = arith.addf %279, %281 : vector<2x128xf32>
    %c0_128 = arith.constant 0 : index
    %c0_129 = arith.constant 0 : index
    %c0_130 = arith.constant 0 : index
    %283 = vector.load %arg7[%c0_128, %c0_129, %c0_130] : memref<2x2x32xf32, #tpu.memory_space<vmem>>, vector<1x2x32xf32>
    %284 = vector.shape_cast %283 : vector<1x2x32xf32> to vector<2x32xf32>
    %285 = vector.extract_strided_slice %282 {offsets = [0, 0], sizes = [2, 32], strides = [1, 1]} : vector<2x128xf32> to vector<2x32xf32>
    %286 = arith.negf %285 : vector<2x32xf32>
    %287 = math.exp %286 : vector<2x32xf32>
    %cst_131 = arith.constant 1.000000e+00 : f32
    %288 = vector.broadcast %cst_131 : f32 to vector<2x32xf32>
    %289 = arith.addf %288, %287 : vector<2x32xf32>
    %290 = arith.divf %288, %289 : vector<2x32xf32>
    %291 = vector.extract_strided_slice %282 {offsets = [0, 32], sizes = [2, 32], strides = [1, 1]} : vector<2x128xf32> to vector<2x32xf32>
    %292 = arith.negf %291 : vector<2x32xf32>
    %293 = math.exp %292 : vector<2x32xf32>
    %cst_132 = arith.constant 1.000000e+00 : f32
    %294 = vector.broadcast %cst_132 : f32 to vector<2x32xf32>
    %295 = arith.addf %294, %293 : vector<2x32xf32>
    %296 = arith.divf %294, %295 : vector<2x32xf32>
    %297 = vector.extract_strided_slice %282 {offsets = [0, 64], sizes = [2, 32], strides = [1, 1]} : vector<2x128xf32> to vector<2x32xf32>
    %298 = math.tanh %297 : vector<2x32xf32>
    %299 = vector.extract_strided_slice %282 {offsets = [0, 96], sizes = [2, 32], strides = [1, 1]} : vector<2x128xf32> to vector<2x32xf32>
    %300 = arith.negf %299 : vector<2x32xf32>
    %301 = math.exp %300 : vector<2x32xf32>
    %cst_133 = arith.constant 1.000000e+00 : f32
    %302 = vector.broadcast %cst_133 : f32 to vector<2x32xf32>
    %303 = arith.addf %302, %301 : vector<2x32xf32>
    %304 = arith.divf %302, %303 : vector<2x32xf32>
    %305 = arith.mulf %296, %284 : vector<2x32xf32>
    %306 = arith.mulf %290, %298 : vector<2x32xf32>
    %307 = arith.addf %305, %306 : vector<2x32xf32>
    %308 = math.tanh %307 : vector<2x32xf32>
    %309 = arith.mulf %304, %308 : vector<2x32xf32>
    %310 = arith.index_cast %273 : i32 to index
    %c0_134 = arith.constant 0 : index
    %c0_135 = arith.constant 0 : index
    %311 = vector.load %arg2[%310, %c0_134, %c0_135] : memref<8x2x128xf32, #tpu.memory_space<vmem>>, vector<1x2x128xf32>
    %312 = vector.shape_cast %311 : vector<1x2x128xf32> to vector<2x128xf32>
    %313 = vector.extract_strided_slice %276 {offsets = [1, 0, 0], sizes = [1, 2, 128], strides = [1, 1, 1]} : vector<2x2x128xf32> to vector<1x2x128xf32>
    %314 = vector.shape_cast %313 : vector<1x2x128xf32> to vector<2x128xf32>
    %315 = arith.addf %312, %314 : vector<2x128xf32>
    %c1_136 = arith.constant 1 : index
    %c0_137 = arith.constant 0 : index
    %c0_138 = arith.constant 0 : index
    %316 = vector.load %arg7[%c1_136, %c0_137, %c0_138] : memref<2x2x32xf32, #tpu.memory_space<vmem>>, vector<1x2x32xf32>
    %317 = vector.shape_cast %316 : vector<1x2x32xf32> to vector<2x32xf32>
    %318 = vector.extract_strided_slice %315 {offsets = [0, 0], sizes = [2, 32], strides = [1, 1]} : vector<2x128xf32> to vector<2x32xf32>
    %319 = arith.negf %318 : vector<2x32xf32>
    %320 = math.exp %319 : vector<2x32xf32>
    %cst_139 = arith.constant 1.000000e+00 : f32
    %321 = vector.broadcast %cst_139 : f32 to vector<2x32xf32>
    %322 = arith.addf %321, %320 : vector<2x32xf32>
    %323 = arith.divf %321, %322 : vector<2x32xf32>
    %324 = vector.extract_strided_slice %315 {offsets = [0, 32], sizes = [2, 32], strides = [1, 1]} : vector<2x128xf32> to vector<2x32xf32>
    %325 = arith.negf %324 : vector<2x32xf32>
    %326 = math.exp %325 : vector<2x32xf32>
    %cst_140 = arith.constant 1.000000e+00 : f32
    %327 = vector.broadcast %cst_140 : f32 to vector<2x32xf32>
    %328 = arith.addf %327, %326 : vector<2x32xf32>
    %329 = arith.divf %327, %328 : vector<2x32xf32>
    %330 = vector.extract_strided_slice %315 {offsets = [0, 64], sizes = [2, 32], strides = [1, 1]} : vector<2x128xf32> to vector<2x32xf32>
    %331 = math.tanh %330 : vector<2x32xf32>
    %332 = vector.extract_strided_slice %315 {offsets = [0, 96], sizes = [2, 32], strides = [1, 1]} : vector<2x128xf32> to vector<2x32xf32>
    %333 = arith.negf %332 : vector<2x32xf32>
    %334 = math.exp %333 : vector<2x32xf32>
    %cst_141 = arith.constant 1.000000e+00 : f32
    %335 = vector.broadcast %cst_141 : f32 to vector<2x32xf32>
    %336 = arith.addf %335, %334 : vector<2x32xf32>
    %337 = arith.divf %335, %336 : vector<2x32xf32>
    %338 = arith.mulf %329, %317 : vector<2x32xf32>
    %339 = arith.mulf %323, %331 : vector<2x32xf32>
    %340 = arith.addf %338, %339 : vector<2x32xf32>
    %341 = math.tanh %340 : vector<2x32xf32>
    %342 = arith.mulf %337, %341 : vector<2x32xf32>
    %c0_142 = arith.constant 0 : index
    %c0_143 = arith.constant 0 : index
    %c0_144 = arith.constant 0 : index
    %343 = vector.load %arg6[%c0_142, %c0_143, %c0_144] : memref<2x2x32xf32, #tpu.memory_space<vmem>>, vector<1x2x32xf32>
    %344 = vector.shape_cast %343 : vector<1x2x32xf32> to vector<2x32xf32>
    %345 = vector.shape_cast %309 : vector<2x32xf32> to vector<1x2x32xf32>
    tpu.vector_store %arg6[%c0_142, %c0_143, %c0_144], %345 {strides = array<i32>} : memref<2x2x32xf32, #tpu.memory_space<vmem>>, vector<1x2x32xf32>,
    %c1_145 = arith.constant 1 : index
    %c0_146 = arith.constant 0 : index
    %c0_147 = arith.constant 0 : index
    %346 = vector.load %arg6[%c1_145, %c0_146, %c0_147] : memref<2x2x32xf32, #tpu.memory_space<vmem>>, vector<1x2x32xf32>
    %347 = vector.shape_cast %346 : vector<1x2x32xf32> to vector<2x32xf32>
    %348 = vector.shape_cast %342 : vector<2x32xf32> to vector<1x2x32xf32>
    tpu.vector_store %arg6[%c1_145, %c0_146, %c0_147], %348 {strides = array<i32>} : memref<2x2x32xf32, #tpu.memory_space<vmem>>, vector<1x2x32xf32>,
    %c0_148 = arith.constant 0 : index
    %c0_149 = arith.constant 0 : index
    %c0_150 = arith.constant 0 : index
    %349 = vector.load %arg7[%c0_148, %c0_149, %c0_150] : memref<2x2x32xf32, #tpu.memory_space<vmem>>, vector<1x2x32xf32>
    %350 = vector.shape_cast %349 : vector<1x2x32xf32> to vector<2x32xf32>
    %351 = vector.shape_cast %307 : vector<2x32xf32> to vector<1x2x32xf32>
    tpu.vector_store %arg7[%c0_148, %c0_149, %c0_150], %351 {strides = array<i32>} : memref<2x2x32xf32, #tpu.memory_space<vmem>>, vector<1x2x32xf32>,
    %c1_151 = arith.constant 1 : index
    %c0_152 = arith.constant 0 : index
    %c0_153 = arith.constant 0 : index
    %352 = vector.load %arg7[%c1_151, %c0_152, %c0_153] : memref<2x2x32xf32, #tpu.memory_space<vmem>>, vector<1x2x32xf32>
    %353 = vector.shape_cast %352 : vector<1x2x32xf32> to vector<2x32xf32>
    %354 = vector.shape_cast %340 : vector<2x32xf32> to vector<1x2x32xf32>
    tpu.vector_store %arg7[%c1_151, %c0_152, %c0_153], %354 {strides = array<i32>} : memref<2x2x32xf32, #tpu.memory_space<vmem>>, vector<1x2x32xf32>,
    %355 = arith.index_cast %c3_i32 : i32 to index
    %c0_154 = arith.constant 0 : index
    %c0_155 = arith.constant 0 : index
    %356 = vector.load %arg4[%355, %c0_154, %c0_155] : memref<8x2x32xf32, #tpu.memory_space<vmem>>, vector<1x2x32xf32>
    %357 = vector.shape_cast %356 : vector<1x2x32xf32> to vector<2x32xf32>
    %358 = vector.shape_cast %309 : vector<2x32xf32> to vector<1x2x32xf32>
    tpu.vector_store %arg4[%355, %c0_154, %c0_155], %358 {strides = array<i32>} : memref<8x2x32xf32, #tpu.memory_space<vmem>>, vector<1x2x32xf32>,
    %359 = arith.index_cast %273 : i32 to index
    %c0_156 = arith.constant 0 : index
    %c0_157 = arith.constant 0 : index
    %360 = vector.load %arg5[%359, %c0_156, %c0_157] : memref<8x2x32xf32, #tpu.memory_space<vmem>>, vector<1x2x32xf32>
    %361 = vector.shape_cast %360 : vector<1x2x32xf32> to vector<2x32xf32>
    %362 = vector.shape_cast %342 : vector<2x32xf32> to vector<1x2x32xf32>
    tpu.vector_store %arg5[%359, %c0_156, %c0_157], %362 {strides = array<i32>} : memref<8x2x32xf32, #tpu.memory_space<vmem>>, vector<1x2x32xf32>,
    %c4_i32 = arith.constant 4 : i32
    %c7_i32_158 = arith.constant 7 : i32
    %363 = arith.subi %c7_i32_158, %c4_i32 : i32
    %c0_159 = arith.constant 0 : index
    %c0_160 = arith.constant 0 : index
    %c0_161 = arith.constant 0 : index
    %364 = vector.load %arg6[%c0_159, %c0_160, %c0_161] : memref<2x2x32xf32, #tpu.memory_space<vmem>>, vector<2x2x32xf32>
    %c0_162 = arith.constant 0 : index
    %c0_163 = arith.constant 0 : index
    %c0_164 = arith.constant 0 : index
    %365 = vector.load %arg3[%c0_162, %c0_163, %c0_164] : memref<2x32x128xf32, #tpu.memory_space<vmem>>, vector<2x32x128xf32>
    "tpu.trace_start"() <{level = 10 : i32, message = "dbh,dhk->dbk"}> : () -> ()
    %cst_165 = arith.constant dense<0.000000e+00> : vector<2x2x128xf32>
    %366 = tpu.matmul %364, %365, %cst_165 {dimension_numbers = #tpu.dot_dimension_numbers<[2], [1], [1], [2], [0, 0, 0, 1, 1, 2], [0], [0]>} : vector<2x2x32xf32>, vector<2x32x128xf32>, vector<2x2x128xf32> -> vector<2x2x128xf32>
    "tpu.trace_stop"() : () -> ()
    %367 = arith.index_cast %c4_i32 : i32 to index
    %c0_166 = arith.constant 0 : index
    %c0_167 = arith.constant 0 : index
    %368 = vector.load %arg1[%367, %c0_166, %c0_167] : memref<8x2x128xf32, #tpu.memory_space<vmem>>, vector<1x2x128xf32>
    %369 = vector.shape_cast %368 : vector<1x2x128xf32> to vector<2x128xf32>
    %370 = vector.extract_strided_slice %366 {offsets = [0, 0, 0], sizes = [1, 2, 128], strides = [1, 1, 1]} : vector<2x2x128xf32> to vector<1x2x128xf32>
    %371 = vector.shape_cast %370 : vector<1x2x128xf32> to vector<2x128xf32>
    %372 = arith.addf %369, %371 : vector<2x128xf32>
    %c0_168 = arith.constant 0 : index
    %c0_169 = arith.constant 0 : index
    %c0_170 = arith.constant 0 : index
    %373 = vector.load %arg7[%c0_168, %c0_169, %c0_170] : memref<2x2x32xf32, #tpu.memory_space<vmem>>, vector<1x2x32xf32>
    %374 = vector.shape_cast %373 : vector<1x2x32xf32> to vector<2x32xf32>
    %375 = vector.extract_strided_slice %372 {offsets = [0, 0], sizes = [2, 32], strides = [1, 1]} : vector<2x128xf32> to vector<2x32xf32>
    %376 = arith.negf %375 : vector<2x32xf32>
    %377 = math.exp %376 : vector<2x32xf32>
    %cst_171 = arith.constant 1.000000e+00 : f32
    %378 = vector.broadcast %cst_171 : f32 to vector<2x32xf32>
    %379 = arith.addf %378, %377 : vector<2x32xf32>
    %380 = arith.divf %378, %379 : vector<2x32xf32>
    %381 = vector.extract_strided_slice %372 {offsets = [0, 32], sizes = [2, 32], strides = [1, 1]} : vector<2x128xf32> to vector<2x32xf32>
    %382 = arith.negf %381 : vector<2x32xf32>
    %383 = math.exp %382 : vector<2x32xf32>
    %cst_172 = arith.constant 1.000000e+00 : f32
    %384 = vector.broadcast %cst_172 : f32 to vector<2x32xf32>
    %385 = arith.addf %384, %383 : vector<2x32xf32>
    %386 = arith.divf %384, %385 : vector<2x32xf32>
    %387 = vector.extract_strided_slice %372 {offsets = [0, 64], sizes = [2, 32], strides = [1, 1]} : vector<2x128xf32> to vector<2x32xf32>
    %388 = math.tanh %387 : vector<2x32xf32>
    %389 = vector.extract_strided_slice %372 {offsets = [0, 96], sizes = [2, 32], strides = [1, 1]} : vector<2x128xf32> to vector<2x32xf32>
    %390 = arith.negf %389 : vector<2x32xf32>
    %391 = math.exp %390 : vector<2x32xf32>
    %cst_173 = arith.constant 1.000000e+00 : f32
    %392 = vector.broadcast %cst_173 : f32 to vector<2x32xf32>
    %393 = arith.addf %392, %391 : vector<2x32xf32>
    %394 = arith.divf %392, %393 : vector<2x32xf32>
    %395 = arith.mulf %386, %374 : vector<2x32xf32>
    %396 = arith.mulf %380, %388 : vector<2x32xf32>
    %397 = arith.addf %395, %396 : vector<2x32xf32>
    %398 = math.tanh %397 : vector<2x32xf32>
    %399 = arith.mulf %394, %398 : vector<2x32xf32>
    %400 = arith.index_cast %363 : i32 to index
    %c0_174 = arith.constant 0 : index
    %c0_175 = arith.constant 0 : index
    %401 = vector.load %arg2[%400, %c0_174, %c0_175] : memref<8x2x128xf32, #tpu.memory_space<vmem>>, vector<1x2x128xf32>
    %402 = vector.shape_cast %401 : vector<1x2x128xf32> to vector<2x128xf32>
    %403 = vector.extract_strided_slice %366 {offsets = [1, 0, 0], sizes = [1, 2, 128], strides = [1, 1, 1]} : vector<2x2x128xf32> to vector<1x2x128xf32>
    %404 = vector.shape_cast %403 : vector<1x2x128xf32> to vector<2x128xf32>
    %405 = arith.addf %402, %404 : vector<2x128xf32>
    %c1_176 = arith.constant 1 : index
    %c0_177 = arith.constant 0 : index
    %c0_178 = arith.constant 0 : index
    %406 = vector.load %arg7[%c1_176, %c0_177, %c0_178] : memref<2x2x32xf32, #tpu.memory_space<vmem>>, vector<1x2x32xf32>
    %407 = vector.shape_cast %406 : vector<1x2x32xf32> to vector<2x32xf32>
    %408 = vector.extract_strided_slice %405 {offsets = [0, 0], sizes = [2, 32], strides = [1, 1]} : vector<2x128xf32> to vector<2x32xf32>
    %409 = arith.negf %408 : vector<2x32xf32>
    %410 = math.exp %409 : vector<2x32xf32>
    %cst_179 = arith.constant 1.000000e+00 : f32
    %411 = vector.broadcast %cst_179 : f32 to vector<2x32xf32>
    %412 = arith.addf %411, %410 : vector<2x32xf32>
    %413 = arith.divf %411, %412 : vector<2x32xf32>
    %414 = vector.extract_strided_slice %405 {offsets = [0, 32], sizes = [2, 32], strides = [1, 1]} : vector<2x128xf32> to vector<2x32xf32>
    %415 = arith.negf %414 : vector<2x32xf32>
    %416 = math.exp %415 : vector<2x32xf32>
    %cst_180 = arith.constant 1.000000e+00 : f32
    %417 = vector.broadcast %cst_180 : f32 to vector<2x32xf32>
    %418 = arith.addf %417, %416 : vector<2x32xf32>
    %419 = arith.divf %417, %418 : vector<2x32xf32>
    %420 = vector.extract_strided_slice %405 {offsets = [0, 64], sizes = [2, 32], strides = [1, 1]} : vector<2x128xf32> to vector<2x32xf32>
    %421 = math.tanh %420 : vector<2x32xf32>
    %422 = vector.extract_strided_slice %405 {offsets = [0, 96], sizes = [2, 32], strides = [1, 1]} : vector<2x128xf32> to vector<2x32xf32>
    %423 = arith.negf %422 : vector<2x32xf32>
    %424 = math.exp %423 : vector<2x32xf32>
    %cst_181 = arith.constant 1.000000e+00 : f32
    %425 = vector.broadcast %cst_181 : f32 to vector<2x32xf32>
    %426 = arith.addf %425, %424 : vector<2x32xf32>
    %427 = arith.divf %425, %426 : vector<2x32xf32>
    %428 = arith.mulf %419, %407 : vector<2x32xf32>
    %429 = arith.mulf %413, %421 : vector<2x32xf32>
    %430 = arith.addf %428, %429 : vector<2x32xf32>
    %431 = math.tanh %430 : vector<2x32xf32>
    %432 = arith.mulf %427, %431 : vector<2x32xf32>
    %c0_182 = arith.constant 0 : index
    %c0_183 = arith.constant 0 : index
    %c0_184 = arith.constant 0 : index
    %433 = vector.load %arg6[%c0_182, %c0_183, %c0_184] : memref<2x2x32xf32, #tpu.memory_space<vmem>>, vector<1x2x32xf32>
    %434 = vector.shape_cast %433 : vector<1x2x32xf32> to vector<2x32xf32>
    %435 = vector.shape_cast %399 : vector<2x32xf32> to vector<1x2x32xf32>
    tpu.vector_store %arg6[%c0_182, %c0_183, %c0_184], %435 {strides = array<i32>} : memref<2x2x32xf32, #tpu.memory_space<vmem>>, vector<1x2x32xf32>,
    %c1_185 = arith.constant 1 : index
    %c0_186 = arith.constant 0 : index
    %c0_187 = arith.constant 0 : index
    %436 = vector.load %arg6[%c1_185, %c0_186, %c0_187] : memref<2x2x32xf32, #tpu.memory_space<vmem>>, vector<1x2x32xf32>
    %437 = vector.shape_cast %436 : vector<1x2x32xf32> to vector<2x32xf32>
    %438 = vector.shape_cast %432 : vector<2x32xf32> to vector<1x2x32xf32>
    tpu.vector_store %arg6[%c1_185, %c0_186, %c0_187], %438 {strides = array<i32>} : memref<2x2x32xf32, #tpu.memory_space<vmem>>, vector<1x2x32xf32>,
    %c0_188 = arith.constant 0 : index
    %c0_189 = arith.constant 0 : index
    %c0_190 = arith.constant 0 : index
    %439 = vector.load %arg7[%c0_188, %c0_189, %c0_190] : memref<2x2x32xf32, #tpu.memory_space<vmem>>, vector<1x2x32xf32>
    %440 = vector.shape_cast %439 : vector<1x2x32xf32> to vector<2x32xf32>
    %441 = vector.shape_cast %397 : vector<2x32xf32> to vector<1x2x32xf32>
    tpu.vector_store %arg7[%c0_188, %c0_189, %c0_190], %441 {strides = array<i32>} : memref<2x2x32xf32, #tpu.memory_space<vmem>>, vector<1x2x32xf32>,
    %c1_191 = arith.constant 1 : index
    %c0_192 = arith.constant 0 : index
    %c0_193 = arith.constant 0 : index
    %442 = vector.load %arg7[%c1_191, %c0_192, %c0_193] : memref<2x2x32xf32, #tpu.memory_space<vmem>>, vector<1x2x32xf32>
    %443 = vector.shape_cast %442 : vector<1x2x32xf32> to vector<2x32xf32>
    %444 = vector.shape_cast %430 : vector<2x32xf32> to vector<1x2x32xf32>
    tpu.vector_store %arg7[%c1_191, %c0_192, %c0_193], %444 {strides = array<i32>} : memref<2x2x32xf32, #tpu.memory_space<vmem>>, vector<1x2x32xf32>,
    %445 = arith.index_cast %c4_i32 : i32 to index
    %c0_194 = arith.constant 0 : index
    %c0_195 = arith.constant 0 : index
    %446 = vector.load %arg4[%445, %c0_194, %c0_195] : memref<8x2x32xf32, #tpu.memory_space<vmem>>, vector<1x2x32xf32>
    %447 = vector.shape_cast %446 : vector<1x2x32xf32> to vector<2x32xf32>
    %448 = vector.shape_cast %399 : vector<2x32xf32> to vector<1x2x32xf32>
    tpu.vector_store %arg4[%445, %c0_194, %c0_195], %448 {strides = array<i32>} : memref<8x2x32xf32, #tpu.memory_space<vmem>>, vector<1x2x32xf32>,
    %449 = arith.index_cast %363 : i32 to index
    %c0_196 = arith.constant 0 : index
    %c0_197 = arith.constant 0 : index
    %450 = vector.load %arg5[%449, %c0_196, %c0_197] : memref<8x2x32xf32, #tpu.memory_space<vmem>>, vector<1x2x32xf32>
    %451 = vector.shape_cast %450 : vector<1x2x32xf32> to vector<2x32xf32>
    %452 = vector.shape_cast %432 : vector<2x32xf32> to vector<1x2x32xf32>
    tpu.vector_store %arg5[%449, %c0_196, %c0_197], %452 {strides = array<i32>} : memref<8x2x32xf32, #tpu.memory_space<vmem>>, vector<1x2x32xf32>,
    %c5_i32 = arith.constant 5 : i32
    %c7_i32_198 = arith.constant 7 : i32
    %453 = arith.subi %c7_i32_198, %c5_i32 : i32
    %c0_199 = arith.constant 0 : index
    %c0_200 = arith.constant 0 : index
    %c0_201 = arith.constant 0 : index
    %454 = vector.load %arg6[%c0_199, %c0_200, %c0_201] : memref<2x2x32xf32, #tpu.memory_space<vmem>>, vector<2x2x32xf32>
    %c0_202 = arith.constant 0 : index
    %c0_203 = arith.constant 0 : index
    %c0_204 = arith.constant 0 : index
    %455 = vector.load %arg3[%c0_202, %c0_203, %c0_204] : memref<2x32x128xf32, #tpu.memory_space<vmem>>, vector<2x32x128xf32>
    "tpu.trace_start"() <{level = 10 : i32, message = "dbh,dhk->dbk"}> : () -> ()
    %cst_205 = arith.constant dense<0.000000e+00> : vector<2x2x128xf32>
    %456 = tpu.matmul %454, %455, %cst_205 {dimension_numbers = #tpu.dot_dimension_numbers<[2], [1], [1], [2], [0, 0, 0, 1, 1, 2], [0], [0]>} : vector<2x2x32xf32>, vector<2x32x128xf32>, vector<2x2x128xf32> -> vector<2x2x128xf32>
    "tpu.trace_stop"() : () -> ()
    %457 = arith.index_cast %c5_i32 : i32 to index
    %c0_206 = arith.constant 0 : index
    %c0_207 = arith.constant 0 : index
    %458 = vector.load %arg1[%457, %c0_206, %c0_207] : memref<8x2x128xf32, #tpu.memory_space<vmem>>, vector<1x2x128xf32>
    %459 = vector.shape_cast %458 : vector<1x2x128xf32> to vector<2x128xf32>
    %460 = vector.extract_strided_slice %456 {offsets = [0, 0, 0], sizes = [1, 2, 128], strides = [1, 1, 1]} : vector<2x2x128xf32> to vector<1x2x128xf32>
    %461 = vector.shape_cast %460 : vector<1x2x128xf32> to vector<2x128xf32>
    %462 = arith.addf %459, %461 : vector<2x128xf32>
    %c0_208 = arith.constant 0 : index
    %c0_209 = arith.constant 0 : index
    %c0_210 = arith.constant 0 : index
    %463 = vector.load %arg7[%c0_208, %c0_209, %c0_210] : memref<2x2x32xf32, #tpu.memory_space<vmem>>, vector<1x2x32xf32>
    %464 = vector.shape_cast %463 : vector<1x2x32xf32> to vector<2x32xf32>
    %465 = vector.extract_strided_slice %462 {offsets = [0, 0], sizes = [2, 32], strides = [1, 1]} : vector<2x128xf32> to vector<2x32xf32>
    %466 = arith.negf %465 : vector<2x32xf32>
    %467 = math.exp %466 : vector<2x32xf32>
    %cst_211 = arith.constant 1.000000e+00 : f32
    %468 = vector.broadcast %cst_211 : f32 to vector<2x32xf32>
    %469 = arith.addf %468, %467 : vector<2x32xf32>
    %470 = arith.divf %468, %469 : vector<2x32xf32>
    %471 = vector.extract_strided_slice %462 {offsets = [0, 32], sizes = [2, 32], strides = [1, 1]} : vector<2x128xf32> to vector<2x32xf32>
    %472 = arith.negf %471 : vector<2x32xf32>
    %473 = math.exp %472 : vector<2x32xf32>
    %cst_212 = arith.constant 1.000000e+00 : f32
    %474 = vector.broadcast %cst_212 : f32 to vector<2x32xf32>
    %475 = arith.addf %474, %473 : vector<2x32xf32>
    %476 = arith.divf %474, %475 : vector<2x32xf32>
    %477 = vector.extract_strided_slice %462 {offsets = [0, 64], sizes = [2, 32], strides = [1, 1]} : vector<2x128xf32> to vector<2x32xf32>
    %478 = math.tanh %477 : vector<2x32xf32>
    %479 = vector.extract_strided_slice %462 {offsets = [0, 96], sizes = [2, 32], strides = [1, 1]} : vector<2x128xf32> to vector<2x32xf32>
    %480 = arith.negf %479 : vector<2x32xf32>
    %481 = math.exp %480 : vector<2x32xf32>
    %cst_213 = arith.constant 1.000000e+00 : f32
    %482 = vector.broadcast %cst_213 : f32 to vector<2x32xf32>
    %483 = arith.addf %482, %481 : vector<2x32xf32>
    %484 = arith.divf %482, %483 : vector<2x32xf32>
    %485 = arith.mulf %476, %464 : vector<2x32xf32>
    %486 = arith.mulf %470, %478 : vector<2x32xf32>
    %487 = arith.addf %485, %486 : vector<2x32xf32>
    %488 = math.tanh %487 : vector<2x32xf32>
    %489 = arith.mulf %484, %488 : vector<2x32xf32>
    %490 = arith.index_cast %453 : i32 to index
    %c0_214 = arith.constant 0 : index
    %c0_215 = arith.constant 0 : index
    %491 = vector.load %arg2[%490, %c0_214, %c0_215] : memref<8x2x128xf32, #tpu.memory_space<vmem>>, vector<1x2x128xf32>
    %492 = vector.shape_cast %491 : vector<1x2x128xf32> to vector<2x128xf32>
    %493 = vector.extract_strided_slice %456 {offsets = [1, 0, 0], sizes = [1, 2, 128], strides = [1, 1, 1]} : vector<2x2x128xf32> to vector<1x2x128xf32>
    %494 = vector.shape_cast %493 : vector<1x2x128xf32> to vector<2x128xf32>
    %495 = arith.addf %492, %494 : vector<2x128xf32>
    %c1_216 = arith.constant 1 : index
    %c0_217 = arith.constant 0 : index
    %c0_218 = arith.constant 0 : index
    %496 = vector.load %arg7[%c1_216, %c0_217, %c0_218] : memref<2x2x32xf32, #tpu.memory_space<vmem>>, vector<1x2x32xf32>
    %497 = vector.shape_cast %496 : vector<1x2x32xf32> to vector<2x32xf32>
    %498 = vector.extract_strided_slice %495 {offsets = [0, 0], sizes = [2, 32], strides = [1, 1]} : vector<2x128xf32> to vector<2x32xf32>
    %499 = arith.negf %498 : vector<2x32xf32>
    %500 = math.exp %499 : vector<2x32xf32>
    %cst_219 = arith.constant 1.000000e+00 : f32
    %501 = vector.broadcast %cst_219 : f32 to vector<2x32xf32>
    %502 = arith.addf %501, %500 : vector<2x32xf32>
    %503 = arith.divf %501, %502 : vector<2x32xf32>
    %504 = vector.extract_strided_slice %495 {offsets = [0, 32], sizes = [2, 32], strides = [1, 1]} : vector<2x128xf32> to vector<2x32xf32>
    %505 = arith.negf %504 : vector<2x32xf32>
    %506 = math.exp %505 : vector<2x32xf32>
    %cst_220 = arith.constant 1.000000e+00 : f32
    %507 = vector.broadcast %cst_220 : f32 to vector<2x32xf32>
    %508 = arith.addf %507, %506 : vector<2x32xf32>
    %509 = arith.divf %507, %508 : vector<2x32xf32>
    %510 = vector.extract_strided_slice %495 {offsets = [0, 64], sizes = [2, 32], strides = [1, 1]} : vector<2x128xf32> to vector<2x32xf32>
    %511 = math.tanh %510 : vector<2x32xf32>
    %512 = vector.extract_strided_slice %495 {offsets = [0, 96], sizes = [2, 32], strides = [1, 1]} : vector<2x128xf32> to vector<2x32xf32>
    %513 = arith.negf %512 : vector<2x32xf32>
    %514 = math.exp %513 : vector<2x32xf32>
    %cst_221 = arith.constant 1.000000e+00 : f32
    %515 = vector.broadcast %cst_221 : f32 to vector<2x32xf32>
    %516 = arith.addf %515, %514 : vector<2x32xf32>
    %517 = arith.divf %515, %516 : vector<2x32xf32>
    %518 = arith.mulf %509, %497 : vector<2x32xf32>
    %519 = arith.mulf %503, %511 : vector<2x32xf32>
    %520 = arith.addf %518, %519 : vector<2x32xf32>
    %521 = math.tanh %520 : vector<2x32xf32>
    %522 = arith.mulf %517, %521 : vector<2x32xf32>
    %c0_222 = arith.constant 0 : index
    %c0_223 = arith.constant 0 : index
    %c0_224 = arith.constant 0 : index
    %523 = vector.load %arg6[%c0_222, %c0_223, %c0_224] : memref<2x2x32xf32, #tpu.memory_space<vmem>>, vector<1x2x32xf32>
    %524 = vector.shape_cast %523 : vector<1x2x32xf32> to vector<2x32xf32>
    %525 = vector.shape_cast %489 : vector<2x32xf32> to vector<1x2x32xf32>
    tpu.vector_store %arg6[%c0_222, %c0_223, %c0_224], %525 {strides = array<i32>} : memref<2x2x32xf32, #tpu.memory_space<vmem>>, vector<1x2x32xf32>,
    %c1_225 = arith.constant 1 : index
    %c0_226 = arith.constant 0 : index
    %c0_227 = arith.constant 0 : index
    %526 = vector.load %arg6[%c1_225, %c0_226, %c0_227] : memref<2x2x32xf32, #tpu.memory_space<vmem>>, vector<1x2x32xf32>
    %527 = vector.shape_cast %526 : vector<1x2x32xf32> to vector<2x32xf32>
    %528 = vector.shape_cast %522 : vector<2x32xf32> to vector<1x2x32xf32>
    tpu.vector_store %arg6[%c1_225, %c0_226, %c0_227], %528 {strides = array<i32>} : memref<2x2x32xf32, #tpu.memory_space<vmem>>, vector<1x2x32xf32>,
    %c0_228 = arith.constant 0 : index
    %c0_229 = arith.constant 0 : index
    %c0_230 = arith.constant 0 : index
    %529 = vector.load %arg7[%c0_228, %c0_229, %c0_230] : memref<2x2x32xf32, #tpu.memory_space<vmem>>, vector<1x2x32xf32>
    %530 = vector.shape_cast %529 : vector<1x2x32xf32> to vector<2x32xf32>
    %531 = vector.shape_cast %487 : vector<2x32xf32> to vector<1x2x32xf32>
    tpu.vector_store %arg7[%c0_228, %c0_229, %c0_230], %531 {strides = array<i32>} : memref<2x2x32xf32, #tpu.memory_space<vmem>>, vector<1x2x32xf32>,
    %c1_231 = arith.constant 1 : index
    %c0_232 = arith.constant 0 : index
    %c0_233 = arith.constant 0 : index
    %532 = vector.load %arg7[%c1_231, %c0_232, %c0_233] : memref<2x2x32xf32, #tpu.memory_space<vmem>>, vector<1x2x32xf32>
    %533 = vector.shape_cast %532 : vector<1x2x32xf32> to vector<2x32xf32>
    %534 = vector.shape_cast %520 : vector<2x32xf32> to vector<1x2x32xf32>
    tpu.vector_store %arg7[%c1_231, %c0_232, %c0_233], %534 {strides = array<i32>} : memref<2x2x32xf32, #tpu.memory_space<vmem>>, vector<1x2x32xf32>,
    %535 = arith.index_cast %c5_i32 : i32 to index
    %c0_234 = arith.constant 0 : index
    %c0_235 = arith.constant 0 : index
    %536 = vector.load %arg4[%535, %c0_234, %c0_235] : memref<8x2x32xf32, #tpu.memory_space<vmem>>, vector<1x2x32xf32>
    %537 = vector.shape_cast %536 : vector<1x2x32xf32> to vector<2x32xf32>
    %538 = vector.shape_cast %489 : vector<2x32xf32> to vector<1x2x32xf32>
    tpu.vector_store %arg4[%535, %c0_234, %c0_235], %538 {strides = array<i32>} : memref<8x2x32xf32, #tpu.memory_space<vmem>>, vector<1x2x32xf32>,
    %539 = arith.index_cast %453 : i32 to index
    %c0_236 = arith.constant 0 : index
    %c0_237 = arith.constant 0 : index
    %540 = vector.load %arg5[%539, %c0_236, %c0_237] : memref<8x2x32xf32, #tpu.memory_space<vmem>>, vector<1x2x32xf32>
    %541 = vector.shape_cast %540 : vector<1x2x32xf32> to vector<2x32xf32>
    %542 = vector.shape_cast %522 : vector<2x32xf32> to vector<1x2x32xf32>
    tpu.vector_store %arg5[%539, %c0_236, %c0_237], %542 {strides = array<i32>} : memref<8x2x32xf32, #tpu.memory_space<vmem>>, vector<1x2x32xf32>,
    %c6_i32 = arith.constant 6 : i32
    %c7_i32_238 = arith.constant 7 : i32
    %543 = arith.subi %c7_i32_238, %c6_i32 : i32
    %c0_239 = arith.constant 0 : index
    %c0_240 = arith.constant 0 : index
    %c0_241 = arith.constant 0 : index
    %544 = vector.load %arg6[%c0_239, %c0_240, %c0_241] : memref<2x2x32xf32, #tpu.memory_space<vmem>>, vector<2x2x32xf32>
    %c0_242 = arith.constant 0 : index
    %c0_243 = arith.constant 0 : index
    %c0_244 = arith.constant 0 : index
    %545 = vector.load %arg3[%c0_242, %c0_243, %c0_244] : memref<2x32x128xf32, #tpu.memory_space<vmem>>, vector<2x32x128xf32>
    "tpu.trace_start"() <{level = 10 : i32, message = "dbh,dhk->dbk"}> : () -> ()
    %cst_245 = arith.constant dense<0.000000e+00> : vector<2x2x128xf32>
    %546 = tpu.matmul %544, %545, %cst_245 {dimension_numbers = #tpu.dot_dimension_numbers<[2], [1], [1], [2], [0, 0, 0, 1, 1, 2], [0], [0]>} : vector<2x2x32xf32>, vector<2x32x128xf32>, vector<2x2x128xf32> -> vector<2x2x128xf32>
    "tpu.trace_stop"() : () -> ()
    %547 = arith.index_cast %c6_i32 : i32 to index
    %c0_246 = arith.constant 0 : index
    %c0_247 = arith.constant 0 : index
    %548 = vector.load %arg1[%547, %c0_246, %c0_247] : memref<8x2x128xf32, #tpu.memory_space<vmem>>, vector<1x2x128xf32>
    %549 = vector.shape_cast %548 : vector<1x2x128xf32> to vector<2x128xf32>
    %550 = vector.extract_strided_slice %546 {offsets = [0, 0, 0], sizes = [1, 2, 128], strides = [1, 1, 1]} : vector<2x2x128xf32> to vector<1x2x128xf32>
    %551 = vector.shape_cast %550 : vector<1x2x128xf32> to vector<2x128xf32>
    %552 = arith.addf %549, %551 : vector<2x128xf32>
    %c0_248 = arith.constant 0 : index
    %c0_249 = arith.constant 0 : index
    %c0_250 = arith.constant 0 : index
    %553 = vector.load %arg7[%c0_248, %c0_249, %c0_250] : memref<2x2x32xf32, #tpu.memory_space<vmem>>, vector<1x2x32xf32>
    %554 = vector.shape_cast %553 : vector<1x2x32xf32> to vector<2x32xf32>
    %555 = vector.extract_strided_slice %552 {offsets = [0, 0], sizes = [2, 32], strides = [1, 1]} : vector<2x128xf32> to vector<2x32xf32>
    %556 = arith.negf %555 : vector<2x32xf32>
    %557 = math.exp %556 : vector<2x32xf32>
    %cst_251 = arith.constant 1.000000e+00 : f32
    %558 = vector.broadcast %cst_251 : f32 to vector<2x32xf32>
    %559 = arith.addf %558, %557 : vector<2x32xf32>
    %560 = arith.divf %558, %559 : vector<2x32xf32>
    %561 = vector.extract_strided_slice %552 {offsets = [0, 32], sizes = [2, 32], strides = [1, 1]} : vector<2x128xf32> to vector<2x32xf32>
    %562 = arith.negf %561 : vector<2x32xf32>
    %563 = math.exp %562 : vector<2x32xf32>
    %cst_252 = arith.constant 1.000000e+00 : f32
    %564 = vector.broadcast %cst_252 : f32 to vector<2x32xf32>
    %565 = arith.addf %564, %563 : vector<2x32xf32>
    %566 = arith.divf %564, %565 : vector<2x32xf32>
    %567 = vector.extract_strided_slice %552 {offsets = [0, 64], sizes = [2, 32], strides = [1, 1]} : vector<2x128xf32> to vector<2x32xf32>
    %568 = math.tanh %567 : vector<2x32xf32>
    %569 = vector.extract_strided_slice %552 {offsets = [0, 96], sizes = [2, 32], strides = [1, 1]} : vector<2x128xf32> to vector<2x32xf32>
    %570 = arith.negf %569 : vector<2x32xf32>
    %571 = math.exp %570 : vector<2x32xf32>
    %cst_253 = arith.constant 1.000000e+00 : f32
    %572 = vector.broadcast %cst_253 : f32 to vector<2x32xf32>
    %573 = arith.addf %572, %571 : vector<2x32xf32>
    %574 = arith.divf %572, %573 : vector<2x32xf32>
    %575 = arith.mulf %566, %554 : vector<2x32xf32>
    %576 = arith.mulf %560, %568 : vector<2x32xf32>
    %577 = arith.addf %575, %576 : vector<2x32xf32>
    %578 = math.tanh %577 : vector<2x32xf32>
    %579 = arith.mulf %574, %578 : vector<2x32xf32>
    %580 = arith.index_cast %543 : i32 to index
    %c0_254 = arith.constant 0 : index
    %c0_255 = arith.constant 0 : index
    %581 = vector.load %arg2[%580, %c0_254, %c0_255] : memref<8x2x128xf32, #tpu.memory_space<vmem>>, vector<1x2x128xf32>
    %582 = vector.shape_cast %581 : vector<1x2x128xf32> to vector<2x128xf32>
    %583 = vector.extract_strided_slice %546 {offsets = [1, 0, 0], sizes = [1, 2, 128], strides = [1, 1, 1]} : vector<2x2x128xf32> to vector<1x2x128xf32>
    %584 = vector.shape_cast %583 : vector<1x2x128xf32> to vector<2x128xf32>
    %585 = arith.addf %582, %584 : vector<2x128xf32>
    %c1_256 = arith.constant 1 : index
    %c0_257 = arith.constant 0 : index
    %c0_258 = arith.constant 0 : index
    %586 = vector.load %arg7[%c1_256, %c0_257, %c0_258] : memref<2x2x32xf32, #tpu.memory_space<vmem>>, vector<1x2x32xf32>
    %587 = vector.shape_cast %586 : vector<1x2x32xf32> to vector<2x32xf32>
    %588 = vector.extract_strided_slice %585 {offsets = [0, 0], sizes = [2, 32], strides = [1, 1]} : vector<2x128xf32> to vector<2x32xf32>
    %589 = arith.negf %588 : vector<2x32xf32>
    %590 = math.exp %589 : vector<2x32xf32>
    %cst_259 = arith.constant 1.000000e+00 : f32
    %591 = vector.broadcast %cst_259 : f32 to vector<2x32xf32>
    %592 = arith.addf %591, %590 : vector<2x32xf32>
    %593 = arith.divf %591, %592 : vector<2x32xf32>
    %594 = vector.extract_strided_slice %585 {offsets = [0, 32], sizes = [2, 32], strides = [1, 1]} : vector<2x128xf32> to vector<2x32xf32>
    %595 = arith.negf %594 : vector<2x32xf32>
    %596 = math.exp %595 : vector<2x32xf32>
    %cst_260 = arith.constant 1.000000e+00 : f32
    %597 = vector.broadcast %cst_260 : f32 to vector<2x32xf32>
    %598 = arith.addf %597, %596 : vector<2x32xf32>
    %599 = arith.divf %597, %598 : vector<2x32xf32>
    %600 = vector.extract_strided_slice %585 {offsets = [0, 64], sizes = [2, 32], strides = [1, 1]} : vector<2x128xf32> to vector<2x32xf32>
    %601 = math.tanh %600 : vector<2x32xf32>
    %602 = vector.extract_strided_slice %585 {offsets = [0, 96], sizes = [2, 32], strides = [1, 1]} : vector<2x128xf32> to vector<2x32xf32>
    %603 = arith.negf %602 : vector<2x32xf32>
    %604 = math.exp %603 : vector<2x32xf32>
    %cst_261 = arith.constant 1.000000e+00 : f32
    %605 = vector.broadcast %cst_261 : f32 to vector<2x32xf32>
    %606 = arith.addf %605, %604 : vector<2x32xf32>
    %607 = arith.divf %605, %606 : vector<2x32xf32>
    %608 = arith.mulf %599, %587 : vector<2x32xf32>
    %609 = arith.mulf %593, %601 : vector<2x32xf32>
    %610 = arith.addf %608, %609 : vector<2x32xf32>
    %611 = math.tanh %610 : vector<2x32xf32>
    %612 = arith.mulf %607, %611 : vector<2x32xf32>
    %c0_262 = arith.constant 0 : index
    %c0_263 = arith.constant 0 : index
    %c0_264 = arith.constant 0 : index
    %613 = vector.load %arg6[%c0_262, %c0_263, %c0_264] : memref<2x2x32xf32, #tpu.memory_space<vmem>>, vector<1x2x32xf32>
    %614 = vector.shape_cast %613 : vector<1x2x32xf32> to vector<2x32xf32>
    %615 = vector.shape_cast %579 : vector<2x32xf32> to vector<1x2x32xf32>
    tpu.vector_store %arg6[%c0_262, %c0_263, %c0_264], %615 {strides = array<i32>} : memref<2x2x32xf32, #tpu.memory_space<vmem>>, vector<1x2x32xf32>,
    %c1_265 = arith.constant 1 : index
    %c0_266 = arith.constant 0 : index
    %c0_267 = arith.constant 0 : index
    %616 = vector.load %arg6[%c1_265, %c0_266, %c0_267] : memref<2x2x32xf32, #tpu.memory_space<vmem>>, vector<1x2x32xf32>
    %617 = vector.shape_cast %616 : vector<1x2x32xf32> to vector<2x32xf32>
    %618 = vector.shape_cast %612 : vector<2x32xf32> to vector<1x2x32xf32>
    tpu.vector_store %arg6[%c1_265, %c0_266, %c0_267], %618 {strides = array<i32>} : memref<2x2x32xf32, #tpu.memory_space<vmem>>, vector<1x2x32xf32>,
    %c0_268 = arith.constant 0 : index
    %c0_269 = arith.constant 0 : index
    %c0_270 = arith.constant 0 : index
    %619 = vector.load %arg7[%c0_268, %c0_269, %c0_270] : memref<2x2x32xf32, #tpu.memory_space<vmem>>, vector<1x2x32xf32>
    %620 = vector.shape_cast %619 : vector<1x2x32xf32> to vector<2x32xf32>
    %621 = vector.shape_cast %577 : vector<2x32xf32> to vector<1x2x32xf32>
    tpu.vector_store %arg7[%c0_268, %c0_269, %c0_270], %621 {strides = array<i32>} : memref<2x2x32xf32, #tpu.memory_space<vmem>>, vector<1x2x32xf32>,
    %c1_271 = arith.constant 1 : index
    %c0_272 = arith.constant 0 : index
    %c0_273 = arith.constant 0 : index
    %622 = vector.load %arg7[%c1_271, %c0_272, %c0_273] : memref<2x2x32xf32, #tpu.memory_space<vmem>>, vector<1x2x32xf32>
    %623 = vector.shape_cast %622 : vector<1x2x32xf32> to vector<2x32xf32>
    %624 = vector.shape_cast %610 : vector<2x32xf32> to vector<1x2x32xf32>
    tpu.vector_store %arg7[%c1_271, %c0_272, %c0_273], %624 {strides = array<i32>} : memref<2x2x32xf32, #tpu.memory_space<vmem>>, vector<1x2x32xf32>,
    %625 = arith.index_cast %c6_i32 : i32 to index
    %c0_274 = arith.constant 0 : index
    %c0_275 = arith.constant 0 : index
    %626 = vector.load %arg4[%625, %c0_274, %c0_275] : memref<8x2x32xf32, #tpu.memory_space<vmem>>, vector<1x2x32xf32>
    %627 = vector.shape_cast %626 : vector<1x2x32xf32> to vector<2x32xf32>
    %628 = vector.shape_cast %579 : vector<2x32xf32> to vector<1x2x32xf32>
    tpu.vector_store %arg4[%625, %c0_274, %c0_275], %628 {strides = array<i32>} : memref<8x2x32xf32, #tpu.memory_space<vmem>>, vector<1x2x32xf32>,
    %629 = arith.index_cast %543 : i32 to index
    %c0_276 = arith.constant 0 : index
    %c0_277 = arith.constant 0 : index
    %630 = vector.load %arg5[%629, %c0_276, %c0_277] : memref<8x2x32xf32, #tpu.memory_space<vmem>>, vector<1x2x32xf32>
    %631 = vector.shape_cast %630 : vector<1x2x32xf32> to vector<2x32xf32>
    %632 = vector.shape_cast %612 : vector<2x32xf32> to vector<1x2x32xf32>
    tpu.vector_store %arg5[%629, %c0_276, %c0_277], %632 {strides = array<i32>} : memref<8x2x32xf32, #tpu.memory_space<vmem>>, vector<1x2x32xf32>,
    %c7_i32_278 = arith.constant 7 : i32
    %c7_i32_279 = arith.constant 7 : i32
    %633 = arith.subi %c7_i32_279, %c7_i32_278 : i32
    %c0_280 = arith.constant 0 : index
    %c0_281 = arith.constant 0 : index
    %c0_282 = arith.constant 0 : index
    %634 = vector.load %arg6[%c0_280, %c0_281, %c0_282] : memref<2x2x32xf32, #tpu.memory_space<vmem>>, vector<2x2x32xf32>
    %c0_283 = arith.constant 0 : index
    %c0_284 = arith.constant 0 : index
    %c0_285 = arith.constant 0 : index
    %635 = vector.load %arg3[%c0_283, %c0_284, %c0_285] : memref<2x32x128xf32, #tpu.memory_space<vmem>>, vector<2x32x128xf32>
    "tpu.trace_start"() <{level = 10 : i32, message = "dbh,dhk->dbk"}> : () -> ()
    %cst_286 = arith.constant dense<0.000000e+00> : vector<2x2x128xf32>
    %636 = tpu.matmul %634, %635, %cst_286 {dimension_numbers = #tpu.dot_dimension_numbers<[2], [1], [1], [2], [0, 0, 0, 1, 1, 2], [0], [0]>} : vector<2x2x32xf32>, vector<2x32x128xf32>, vector<2x2x128xf32> -> vector<2x2x128xf32>
    "tpu.trace_stop"() : () -> ()
    %637 = arith.index_cast %c7_i32_278 : i32 to index
    %c0_287 = arith.constant 0 : index
    %c0_288 = arith.constant 0 : index
    %638 = vector.load %arg1[%637, %c0_287, %c0_288] : memref<8x2x128xf32, #tpu.memory_space<vmem>>, vector<1x2x128xf32>
    %639 = vector.shape_cast %638 : vector<1x2x128xf32> to vector<2x128xf32>
    %640 = vector.extract_strided_slice %636 {offsets = [0, 0, 0], sizes = [1, 2, 128], strides = [1, 1, 1]} : vector<2x2x128xf32> to vector<1x2x128xf32>
    %641 = vector.shape_cast %640 : vector<1x2x128xf32> to vector<2x128xf32>
    %642 = arith.addf %639, %641 : vector<2x128xf32>
    %c0_289 = arith.constant 0 : index
    %c0_290 = arith.constant 0 : index
    %c0_291 = arith.constant 0 : index
    %643 = vector.load %arg7[%c0_289, %c0_290, %c0_291] : memref<2x2x32xf32, #tpu.memory_space<vmem>>, vector<1x2x32xf32>
    %644 = vector.shape_cast %643 : vector<1x2x32xf32> to vector<2x32xf32>
    %645 = vector.extract_strided_slice %642 {offsets = [0, 0], sizes = [2, 32], strides = [1, 1]} : vector<2x128xf32> to vector<2x32xf32>
    %646 = arith.negf %645 : vector<2x32xf32>
    %647 = math.exp %646 : vector<2x32xf32>
    %cst_292 = arith.constant 1.000000e+00 : f32
    %648 = vector.broadcast %cst_292 : f32 to vector<2x32xf32>
    %649 = arith.addf %648, %647 : vector<2x32xf32>
    %650 = arith.divf %648, %649 : vector<2x32xf32>
    %651 = vector.extract_strided_slice %642 {offsets = [0, 32], sizes = [2, 32], strides = [1, 1]} : vector<2x128xf32> to vector<2x32xf32>
    %652 = arith.negf %651 : vector<2x32xf32>
    %653 = math.exp %652 : vector<2x32xf32>
    %cst_293 = arith.constant 1.000000e+00 : f32
    %654 = vector.broadcast %cst_293 : f32 to vector<2x32xf32>
    %655 = arith.addf %654, %653 : vector<2x32xf32>
    %656 = arith.divf %654, %655 : vector<2x32xf32>
    %657 = vector.extract_strided_slice %642 {offsets = [0, 64], sizes = [2, 32], strides = [1, 1]} : vector<2x128xf32> to vector<2x32xf32>
    %658 = math.tanh %657 : vector<2x32xf32>
    %659 = vector.extract_strided_slice %642 {offsets = [0, 96], sizes = [2, 32], strides = [1, 1]} : vector<2x128xf32> to vector<2x32xf32>
    %660 = arith.negf %659 : vector<2x32xf32>
    %661 = math.exp %660 : vector<2x32xf32>
    %cst_294 = arith.constant 1.000000e+00 : f32
    %662 = vector.broadcast %cst_294 : f32 to vector<2x32xf32>
    %663 = arith.addf %662, %661 : vector<2x32xf32>
    %664 = arith.divf %662, %663 : vector<2x32xf32>
    %665 = arith.mulf %656, %644 : vector<2x32xf32>
    %666 = arith.mulf %650, %658 : vector<2x32xf32>
    %667 = arith.addf %665, %666 : vector<2x32xf32>
    %668 = math.tanh %667 : vector<2x32xf32>
    %669 = arith.mulf %664, %668 : vector<2x32xf32>
    %670 = arith.index_cast %633 : i32 to index
    %c0_295 = arith.constant 0 : index
    %c0_296 = arith.constant 0 : index
    %671 = vector.load %arg2[%670, %c0_295, %c0_296] : memref<8x2x128xf32, #tpu.memory_space<vmem>>, vector<1x2x128xf32>
    %672 = vector.shape_cast %671 : vector<1x2x128xf32> to vector<2x128xf32>
    %673 = vector.extract_strided_slice %636 {offsets = [1, 0, 0], sizes = [1, 2, 128], strides = [1, 1, 1]} : vector<2x2x128xf32> to vector<1x2x128xf32>
    %674 = vector.shape_cast %673 : vector<1x2x128xf32> to vector<2x128xf32>
    %675 = arith.addf %672, %674 : vector<2x128xf32>
    %c1_297 = arith.constant 1 : index
    %c0_298 = arith.constant 0 : index
    %c0_299 = arith.constant 0 : index
    %676 = vector.load %arg7[%c1_297, %c0_298, %c0_299] : memref<2x2x32xf32, #tpu.memory_space<vmem>>, vector<1x2x32xf32>
    %677 = vector.shape_cast %676 : vector<1x2x32xf32> to vector<2x32xf32>
    %678 = vector.extract_strided_slice %675 {offsets = [0, 0], sizes = [2, 32], strides = [1, 1]} : vector<2x128xf32> to vector<2x32xf32>
    %679 = arith.negf %678 : vector<2x32xf32>
    %680 = math.exp %679 : vector<2x32xf32>
    %cst_300 = arith.constant 1.000000e+00 : f32
    %681 = vector.broadcast %cst_300 : f32 to vector<2x32xf32>
    %682 = arith.addf %681, %680 : vector<2x32xf32>
    %683 = arith.divf %681, %682 : vector<2x32xf32>
    %684 = vector.extract_strided_slice %675 {offsets = [0, 32], sizes = [2, 32], strides = [1, 1]} : vector<2x128xf32> to vector<2x32xf32>
    %685 = arith.negf %684 : vector<2x32xf32>
    %686 = math.exp %685 : vector<2x32xf32>
    %cst_301 = arith.constant 1.000000e+00 : f32
    %687 = vector.broadcast %cst_301 : f32 to vector<2x32xf32>
    %688 = arith.addf %687, %686 : vector<2x32xf32>
    %689 = arith.divf %687, %688 : vector<2x32xf32>
    %690 = vector.extract_strided_slice %675 {offsets = [0, 64], sizes = [2, 32], strides = [1, 1]} : vector<2x128xf32> to vector<2x32xf32>
    %691 = math.tanh %690 : vector<2x32xf32>
    %692 = vector.extract_strided_slice %675 {offsets = [0, 96], sizes = [2, 32], strides = [1, 1]} : vector<2x128xf32> to vector<2x32xf32>
    %693 = arith.negf %692 : vector<2x32xf32>
    %694 = math.exp %693 : vector<2x32xf32>
    %cst_302 = arith.constant 1.000000e+00 : f32
    %695 = vector.broadcast %cst_302 : f32 to vector<2x32xf32>
    %696 = arith.addf %695, %694 : vector<2x32xf32>
    %697 = arith.divf %695, %696 : vector<2x32xf32>
    %698 = arith.mulf %689, %677 : vector<2x32xf32>
    %699 = arith.mulf %683, %691 : vector<2x32xf32>
    %700 = arith.addf %698, %699 : vector<2x32xf32>
    %701 = math.tanh %700 : vector<2x32xf32>
    %702 = arith.mulf %697, %701 : vector<2x32xf32>
    %c0_303 = arith.constant 0 : index
    %c0_304 = arith.constant 0 : index
    %c0_305 = arith.constant 0 : index
    %703 = vector.load %arg6[%c0_303, %c0_304, %c0_305] : memref<2x2x32xf32, #tpu.memory_space<vmem>>, vector<1x2x32xf32>
    %704 = vector.shape_cast %703 : vector<1x2x32xf32> to vector<2x32xf32>
    %705 = vector.shape_cast %669 : vector<2x32xf32> to vector<1x2x32xf32>
    tpu.vector_store %arg6[%c0_303, %c0_304, %c0_305], %705 {strides = array<i32>} : memref<2x2x32xf32, #tpu.memory_space<vmem>>, vector<1x2x32xf32>,
    %c1_306 = arith.constant 1 : index
    %c0_307 = arith.constant 0 : index
    %c0_308 = arith.constant 0 : index
    %706 = vector.load %arg6[%c1_306, %c0_307, %c0_308] : memref<2x2x32xf32, #tpu.memory_space<vmem>>, vector<1x2x32xf32>
    %707 = vector.shape_cast %706 : vector<1x2x32xf32> to vector<2x32xf32>
    %708 = vector.shape_cast %702 : vector<2x32xf32> to vector<1x2x32xf32>
    tpu.vector_store %arg6[%c1_306, %c0_307, %c0_308], %708 {strides = array<i32>} : memref<2x2x32xf32, #tpu.memory_space<vmem>>, vector<1x2x32xf32>,
    %c0_309 = arith.constant 0 : index
    %c0_310 = arith.constant 0 : index
    %c0_311 = arith.constant 0 : index
    %709 = vector.load %arg7[%c0_309, %c0_310, %c0_311] : memref<2x2x32xf32, #tpu.memory_space<vmem>>, vector<1x2x32xf32>
    %710 = vector.shape_cast %709 : vector<1x2x32xf32> to vector<2x32xf32>
    %711 = vector.shape_cast %667 : vector<2x32xf32> to vector<1x2x32xf32>
    tpu.vector_store %arg7[%c0_309, %c0_310, %c0_311], %711 {strides = array<i32>} : memref<2x2x32xf32, #tpu.memory_space<vmem>>, vector<1x2x32xf32>,
    %c1_312 = arith.constant 1 : index
    %c0_313 = arith.constant 0 : index
    %c0_314 = arith.constant 0 : index
    %712 = vector.load %arg7[%c1_312, %c0_313, %c0_314] : memref<2x2x32xf32, #tpu.memory_space<vmem>>, vector<1x2x32xf32>
    %713 = vector.shape_cast %712 : vector<1x2x32xf32> to vector<2x32xf32>
    %714 = vector.shape_cast %700 : vector<2x32xf32> to vector<1x2x32xf32>
    tpu.vector_store %arg7[%c1_312, %c0_313, %c0_314], %714 {strides = array<i32>} : memref<2x2x32xf32, #tpu.memory_space<vmem>>, vector<1x2x32xf32>,
    %715 = arith.index_cast %c7_i32_278 : i32 to index
    %c0_315 = arith.constant 0 : index
    %c0_316 = arith.constant 0 : index
    %716 = vector.load %arg4[%715, %c0_315, %c0_316] : memref<8x2x32xf32, #tpu.memory_space<vmem>>, vector<1x2x32xf32>
    %717 = vector.shape_cast %716 : vector<1x2x32xf32> to vector<2x32xf32>
    %718 = vector.shape_cast %669 : vector<2x32xf32> to vector<1x2x32xf32>
    tpu.vector_store %arg4[%715, %c0_315, %c0_316], %718 {strides = array<i32>} : memref<8x2x32xf32, #tpu.memory_space<vmem>>, vector<1x2x32xf32>,
    %719 = arith.index_cast %633 : i32 to index
    %c0_317 = arith.constant 0 : index
    %c0_318 = arith.constant 0 : index
    %720 = vector.load %arg5[%719, %c0_317, %c0_318] : memref<8x2x32xf32, #tpu.memory_space<vmem>>, vector<1x2x32xf32>
    %721 = vector.shape_cast %720 : vector<1x2x32xf32> to vector<2x32xf32>
    %722 = vector.shape_cast %702 : vector<2x32xf32> to vector<1x2x32xf32>
    tpu.vector_store %arg5[%719, %c0_317, %c0_318], %722 {strides = array<i32>} : memref<8x2x32xf32, #tpu.memory_space<vmem>>, vector<1x2x32xf32>,
    %c8_i32 = arith.constant 8 : i32
    return
  }
  func.func @transform_0(%arg0: i32) -> (i32, i32, i32) {
    %c0_i32 = arith.constant 0 : i32
    %c0_i32_0 = arith.constant 0 : i32
    %c0_i32_1 = arith.constant 0 : i32
    return %arg0, %c0_i32, %c0_i32_0 : i32, i32, i32
  }
  func.func @transform_1(%arg0: i32) -> (i32, i32, i32) {
    %c0_i32 = arith.constant 0 : i32
    %0 = arith.subi %c0_i32, %arg0 : i32
    %c0_i32_0 = arith.constant 0 : i32
    %c1_i32 = arith.constant 1 : i32
    %c0_i32_1 = arith.constant 0 : i32
    return %0, %c0_i32_0, %c1_i32 : i32, i32, i32
  }
  func.func @transform_2(%arg0: i32) -> (i32, i32, i32) {
    %c0_i32 = arith.constant 0 : i32
    %c0_i32_0 = arith.constant 0 : i32
    %c0_i32_1 = arith.constant 0 : i32
    %c0_i32_2 = arith.constant 0 : i32
    return %c0_i32, %c0_i32_0, %c0_i32_1 : i32, i32, i32
  }
  func.func @transform_3(%arg0: i32) -> (i32, i32, i32) {
    %c0_i32 = arith.constant 0 : i32
    %c0_i32_0 = arith.constant 0 : i32
    %c0_i32_1 = arith.constant 0 : i32
    return %arg0, %c0_i32, %c0_i32_0 : i32, i32, i32
  }
  func.func @transform_4(%arg0: i32) -> (i32, i32, i32) {
    %c0_i32 = arith.constant 0 : i32
    %0 = arith.subi %c0_i32, %arg0 : i32
    %c0_i32_0 = arith.constant 0 : i32
    %c0_i32_1 = arith.constant 0 : i32
    %c0_i32_2 = arith.constant 0 : i32
    return %0, %c0_i32_0, %c0_i32_1 : i32, i32, i32
  }
}

module attributes {stable_mosaic.version = 11 : i64} {
  func.func @kernel(%arg0: i32, %arg1: memref<16x32xf32, #tpu.memory_space<vmem>>, %arg2: memref<16x32xf32, #tpu.memory_space<vmem>>, %arg3: memref<32x256xf32, #tpu.memory_space<vmem>>, %arg4: memref<32x256xf32, #tpu.memory_space<vmem>>, %arg5: memref<1x256xf32, #tpu.memory_space<vmem>>, %arg6: memref<16x256xf32, #tpu.memory_space<vmem>>) attributes {dimension_semantics = [#tpu.dimension_semantics<parallel>], iteration_bounds = array<i64: 1>, scalar_prefetch = 0 : i64, scratch_operands = 0 : i64, tpu.core_type = #tpu.core_type<tc>, window_params = [{transform_indices = @transform_0, window_bounds = array<i64: 16, 32>}, {transform_indices = @transform_1, window_bounds = array<i64: 16, 32>}, {pipeline_mode = #tpu.pipeline_mode<synchronous>, transform_indices = @transform_2, window_bounds = array<i64: 32, 256>}, {pipeline_mode = #tpu.pipeline_mode<synchronous>, transform_indices = @transform_3, window_bounds = array<i64: 32, 256>}, {pipeline_mode = #tpu.pipeline_mode<synchronous>, transform_indices = @transform_4, window_bounds = array<i64: 1, 256>}, {transform_indices = @transform_5, window_bounds = array<i64: 16, 256>}]} {
    %c0 = arith.constant 0 : index
    %c0_0 = arith.constant 0 : index
    %0 = vector.load %arg1[%c0, %c0_0] : memref<16x32xf32, #tpu.memory_space<vmem>>, vector<16x32xf32>
    %c0_1 = arith.constant 0 : index
    %c0_2 = arith.constant 0 : index
    %1 = vector.load %arg3[%c0_1, %c0_2] : memref<32x256xf32, #tpu.memory_space<vmem>>, vector<32x256xf32>
    %cst = arith.constant dense<0.000000e+00> : vector<16x256xf32>
    %2 = tpu.matmul %0, %1, %cst {dimension_numbers = #tpu.dot_dimension_numbers<[1], [0], [0], [1], [0, 0, 1, 1], [], []>} : vector<16x32xf32>, vector<32x256xf32>, vector<16x256xf32> -> vector<16x256xf32>
    %c0_3 = arith.constant 0 : index
    %c0_4 = arith.constant 0 : index
    %3 = vector.load %arg2[%c0_3, %c0_4] : memref<16x32xf32, #tpu.memory_space<vmem>>, vector<16x32xf32>
    %c0_5 = arith.constant 0 : index
    %c0_6 = arith.constant 0 : index
    %4 = vector.load %arg4[%c0_5, %c0_6] : memref<32x256xf32, #tpu.memory_space<vmem>>, vector<32x256xf32>
    %cst_7 = arith.constant dense<0.000000e+00> : vector<16x256xf32>
    %5 = tpu.matmul %3, %4, %cst_7 {dimension_numbers = #tpu.dot_dimension_numbers<[1], [0], [0], [1], [0, 0, 1, 1], [], []>} : vector<16x32xf32>, vector<32x256xf32>, vector<16x256xf32> -> vector<16x256xf32>
    %6 = arith.addf %2, %5 : vector<16x256xf32>
    %c0_8 = arith.constant 0 : index
    %c0_9 = arith.constant 0 : index
    %7 = vector.load %arg5[%c0_8, %c0_9] : memref<1x256xf32, #tpu.memory_space<vmem>>, vector<1x256xf32>
    %8 = vector.broadcast %7 : vector<1x256xf32> to vector<16x256xf32>
    %9 = arith.addf %6, %8 : vector<16x256xf32>
    %c0_10 = arith.constant 0 : index
    %c0_11 = arith.constant 0 : index
    %10 = vector.load %arg6[%c0_10, %c0_11] : memref<16x256xf32, #tpu.memory_space<vmem>>, vector<16x256xf32>
    tpu.vector_store %arg6[%c0_10, %c0_11], %9 {strides = array<i32>} : memref<16x256xf32, #tpu.memory_space<vmem>>, vector<16x256xf32>,
    return
  }
  func.func @transform_0(%arg0: i32) -> (i32, i32) {
    %c0_i32 = arith.constant 0 : i32
    %c0_i32_0 = arith.constant 0 : i32
    return %arg0, %c0_i32 : i32, i32
  }
  func.func @transform_1(%arg0: i32) -> (i32, i32) {
    %c0_i32 = arith.constant 0 : i32
    %c0_i32_0 = arith.constant 0 : i32
    return %arg0, %c0_i32 : i32, i32
  }
  func.func @transform_2(%arg0: i32) -> (i32, i32) {
    %c0_i32 = arith.constant 0 : i32
    %c0_i32_0 = arith.constant 0 : i32
    %c0_i32_1 = arith.constant 0 : i32
    return %c0_i32, %c0_i32_0 : i32, i32
  }
  func.func @transform_3(%arg0: i32) -> (i32, i32) {
    %c0_i32 = arith.constant 0 : i32
    %c0_i32_0 = arith.constant 0 : i32
    %c0_i32_1 = arith.constant 0 : i32
    return %c0_i32, %c0_i32_0 : i32, i32
  }
  func.func @transform_4(%arg0: i32) -> (i32, i32) {
    %c0_i32 = arith.constant 0 : i32
    %c0_i32_0 = arith.constant 0 : i32
    %c0_i32_1 = arith.constant 0 : i32
    return %c0_i32, %c0_i32_0 : i32, i32
  }
  func.func @transform_5(%arg0: i32) -> (i32, i32) {
    %c0_i32 = arith.constant 0 : i32
    %c0_i32_0 = arith.constant 0 : i32
    return %arg0, %c0_i32 : i32, i32
  }
}

module attributes {stable_mosaic.version = 11 : i64} {
  func.func @kernel(%arg0: i32, %arg1: memref<16x256xf32, #tpu.memory_space<vmem>>, %arg2: memref<16x32xf32, #tpu.memory_space<vmem>>, %arg3: memref<16x32xf32, #tpu.memory_space<vmem>>, %arg4: memref<1x256xf32, #tpu.memory_space<vmem>>, %arg5: memref<1x32xf32, #tpu.memory_space<vmem>>, %arg6: memref<1x32xf32, #tpu.memory_space<vmem>>, %arg7: memref<1x1xf32, #tpu.memory_space<smem>>, %arg8: memref<16x1xf32, #tpu.memory_space<vmem>>) attributes {dimension_semantics = [#tpu.dimension_semantics<parallel>], iteration_bounds = array<i64: 1>, scalar_prefetch = 0 : i64, scratch_operands = 0 : i64, tpu.core_type = #tpu.core_type<tc>, window_params = [{transform_indices = @transform_0, window_bounds = array<i64: 16, 256>}, {transform_indices = @transform_1, window_bounds = array<i64: 16, 32>}, {transform_indices = @transform_2, window_bounds = array<i64: 16, 32>}, {pipeline_mode = #tpu.pipeline_mode<synchronous>, transform_indices = @transform_3, window_bounds = array<i64: 1, 256>}, {pipeline_mode = #tpu.pipeline_mode<synchronous>, transform_indices = @transform_4, window_bounds = array<i64: 1, 32>}, {pipeline_mode = #tpu.pipeline_mode<synchronous>, transform_indices = @transform_5, window_bounds = array<i64: 1, 32>}, {transform_indices = @transform_6, window_bounds = array<i64: 1, 1>}, {transform_indices = @transform_7, window_bounds = array<i64: 16, 1>}]} {
    %c0 = arith.constant 0 : index
    %c0_0 = arith.constant 0 : index
    %0 = vector.load %arg1[%c0, %c0_0] : memref<16x256xf32, #tpu.memory_space<vmem>>, vector<16x256xf32>
    %c0_1 = arith.constant 0 : index
    %c0_2 = arith.constant 0 : index
    %1 = vector.load %arg4[%c0_1, %c0_2] : memref<1x256xf32, #tpu.memory_space<vmem>>, vector<1x256xf32>
    %2 = vector.broadcast %1 : vector<1x256xf32> to vector<16x256xf32>
    %3 = arith.mulf %0, %2 : vector<16x256xf32>
    %cst = arith.constant dense<0.000000e+00> : vector<16xf32>
    %4 = vector.multi_reduction <add>, %3, %cst [1] : vector<16x256xf32> to vector<16xf32>
    %5 = vector.shape_cast %4 : vector<16xf32> to vector<16x1xf32>
    %c0_3 = arith.constant 0 : index
    %c0_4 = arith.constant 0 : index
    %6 = vector.load %arg2[%c0_3, %c0_4] : memref<16x32xf32, #tpu.memory_space<vmem>>, vector<16x32xf32>
    %c0_5 = arith.constant 0 : index
    %c0_6 = arith.constant 0 : index
    %7 = vector.load %arg5[%c0_5, %c0_6] : memref<1x32xf32, #tpu.memory_space<vmem>>, vector<1x32xf32>
    %8 = vector.broadcast %7 : vector<1x32xf32> to vector<16x32xf32>
    %9 = arith.mulf %6, %8 : vector<16x32xf32>
    %cst_7 = arith.constant dense<0.000000e+00> : vector<16xf32>
    %10 = vector.multi_reduction <add>, %9, %cst_7 [1] : vector<16x32xf32> to vector<16xf32>
    %11 = vector.shape_cast %10 : vector<16xf32> to vector<16x1xf32>
    %12 = arith.addf %5, %11 : vector<16x1xf32>
    %c0_8 = arith.constant 0 : index
    %c0_9 = arith.constant 0 : index
    %13 = vector.load %arg3[%c0_8, %c0_9] : memref<16x32xf32, #tpu.memory_space<vmem>>, vector<16x32xf32>
    %c0_10 = arith.constant 0 : index
    %c0_11 = arith.constant 0 : index
    %14 = vector.load %arg6[%c0_10, %c0_11] : memref<1x32xf32, #tpu.memory_space<vmem>>, vector<1x32xf32>
    %15 = vector.broadcast %14 : vector<1x32xf32> to vector<16x32xf32>
    %16 = arith.mulf %13, %15 : vector<16x32xf32>
    %cst_12 = arith.constant dense<0.000000e+00> : vector<16xf32>
    %17 = vector.multi_reduction <add>, %16, %cst_12 [1] : vector<16x32xf32> to vector<16xf32>
    %18 = vector.shape_cast %17 : vector<16xf32> to vector<16x1xf32>
    %19 = arith.addf %12, %18 : vector<16x1xf32>
    %c0_13 = arith.constant 0 : index
    %c0_14 = arith.constant 0 : index
    %20 = memref.load %arg7[%c0_13, %c0_14] : memref<1x1xf32, #tpu.memory_space<smem>>
    %21 = vector.broadcast %20 : f32 to vector<16x1xf32>
    %22 = arith.addf %19, %21 : vector<16x1xf32>
    %c0_15 = arith.constant 0 : index
    %c0_16 = arith.constant 0 : index
    %23 = vector.load %arg8[%c0_15, %c0_16] : memref<16x1xf32, #tpu.memory_space<vmem>>, vector<16x1xf32>
    tpu.vector_store %arg8[%c0_15, %c0_16], %22 {strides = array<i32>} : memref<16x1xf32, #tpu.memory_space<vmem>>, vector<16x1xf32>,
    return
  }
  func.func @transform_0(%arg0: i32) -> (i32, i32) {
    %c0_i32 = arith.constant 0 : i32
    %c0_i32_0 = arith.constant 0 : i32
    return %arg0, %c0_i32 : i32, i32
  }
  func.func @transform_1(%arg0: i32) -> (i32, i32) {
    %c0_i32 = arith.constant 0 : i32
    %c0_i32_0 = arith.constant 0 : i32
    return %arg0, %c0_i32 : i32, i32
  }
  func.func @transform_2(%arg0: i32) -> (i32, i32) {
    %c0_i32 = arith.constant 0 : i32
    %c0_i32_0 = arith.constant 0 : i32
    return %arg0, %c0_i32 : i32, i32
  }
  func.func @transform_3(%arg0: i32) -> (i32, i32) {
    %c0_i32 = arith.constant 0 : i32
    %c0_i32_0 = arith.constant 0 : i32
    %c0_i32_1 = arith.constant 0 : i32
    return %c0_i32, %c0_i32_0 : i32, i32
  }
  func.func @transform_4(%arg0: i32) -> (i32, i32) {
    %c0_i32 = arith.constant 0 : i32
    %c0_i32_0 = arith.constant 0 : i32
    %c0_i32_1 = arith.constant 0 : i32
    return %c0_i32, %c0_i32_0 : i32, i32
  }
  func.func @transform_5(%arg0: i32) -> (i32, i32) {
    %c0_i32 = arith.constant 0 : i32
    %c0_i32_0 = arith.constant 0 : i32
    %c0_i32_1 = arith.constant 0 : i32
    return %c0_i32, %c0_i32_0 : i32, i32
  }
  func.func @transform_6(%arg0: i32) -> (i32, i32) {
    %c0_i32 = arith.constant 0 : i32
    %c0_i32_0 = arith.constant 0 : i32
    %c0_i32_1 = arith.constant 0 : i32
    return %c0_i32, %c0_i32_0 : i32, i32
  }
  func.func @transform_7(%arg0: i32) -> (i32, i32) {
    %c0_i32 = arith.constant 0 : i32
    %c0_i32_0 = arith.constant 0 : i32
    return %arg0, %c0_i32 : i32, i32
  }
}

module attributes {stable_mosaic.version = 11 : i64} {
  func.func @kernel(%arg0: i32, %arg1: memref<16x256xf32, #tpu.memory_space<vmem>>, %arg2: memref<16x64xf32, #tpu.memory_space<vmem>>, %arg3: memref<1x256xf32, #tpu.memory_space<vmem>>, %arg4: memref<1x64xf32, #tpu.memory_space<vmem>>, %arg5: memref<1x1xf32, #tpu.memory_space<smem>>, %arg6: memref<16x1xf32, #tpu.memory_space<vmem>>) attributes {dimension_semantics = [#tpu.dimension_semantics<parallel>], iteration_bounds = array<i64: 1>, scalar_prefetch = 0 : i64, scratch_operands = 0 : i64, tpu.core_type = #tpu.core_type<tc>, window_params = [{transform_indices = @transform_0, window_bounds = array<i64: 16, 256>}, {transform_indices = @transform_1, window_bounds = array<i64: 16, 64>}, {pipeline_mode = #tpu.pipeline_mode<synchronous>, transform_indices = @transform_2, window_bounds = array<i64: 1, 256>}, {pipeline_mode = #tpu.pipeline_mode<synchronous>, transform_indices = @transform_3, window_bounds = array<i64: 1, 64>}, {transform_indices = @transform_4, window_bounds = array<i64: 1, 1>}, {transform_indices = @transform_5, window_bounds = array<i64: 16, 1>}]} {
    %c0 = arith.constant 0 : index
    %c0_0 = arith.constant 0 : index
    %0 = vector.load %arg1[%c0, %c0_0] : memref<16x256xf32, #tpu.memory_space<vmem>>, vector<16x256xf32>
    %c0_1 = arith.constant 0 : index
    %c0_2 = arith.constant 0 : index
    %1 = vector.load %arg3[%c0_1, %c0_2] : memref<1x256xf32, #tpu.memory_space<vmem>>, vector<1x256xf32>
    %2 = vector.broadcast %1 : vector<1x256xf32> to vector<16x256xf32>
    %3 = arith.mulf %0, %2 : vector<16x256xf32>
    %cst = arith.constant dense<0.000000e+00> : vector<16xf32>
    %4 = vector.multi_reduction <add>, %3, %cst [1] : vector<16x256xf32> to vector<16xf32>
    %5 = vector.shape_cast %4 : vector<16xf32> to vector<16x1xf32>
    %c0_3 = arith.constant 0 : index
    %c0_4 = arith.constant 0 : index
    %6 = vector.load %arg2[%c0_3, %c0_4] : memref<16x64xf32, #tpu.memory_space<vmem>>, vector<16x64xf32>
    %c0_5 = arith.constant 0 : index
    %c0_6 = arith.constant 0 : index
    %7 = vector.load %arg4[%c0_5, %c0_6] : memref<1x64xf32, #tpu.memory_space<vmem>>, vector<1x64xf32>
    %8 = vector.broadcast %7 : vector<1x64xf32> to vector<16x64xf32>
    %9 = arith.mulf %6, %8 : vector<16x64xf32>
    %cst_7 = arith.constant dense<0.000000e+00> : vector<16xf32>
    %10 = vector.multi_reduction <add>, %9, %cst_7 [1] : vector<16x64xf32> to vector<16xf32>
    %11 = vector.shape_cast %10 : vector<16xf32> to vector<16x1xf32>
    %12 = arith.addf %5, %11 : vector<16x1xf32>
    %c0_8 = arith.constant 0 : index
    %c0_9 = arith.constant 0 : index
    %13 = memref.load %arg5[%c0_8, %c0_9] : memref<1x1xf32, #tpu.memory_space<smem>>
    %14 = vector.broadcast %13 : f32 to vector<16x1xf32>
    %15 = arith.addf %12, %14 : vector<16x1xf32>
    %c0_10 = arith.constant 0 : index
    %c0_11 = arith.constant 0 : index
    %16 = vector.load %arg6[%c0_10, %c0_11] : memref<16x1xf32, #tpu.memory_space<vmem>>, vector<16x1xf32>
    tpu.vector_store %arg6[%c0_10, %c0_11], %15 {strides = array<i32>} : memref<16x1xf32, #tpu.memory_space<vmem>>, vector<16x1xf32>,
    return
  }
  func.func @transform_0(%arg0: i32) -> (i32, i32) {
    %c0_i32 = arith.constant 0 : i32
    %c0_i32_0 = arith.constant 0 : i32
    return %arg0, %c0_i32 : i32, i32
  }
  func.func @transform_1(%arg0: i32) -> (i32, i32) {
    %c0_i32 = arith.constant 0 : i32
    %c0_i32_0 = arith.constant 0 : i32
    return %arg0, %c0_i32 : i32, i32
  }
  func.func @transform_2(%arg0: i32) -> (i32, i32) {
    %c0_i32 = arith.constant 0 : i32
    %c0_i32_0 = arith.constant 0 : i32
    %c0_i32_1 = arith.constant 0 : i32
    return %c0_i32, %c0_i32_0 : i32, i32
  }
  func.func @transform_3(%arg0: i32) -> (i32, i32) {
    %c0_i32 = arith.constant 0 : i32
    %c0_i32_0 = arith.constant 0 : i32
    %c0_i32_1 = arith.constant 0 : i32
    return %c0_i32, %c0_i32_0 : i32, i32
  }
  func.func @transform_4(%arg0: i32) -> (i32, i32) {
    %c0_i32 = arith.constant 0 : i32
    %c0_i32_0 = arith.constant 0 : i32
    %c0_i32_1 = arith.constant 0 : i32
    return %c0_i32, %c0_i32_0 : i32, i32
  }
  func.func @transform_5(%arg0: i32) -> (i32, i32) {
    %c0_i32 = arith.constant 0 : i32
    %c0_i32_0 = arith.constant 0 : i32
    return %arg0, %c0_i32 : i32, i32
  }
}

</mosaic_0001>

<bundles_post_ra>
// kernel: output_layer_forward.7
= control target key start
LH: loop header
LB: loop body
LE: loop exit
PB: predicated region body
PF: predicated region fallthrough
CT: control target
= control target key end

     0   :  { %8 = vsyncpa [#allocation3], 0  ;;  %s205_s12 = smov [#allocation2]   ;;  %s262_s0 = inlined_call_operand.vmem [shape: f32[16,64], index: 0, kind: input, shape index: {}]   ;;  %s263_s1 = inlined_call_operand.hbm [shape: f32[64,256], index: 1, kind: input, shape index: {}]   ;;  %s264_s2 = inlined_call_operand.vmem [shape: f32[1,256], index: 2, kind: input, shape index: {}]   ;;  %s265_s3 = inlined_call_operand.vmem [shape: f32[16,256], index: 3, kind: output, shape index: {}]  }
   0x1   :  { %s16_s13 = sshll.u32 %s205_s12, 4  ;;  %s181_s16 = scalar_lea.hbm %s263_s1, 2048  ;;  %s17_s13 = int_to_ptr.vmem [resolvable:$true] %s16_s13 }
   0x2   :  { %p182_p0 = scmp.ne.s32.totalorder %s263_s1, %s181_s16  ;;  %p185_p1 = scmp.lt.u32.totalorder %s181_s16, %s263_s1 }
   0x4   :  { %p187_p2 = pnand %p185_p1, %p182_p0 }
   0x6   :  { %190 = shalt.err (!%p187_p2)
}
   0x7   :  { %s191_s21 = scalar_lea.vmem %s17_s13, 2048  ;;  %p196_p4 = scmp.lt.s32.totalorder %s17_s13, %s17_s13 }
   0x8   :  { %p192_p3 = scmp.ne.s32.totalorder %s17_s13, %s191_s21  ;;  %p197_p5 = scmp.lt.s32.totalorder %s191_s21, %s191_s21 }
   0xa   :  { %p198_p6 = por %p197_p5, %p196_p4 }
   0xc   :  { %p199_p7 = pnand %p198_p6, %p192_p3 }
   0xe   :  { %202 = shalt.err (!%p199_p7)
}
   0xf   :  { %s206_s22 = smov 256   ;;  %s207_s23 = smov 16  }
  0x10   :  { %22 = dma.hbm_to_vmem [thread:$0]  %s263_s1, 2048, %s17_s13, [#allocation3], %s206_s22, %s206_s22, %s207_s23  }
  0x11   :  { %203 = dma.done.wait [#allocation3], 2048  }
  0x12   :  { %204 = vsyncadd [#allocation3], 4294965248  ;;  %v208_v0 = vmov 0.0   ;;  %v31_v1 = vld [vmem:[#allocation2 + $0x8] sm:$0xff]  ;;  %v33_v2 = vld [vmem:[#allocation2 + $0x18] sm:$0xff]  ;;  %vm58_vm0 = vcmask 523264   ;;  %v48_v27 = vlaneseq }
  0x13   :  { %129 = vmatprep.mubr.f32.mxu0 %v208_v0  ;;  %135 = vmatprep.mubr.f32.mxu1 %v208_v0  ;;  %v30_v3 = vld [vmem:[#allocation2] sm:$0xff]  ;;  %v153_v4 = vpack.c.bf16 %v33_v2, %v31_v1  ;;  %v32_v5 = vld [vmem:[#allocation2 + $0x10] sm:$0xff]  ;;  %v35_v6 = vld [vmem:[#allocation2 + $0x28] sm:$0xff] }
  0x14   :  { %v37_v7 = vld [vmem:[#allocation2 + $0x38] sm:$0xff]  ;;  %v155_v8 = vpack.c.bf16 %v32_v5, %v30_v3  ;;  %v34_v10 = vld [vmem:[#allocation2 + $0x20] sm:$0xff]  ;;  %v36_v11 = vld [vmem:[#allocation2 + $0x30] sm:$0xff]  ;;  %v49_v28 = vshrl.u32 %v48_v27, 7 }
  0x15   :  { %v157_v9 = vpack.c.bf16 %v37_v7, %v35_v6  ;;  %v39_v12 = vld [vmem:[#allocation2 + $0x48] sm:$0xff]  ;;  %154 = vmatprep.subr.bf16.mxu0 %v153_v4  ;;  %169 = vmatprep.subr.bf16.mxu1 %v153_v4  ;;  %v41_v13 = vld [vmem:[#allocation2 + $0x58] sm:$0xff]  ;;  %v159_v14 = vpack.c.bf16 %v36_v11, %v34_v10  ;;  %v38_v16 = vld [vmem:[#allocation2 + $0x40] sm:$0xff] }
  0x16   :  { %156 = vmatpush1.bf16.msra.mxu0 %v155_v8  ;;  %173 = vmatpush1.bf16.msra.mxu1 %v155_v8  ;;  %v161_v15 = vpack.c.bf16 %v41_v13, %v39_v12  ;;  %v40_v17 = vld [vmem:[#allocation2 + $0x50] sm:$0xff]  ;;  %v43_v18 = vld [vmem:[#allocation2 + $0x68] sm:$0xff]  ;;  %v45_v19 = vld [vmem:[#allocation2 + $0x78] sm:$0xff]  ;;  %v50_v29 = vsub.s32 0, %v49_v28  ;;  %v54_v31 = vsub.s32 1, %v49_v28 }
  0x17   :  { %158 = vmatprep.subr.bf16.mxu0 %v157_v9  ;;  %170 = vmatprep.subr.bf16.mxu1 %v157_v9  ;;  %v163_v20 = vpack.c.bf16 %v40_v17, %v38_v16  ;;  %v165_v21 = vpack.c.bf16 %v45_v19, %v43_v18  ;;  %v42_v22 = vld [vmem:[#allocation2 + $0x60] sm:$0xff]  ;;  %v44_v23 = vld [vmem:[#allocation2 + $0x70] sm:$0xff]  ;;  %v29_v26 = vld [vmem:[%s262_s0 + $0x8] sm:$0xff] }
  0x18   :  { %v167_v24 = vpack.c.bf16 %v44_v23, %v42_v22  ;;  %v28_v25 = vld [vmem:[%s262_s0] sm:$0xff] }
  0x19   :  { %v46_v30 = vld [vmem:[%s264_s2] sm:$0x3] }
  0x1a   :  { %160 = vmatpush1.bf16.msra.mxu0 %v159_v14  ;;  %174 = vmatpush1.bf16.msra.mxu1 %v159_v14  ;;  %v51_v32 = vrot.slane %v46_v30, %v50_v29  ;;  %v55_v33 = vrot.slane %v46_v30, %v54_v31 }
  0x1b   :  { %162 = vmatprep.subr.bf16.mxu0 %v161_v15  ;;  %171 = vmatprep.subr.bf16.mxu1 %v161_v15 }
  0x1e   :  { %164 = vmatpush1.bf16.msra.mxu0 %v163_v20  ;;  %175 = vmatpush1.bf16.msra.mxu1 %v163_v20 }
  0x1f   :  { %166 = vmatprep.subr.bf16.mxu0 %v165_v21  ;;  %172 = vmatprep.subr.bf16.mxu1 %v165_v21 }
  0x22   :  { %168 = vmatpush1.bf16.msra.mxu0 %v167_v24  ;;  %176 = vmatpush1.bf16.msra.mxu1 %v167_v24 }
  0x25   :  { %151 = vmatmul.mubr.msk.f32.vlgmr.msra.gmra.mrb[0].mxu0 %vm58_vm0, %v28_v25  ;;  %152 = vmatmul.mubr.msk.f32.vlgmr.msra.gmra.mrb[0].mxu1 %vm58_vm0, %v29_v26 }
  0xf8   :  { %v131_v34 = vpop.f32.mrb[0].mxu0  ;;  %v137_v35 = vpop.f32.mrb[0].mxu1 }
  0xf9   :  { %v132_v36 = vadd.f32 %v131_v34, %v51_v32  ;;  %v138_v37 = vadd.f32 %v137_v35, %v51_v32  ;;  %v133_v38 = vpop.f32.mrb[1].mxu0  ;;  %v139_v39 = vpop.f32.mrb[1].mxu1 }
  0xfa   :  { %v134_v40 = vadd.f32 %v133_v38, %v55_v33  ;;  %v140_v41 = vadd.f32 %v139_v39, %v55_v33 }
  0xfb   :  { %142 = vst [vmem:[%s265_s3] sm:$0xff] %v132_v36  ;;  %144 = vst [vmem:[%s265_s3 + $0x10] sm:$0xff] %v138_v37 }
  0xfc   :  { %143 = vst [vmem:[%s265_s3 + $0x8] sm:$0xff] %v134_v40  ;;  %145 = vst [vmem:[%s265_s3 + $0x18] sm:$0xff] %v140_v41 }
  0xfd   :  { %150 = vsyncpa [#allocation3], 1 }

// kernel: output_layer_forward.9
= control target key start
LH: loop header
LB: loop body
LE: loop exit
PB: predicated region body
PF: predicated region fallthrough
CT: control target
= control target key end

     0   :  { %v256_v3 = vmov 0.0   ;;  %vm40_vm0 = vcmask 261120   ;;  %v209_v29 = vlaneseq  ;;  %s362_s3 = inlined_call_operand.vmem [shape: f32[32,256], index: 3, kind: input, shape index: {}]   ;;  %s363_s2 = inlined_call_operand.vmem [shape: f32[32,256], index: 2, kind: input, shape index: {}]   ;;  %s364_s1 = inlined_call_operand.vmem [shape: f32[16,32], index: 1, kind: input, shape index: {}]   ;;  %s365_s0 = inlined_call_operand.vmem [shape: f32[16,32], index: 0, kind: input, shape index: {}]   ;;  %s366_s4 = inlined_call_operand.vmem [shape: f32[1,256], index: 4, kind: input, shape index: {}]   ;;  %s367_s5 = inlined_call_operand.vmem [shape: f32[16,256], index: 5, kind: output, shape index: {}]  }
   0x1   :  { %v33_v0 = vld [vmem:[%s362_s3 + $0x8] sm:$0xff]  ;;  %v35_v1 = vld [vmem:[%s362_s3 + $0x18] sm:$0xff]  ;;  %111 = vmatprep.mubr.f32.mxu1 %v256_v3  ;;  %194 = vmatprep.mubr.f32.mxu0 %v256_v3  ;;  %v32_v6 = vld [vmem:[%s362_s3] sm:$0xff] }
   0x2   :  { %v23_v2 = vld [vmem:[%s363_s2 + $0x8] sm:$0xff]  ;;  %v235_v4 = vpack.c.bf16 %v35_v1, %v33_v0  ;;  %v25_v5 = vld [vmem:[%s363_s2 + $0x18] sm:$0xff]  ;;  %v34_v7 = vld [vmem:[%s362_s3 + $0x10] sm:$0xff]  ;;  %v210_v30 = vshrl.u32 %v209_v29, 7 }
   0x3   :  { %v243_v8 = vpack.c.bf16 %v25_v5, %v23_v2  ;;  %v237_v9 = vpack.c.bf16 %v34_v7, %v32_v6  ;;  %v22_v10 = vld [vmem:[%s363_s2] sm:$0xff]  ;;  %v24_v11 = vld [vmem:[%s363_s2 + $0x10] sm:$0xff]  ;;  %v37_v12 = vld [vmem:[%s362_s3 + $0x28] sm:$0xff] }
   0x4   :  { %236 = vmatprep.subr.bf16.mxu1 %v235_v4  ;;  %v245_v13 = vpack.c.bf16 %v24_v11, %v22_v10  ;;  %v39_v14 = vld [vmem:[%s362_s3 + $0x38] sm:$0xff]  ;;  %v27_v15 = vld [vmem:[%s363_s2 + $0x28] sm:$0xff]  ;;  %v36_v19 = vld [vmem:[%s362_s3 + $0x20] sm:$0xff]  ;;  %v211_v31 = vsub.s32 0, %v210_v30  ;;  %v215_v33 = vsub.s32 1, %v210_v30 }
   0x5   :  { %v29_v16 = vld [vmem:[%s363_s2 + $0x38] sm:$0xff]  ;;  %244 = vmatprep.subr.bf16.mxu0 %v243_v8  ;;  %238 = vmatpush1.bf16.msra.mxu1 %v237_v9  ;;  %v239_v17 = vpack.c.bf16 %v39_v14, %v37_v12  ;;  %v38_v20 = vld [vmem:[%s362_s3 + $0x30] sm:$0xff]  ;;  %v26_v21 = vld [vmem:[%s363_s2 + $0x20] sm:$0xff] }
   0x6   :  { %v247_v18 = vpack.c.bf16 %v29_v16, %v27_v15  ;;  %246 = vmatpush1.bf16.msra.mxu0 %v245_v13  ;;  %v241_v22 = vpack.c.bf16 %v38_v20, %v36_v19  ;;  %v28_v23 = vld [vmem:[%s363_s2 + $0x30] sm:$0xff]  ;;  %v30_v25 = vld [vmem:[%s364_s1] sm:$0xff]  ;;  %v31_v27 = vld [vmem:[%s364_s1 + $0x8] sm:$0xff] }
   0x7   :  { %240 = vmatprep.subr.bf16.mxu1 %v239_v17  ;;  %v249_v24 = vpack.c.bf16 %v28_v23, %v26_v21  ;;  %v20_v26 = vld [vmem:[%s365_s0] sm:$0xff]  ;;  %v21_v28 = vld [vmem:[%s365_s0 + $0x8] sm:$0xff] }
   0x8   :  { %248 = vmatprep.subr.bf16.mxu0 %v247_v18  ;;  %v207_v32 = vld [vmem:[%s366_s4] sm:$0x3] }
   0x9   :  { %242 = vmatpush1.bf16.msra.mxu1 %v241_v22  ;;  %v212_v35 = vrot.slane %v207_v32, %v211_v31  ;;  %v216_v38 = vrot.slane %v207_v32, %v215_v33 }
   0xa   :  { %250 = vmatpush1.bf16.msra.mxu0 %v249_v24 }
   0xc   :  { %231 = vmatmul.mubr.msk.f32.vlgmr.msra.gmra.mrb[0].mxu1 %vm40_vm0, %v30_v25 }
   0xd   :  { %233 = vmatmul.mubr.msk.f32.vlgmr.msra.gmra.mrb[0].mxu0 %vm40_vm0, %v20_v26  ;;  %117 = vmatprep.mubr.f32.mxu1 %v256_v3 }
   0xe   :  { %200 = vmatprep.mubr.f32.mxu0 %v256_v3 }
  0x10   :  { %232 = vmatmul.mubr.msk.f32.gmra.mrb[2].mxu1 %vm40_vm0, %v31_v27 }
  0x11   :  { %234 = vmatmul.mubr.msk.f32.gmra.mrb[2].mxu0 %vm40_vm0, %v21_v28 }
  0xdf   :  { %v113_v34 = vpop.f32.mrb[0].mxu1 }
  0xe0   :  { %v196_v36 = vpop.f32.mrb[0].mxu0  ;;  %v115_v37 = vpop.f32.mrb[1].mxu1 }
  0xe1   :  { %v197_v39 = vadd.f32 %v196_v36, %v113_v34  ;;  %v198_v40 = vpop.f32.mrb[1].mxu0 }
  0xe2   :  { %v199_v41 = vadd.f32 %v198_v40, %v115_v37 }
  0xe3   :  { %v219_v42 = vadd.f32 %v212_v35, %v197_v39  ;;  %v119_v43 = vpop.f32.mrb[2].mxu1 }
  0xe4   :  { %v220_v44 = vadd.f32 %v216_v38, %v199_v41  ;;  %v202_v45 = vpop.f32.mrb[2].mxu0  ;;  %v121_v46 = vpop.f32.mrb[3].mxu1 }
  0xe5   :  { %223 = vst [vmem:[%s367_s5] sm:$0xff] %v219_v42  ;;  %v203_v47 = vadd.f32 %v202_v45, %v119_v43  ;;  %v204_v48 = vpop.f32.mrb[3].mxu0 }
  0xe6   :  { %224 = vst [vmem:[%s367_s5 + $0x8] sm:$0xff] %v220_v44  ;;  %v205_v49 = vadd.f32 %v204_v48, %v121_v46 }
  0xe7   :  { %v221_v50 = vadd.f32 %v212_v35, %v203_v47 }
  0xe8   :  { %v222_v51 = vadd.f32 %v216_v38, %v205_v49 }
  0xe9   :  { %225 = vst [vmem:[%s367_s5 + $0x10] sm:$0xff] %v221_v50 }
  0xea   :  { %226 = vst [vmem:[%s367_s5 + $0x18] sm:$0xff] %v222_v51 }

// kernel: output_layer_forward.11
= control target key start
LH: loop header
LB: loop body
LE: loop exit
PB: predicated region body
PF: predicated region fallthrough
CT: control target
= control target key end

     0   :  { %v33_v0 = vlaneseq  ;;  %vm64_vm0 = vcmask 261120   ;;  %vm96_vm1 = vcmask 7168   ;;  %s191_s1 = inlined_call_operand.vmem [shape: f32[16,32], index: 1, kind: input, shape index: {}]   ;;  %s192_s4 = inlined_call_operand.vmem [shape: f32[1,32], index: 4, kind: input, shape index: {}]   ;;  %s193_s3 = inlined_call_operand.vmem [shape: f32[1,256], index: 3, kind: input, shape index: {}]   ;;  %s194_s2 = inlined_call_operand.vmem [shape: f32[16,32], index: 2, kind: input, shape index: {}]   ;;  %s195_s0 = inlined_call_operand.vmem [shape: f32[16,256], index: 0, kind: input, shape index: {}]   ;;  %s196_s5 = inlined_call_operand.vmem [shape: f32[1,32], index: 5, kind: input, shape index: {}]   ;;  %s197_s6 = inlined_call_operand.<no memory space> [shape: f32[1,1], index: 6, kind: input, shape index: {}]   ;;  %s198_s7 = inlined_call_operand.vmem [shape: f32[16,1], index: 7, kind: output, shape index: {}]  }
   0x1   :  { %v53_v1 = vld [vmem:[%s191_s1] sm:$0xff]  ;;  %v54_v5 = vld [vmem:[%s191_s1 + $0x8] sm:$0xff]  ;;  %v29_v15 = vld [vmem:[%s195_s0 + $0x10] sm:$0xff]  ;;  %v93_v37 = vstv %s197_s6 }
   0x2   :  { %v103_v2 = vld [vmem:[%s192_s4] ss:$0 sm:$0xff]  ;;  %v34_v4 = vshrl.u32 %v33_v0, 7  ;;  %v74_v8 = vld [vmem:[%s194_s2 + $0x8] sm:$0xff]  ;;  %v30_v16 = vld [vmem:[%s195_s0 + $0x18] sm:$0xff] }
   0x3   :  { %v62_v3 = vmul.f32 %v103_v2, %v53_v1  ;;  %v31_v6 = vld [vmem:[%s193_s3] sm:$0x3]  ;;  %v63_v7 = vmul.f32 %v103_v2, %v54_v5  ;;  %v28_v14 = vld [vmem:[%s195_s0 + $0x8] sm:$0xff] }
   0x4   :  { %v27_v10 = vld [vmem:[%s195_s0] sm:$0xff]  ;;  %v35_v11 = vsub.s32 0, %v34_v4  ;;  %v39_v12 = vsub.s32 1, %v34_v4 }
   0x5   :  { %v65_v9 = vsel %vm64_vm0, %v62_v3, 0.0  ;;  %v104_v13 = vld [vmem:[%s196_s5] ss:$0 sm:$0xff]  ;;  %v68_v19 = vsel %vm64_vm0, %v63_v7, 0.0 }
   0x6   :  { %66 = vadd.xlane.f32.xlu1 %v65_v9  ;;  %v36_v17 = vrot.slane %v31_v6, %v35_v11  ;;  %v40_v18 = vrot.slane %v31_v6, %v39_v12  ;;  %v83_v20 = vmul.f32 %v104_v13, %v74_v8  ;;  %v73_v27 = vld [vmem:[%s194_s2] sm:$0xff] }
   0x7   :  { %v82_v29 = vmul.f32 %v104_v13, %v73_v27 }
   0x8   :  { %v43_v21 = vmul.f32 %v36_v17, %v27_v10  ;;  %v44_v22 = vmul.f32 %v40_v18, %v28_v14  ;;  %v45_v23 = vmul.f32 %v36_v17, %v29_v15  ;;  %v46_v24 = vmul.f32 %v40_v18, %v30_v16 }
   0x9   :  { %v87_v26 = vsel %vm64_vm0, %v83_v20, 0.0  ;;  %v84_v30 = vsel %vm64_vm0, %v82_v29, 0.0 }
   0xa   :  { %69 = vadd.xlane.f32.xlu1 %v68_v19  ;;  %v47_v25 = vadd.f32 %v44_v22, %v43_v21  ;;  %v50_v28 = vadd.f32 %v46_v24, %v45_v23 }
   0xc   :  { %48 = vadd.xlane.f32.xlu0 %v47_v25 }
   0xe   :  { %88 = vadd.xlane.f32.xlu1 %v87_v26 }
  0x10   :  { %51 = vadd.xlane.f32.xlu0 %v50_v28 }
  0x14   :  { %85 = vadd.xlane.f32.xlu0 %v84_v30 }
  0x93   :  { %v67_v31 = vpop.xlane.xlu1 %66 }
  0x97   :  { %v70_v32 = vpop.xlane.xlu1 %69 }
  0x99   :  { %v49_v33 = vpop.xlane.xlu0 %48 }
  0x9a   :  { %v71_v38 = vadd.f32 %v67_v31, %v49_v33 }
  0x9b   :  { %v89_v35 = vpop.xlane.xlu1 %88 }
  0x9d   :  { %v52_v34 = vpop.xlane.xlu0 %51 }
  0x9e   :  { %v72_v36 = vadd.f32 %v70_v32, %v52_v34 }
  0xa0   :  { %v91_v39 = vadd.f32 %v89_v35, %v72_v36 }
  0xa1   :  { %v86_v40 = vpop.xlane.xlu0 %85 }
  0xa2   :  { %v95_v41 = vadd.f32 %v93_v37, %v91_v39  ;;  %v90_v42 = vadd.f32 %v86_v40, %v71_v38 }
  0xa4   :  { %98 = vst.msk [vmem:[%s198_s7 + $0x8] sm:$0xff] %vm96_vm1, %v95_v41  ;;  %v94_v43 = vadd.f32 %v93_v37, %v90_v42 }
  0xa6   :  { %97 = vst.msk [vmem:[%s198_s7] sm:$0xff] %vm96_vm1, %v94_v43 }

// kernel: output_layer_forward.6
= control target key start
LH: loop header
LB: loop body
LE: loop exit
PB: predicated region body
PF: predicated region fallthrough
CT: control target
= control target key end

     0   :  { %v27_v0 = vlaneseq  ;;  %vm58_vm0 = vcmask 523264   ;;  %vm71_vm1 = vcmask 7168   ;;  %s144_s1 = inlined_call_operand.vmem [shape: f32[16,64], index: 1, kind: input, shape index: {}]   ;;  %s145_s3 = inlined_call_operand.vmem [shape: f32[1,64], index: 3, kind: input, shape index: {}]   ;;  %s146_s2 = inlined_call_operand.vmem [shape: f32[1,256], index: 2, kind: input, shape index: {}]   ;;  %s147_s0 = inlined_call_operand.vmem [shape: f32[16,256], index: 0, kind: input, shape index: {}]   ;;  %s148_s4 = inlined_call_operand.<no memory space> [shape: f32[1,1], index: 4, kind: input, shape index: {}]   ;;  %s149_s5 = inlined_call_operand.vmem [shape: f32[16,1], index: 5, kind: output, shape index: {}]  }
   0x1   :  { %v47_v1 = vld [vmem:[%s144_s1] sm:$0xff]  ;;  %v48_v5 = vld [vmem:[%s144_s1 + $0x8] sm:$0xff]  ;;  %v23_v13 = vld [vmem:[%s147_s0 + $0x10] sm:$0xff]  ;;  %v68_v25 = vstv %s148_s4 }
   0x2   :  { %v78_v2 = vld [vmem:[%s145_s3] ss:$0 sm:$0xff]  ;;  %v28_v4 = vshrl.u32 %v27_v0, 7  ;;  %v22_v12 = vld [vmem:[%s147_s0 + $0x8] sm:$0xff]  ;;  %v24_v14 = vld [vmem:[%s147_s0 + $0x18] sm:$0xff] }
   0x3   :  { %v56_v3 = vmul.f32 %v78_v2, %v47_v1  ;;  %v25_v6 = vld [vmem:[%s146_s2] sm:$0x3]  ;;  %v57_v7 = vmul.f32 %v78_v2, %v48_v5 }
   0x4   :  { %v21_v9 = vld [vmem:[%s147_s0] sm:$0xff]  ;;  %v29_v10 = vsub.s32 0, %v28_v4  ;;  %v33_v11 = vsub.s32 1, %v28_v4 }
   0x5   :  { %v59_v8 = vsel %vm58_vm0, %v56_v3, 0.0  ;;  %v62_v17 = vsel %vm58_vm0, %v57_v7, 0.0 }
   0x6   :  { %60 = vadd.xlane.f32.xlu1 %v59_v8  ;;  %v30_v15 = vrot.slane %v25_v6, %v29_v10  ;;  %v34_v16 = vrot.slane %v25_v6, %v33_v11 }
   0x8   :  { %v37_v18 = vmul.f32 %v30_v15, %v21_v9  ;;  %v38_v19 = vmul.f32 %v34_v16, %v22_v12  ;;  %v39_v20 = vmul.f32 %v30_v15, %v23_v13  ;;  %v40_v21 = vmul.f32 %v34_v16, %v24_v14 }
   0xa   :  { %63 = vadd.xlane.f32.xlu1 %v62_v17  ;;  %v41_v22 = vadd.f32 %v38_v19, %v37_v18  ;;  %v44_v23 = vadd.f32 %v40_v21, %v39_v20 }
   0xc   :  { %42 = vadd.xlane.f32.xlu0 %v41_v22 }
  0x10   :  { %45 = vadd.xlane.f32.xlu0 %v44_v23 }
  0x93   :  { %v61_v24 = vpop.xlane.xlu1 %60 }
  0x97   :  { %v64_v28 = vpop.xlane.xlu1 %63 }
  0x99   :  { %v43_v26 = vpop.xlane.xlu0 %42 }
  0x9a   :  { %v65_v27 = vadd.f32 %v61_v24, %v43_v26 }
  0x9c   :  { %v69_v29 = vadd.f32 %v68_v25, %v65_v27 }
  0x9d   :  { %v46_v30 = vpop.xlane.xlu0 %45 }
  0x9e   :  { %72 = vst.msk [vmem:[%s149_s5] sm:$0xff] %vm71_vm1, %v69_v29  ;;  %v66_v31 = vadd.f32 %v64_v28, %v46_v30 }
  0xa0   :  { %v70_v32 = vadd.f32 %v68_v25, %v66_v31 }
  0xa2   :  { %73 = vst.msk [vmem:[%s149_s5 + $0x8] sm:$0xff] %vm71_vm1, %v70_v32 }

// kernel: output_layer_forward.8
= control target key start
LH: loop header
LB: loop body
LE: loop exit
PB: predicated region body
PF: predicated region fallthrough
CT: control target
= control target key end

     0   :  { %v2719_v3 = vmov 0.0|0.0   ;;  %vm180_vm0 = vcmask 254976   ;;  %vm2720_vm1 = vmmov 0   ;;  %v2721_v9 = vmov 0.0   ;;  %s2722_s7 = smov 32   ;;  %s2723_s10 = smov 64   ;;  %s3158_s0 = inlined_call_operand.vmem [shape: f32[8,2,256], index: 0, kind: input, shape index: {}, may-alias: {0,1}]   ;;  %s3159_s1 = inlined_call_operand.vmem [shape: f32[8,2,256], index: 1, kind: input, shape index: {}, may-alias: {0,1}]   ;;  %s3160_s2 = inlined_call_operand.vmem [shape: f32[2,32,128], index: 2, kind: input, shape index: {}]   ;;  %s3161_s3 = inlined_call_operand.vmem [shape: f32[8,2,32], index: 3, kind: output, shape index: {0}]   ;;  %s3162_s4 = inlined_call_operand.vmem [shape: f32[8,2,32], index: 4, kind: output, shape index: {1}]  }
   0x1   :  { %v187_v0 = vld [vmem:[%s3160_s2] sm:$0xff]  ;;  %v188_v1 = vld [vmem:[%s3160_s2 + $0x8] sm:$0xff]  ;;  %2489 = vmatprep.subr.bf16.mxu0 %v2719_v3  ;;  %2495 = vmatprep.subr.bf16.mxu1 %v2719_v3  ;;  %v189_v6 = vld [vmem:[%s3160_s2 + $0x10] sm:$0xff]  ;;  %181 = vst.msk [vmem:[#allocation2] sm:$0x3] %vm180_vm0, %v2721_v9  ;;  %vm195_vm2 = vcmask 261120  }
   0x2   :  { %v191_v2 = vld [vmem:[%s3160_s2 + $0x20] sm:$0xff]  ;;  %v2760_v4 = vpack.c.bf16 %v188_v1, %v187_v0  ;;  %v192_v5 = vld [vmem:[%s3160_s2 + $0x28] sm:$0xff]  ;;  %v190_v7 = vld [vmem:[%s3160_s2 + $0x18] sm:$0xff]  ;;  %2321 = vmatprep.mubr.msk.f32.mxu0 %vm2720_vm1, %v2721_v9  ;;  %182 = vst.msk [vmem:[#allocation2 + $0x2] sm:$0x3] %vm180_vm0, %v2721_v9  ;;  %2332 = vmatprep.mubr.msk.f32.mxu1 %vm2720_vm1, %v2721_v9  ;;  %s2724_s13 = smov 96  }
   0x3   :  { %v2772_v8 = vpack.c.bf16 %v192_v5, %v191_v2  ;;  %183 = vst.msk [vmem:[#allocation3] sm:$0x3] %vm180_vm0, %v2721_v9  ;;  %184 = vst.msk [vmem:[#allocation3 + $0x2] sm:$0x3] %vm180_vm0, %v2721_v9  ;;  %v193_v10 = vld [vmem:[%s3160_s2 + $0x30] sm:$0xff]  ;;  %v194_v11 = vld [vmem:[%s3160_s2 + $0x38] sm:$0xff]  ;;  %v2796_v13 = vpack.c.bf16 %v190_v7, %v189_v6 }
   0x4   :  { %v27_v12 = vld [vmem:[%s3158_s0] sm:$0x3]  ;;  %2491 = vmatpush3.bf16.msra.mxu0 %v2760_v4  ;;  %v2800_v14 = vpack.c.bf16 %v194_v11, %v193_v10  ;;  %v2186_v19 = vld [vmem:[%s3159_s1 + $0x1e] sm:$0x3]  ;;  %v29_v54 = vld [vmem:[%s3158_s0 + $0x4] sm:$0x3] }
   0x5   :  { %28 = vst [vmem:[#allocation4] sm:$0x3] %v27_v12  ;;  %2492 = vmatprep.subr.bf16.mxu0 %v2719_v3  ;;  %2497 = vmatpush3.bf16.msra.mxu1 %v2772_v8  ;;  %117 = vst [vmem:[#allocation5 + $0xe] sm:$0x3] %v2186_v19  ;;  %v2185_v63 = vld [vmem:[%s3159_s1 + $0x1a] sm:$0x3] }
   0x6   :  { %2498 = vmatprep.subr.bf16.mxu1 %v2719_v3  ;;  %30 = vst [vmem:[#allocation4 + $0x2] sm:$0x3] %v29_v54  ;;  %115 = vst [vmem:[#allocation5 + $0xc] sm:$0x3] %v2185_v63 }
   0x8   :  { %2494 = vmatpush3.bf16.msra.mxu0 %v2796_v13  ;;  %v185_v15 = vld [vmem:[#allocation2] sm:$0x3] }
   0x9   :  { %2500 = vmatpush3.bf16.msra.mxu1 %v2800_v14  ;;  %2501 = vmatprep.subr.bf16.mxu0 %v2719_v3  ;;  %v186_v16 = vld [vmem:[#allocation2 + $0x2] sm:$0x3] }
   0xa   :  { %v344_v17 = vld [vmem:[#allocation3] sm:$0x3]  ;;  %2507 = vmatprep.subr.bf16.mxu1 %v2719_v3  ;;  %v377_v18 = vld [vmem:[#allocation3 + $0x2] sm:$0x3] }
   0xb   :  { %2322 = vmatmul.mubr.msk.f32.vlgmr.msra.gmra.mrb[0].mxu0 %vm195_vm2, %v185_v15  ;;  %353 = vrot.lane.b32.xlu1 %v344_v17, %s2722_s7 }
   0xc   :  { %2333 = vmatmul.mubr.msk.f32.vlgmr.msra.gmra.mrb[0].mxu1 %vm195_vm2, %v186_v16  ;;  %2503 = vmatpush3.bf16.msra.mxu0 %v2760_v4  ;;  %v342_v20 = vld [vmem:[#allocation4] sm:$0x3]  ;;  %v374_v21 = vld [vmem:[#allocation5 + $0xe] sm:$0x3] }
   0xd   :  { %2504 = vmatprep.subr.bf16.mxu0 %v2719_v3  ;;  %2509 = vmatpush3.bf16.msra.mxu1 %v2772_v8  ;;  %v588_v0 = vld [vmem:[#allocation4 + $0x2] sm:$0x3]  ;;  %v620_v6 = vld [vmem:[#allocation5 + $0xc] sm:$0x3] }
   0xe   :  { %2343 = vmatprep.mubr.msk.f32.mxu0 %vm2720_vm1, %v2721_v9  ;;  %2510 = vmatprep.subr.bf16.mxu1 %v2719_v3 }
   0xf   :  { %386 = vrot.lane.b32.xlu1 %v377_v18, %s2722_s7  ;;  %2354 = vmatprep.mubr.msk.f32.mxu1 %vm2720_vm1, %v2721_v9 }
  0x10   :  { %2506 = vmatpush3.bf16.msra.mxu0 %v2796_v13 }
  0x11   :  { %2512 = vmatpush3.bf16.msra.mxu1 %v2800_v14  ;;  %2513 = vmatprep.subr.bf16.mxu0 %v2719_v3 }
  0x12   :  { %2519 = vmatprep.subr.bf16.mxu1 %v2719_v3 }
  0x7d   :  { %v354_v42 = vpop.permute.xlu1 %353 }
  0x81   :  { %v387_v44 = vpop.permute.xlu1 %386 }
  0xde   :  { %v265_v22 = vpop.f32.mrb[0].mxu0 }
  0xdf   :  { %v343_v23 = vadd.f32 %v342_v20, %v265_v22  ;;  %v2323_v24 = vpop.f32.mrb[1].mxu0  ;;  %v338_v25 = vpop.f32.mrb[0].mxu1 }
  0xe0   :  { %v375_v26 = vadd.f32 %v374_v21, %v338_v25  ;;  %v2334_v27 = vpop.f32.mrb[1].mxu1 }
  0xe1   :  { %2591 = vtanh.f32 %v343_v23  ;;  %v2189_v30 = vmul.f32 -1.442695, %v343_v23 }
  0xe2   :  { %2593 = vtanh.f32 %v375_v26  ;;  %v2190_v31 = vmul.f32 -1.442695, %v375_v26 }
  0xe3   :  { %2595 = vpow2.f32 %v2189_v30 }
  0xe4   :  { %2597 = vpow2.f32 %v2190_v31 }
  0xeb   :  { %v2592_v28 = vpop.eup %2591 }
  0xec   :  { %358 = vrot.lane.b32.xlu0 %v2592_v28, %s2723_s10  ;;  %v2594_v29 = vpop.eup %2593 }
  0xed   :  { %v2596_v32 = vpop.eup %2595 }
  0xee   :  { %v348_v33 = vadd.f32 1.0, %v2596_v32  ;;  %v2598_v34 = vpop.eup %2597 }
  0xef   :  { %v381_v35 = vadd.f32 1.0, %v2598_v34 }
  0xf0   :  { %391 = vrot.lane.b32.xlu0 %v2594_v29, %s2723_s10  ;;  %2599 = vrcp.f32 %v348_v33 }
  0xf1   :  { %2601 = vrcp.f32 %v381_v35 }
  0xfa   :  { %v2600_v36 = vpop.eup %2599 }
  0xfb   :  { %v2602_v39 = vpop.eup %2601  ;;  %v356_v43 = vmul.f32 %v2600_v36, %v354_v42  ;;  %v31_v42 = vld [vmem:[%s3158_s0 + $0x8] sm:$0x3] }
  0xfc   :  { %v389_v47 = vmul.f32 %v2602_v39, %v387_v44  ;;  %32 = vst [vmem:[#allocation4 + $0x4] sm:$0x3] %v31_v42 }
 0x15e   :  { %v359_v37 = vpop.permute.xlu0 %358 }
 0x15f   :  { %v361_v38 = vmul.f32 %v2600_v36, %v359_v37 }
 0x161   :  { %363 = vrot.lane.b32.xlu0 %v361_v38, %s2722_s7 }
 0x162   :  { %v392_v40 = vpop.permute.xlu0 %391 }
 0x163   :  { %v394_v41 = vmul.f32 %v2602_v39, %v392_v40 }
 0x165   :  { %396 = vrot.lane.b32.xlu1 %v394_v41, %s2722_s7 }
 0x1d3   :  { %v364_v45 = vpop.permute.xlu0 %363 }
 0x1d4   :  { %v366_v46 = vadd.f32 %v364_v45, %v356_v43 }
 0x1d6   :  { %2603 = vtanh.f32 %v366_v46 }
 0x1d7   :  { %v397_v48 = vpop.permute.xlu1 %396 }
 0x1d8   :  { %v399_v49 = vadd.f32 %v397_v48, %v389_v47 }
 0x1da   :  { %2605 = vtanh.f32 %v399_v49 }
 0x1e0   :  { %v2604_v50 = vpop.eup %2603 }
 0x1e1   :  { %369 = vrot.lane.b32.xlu0 %v2604_v50, %s2723_s10 }
 0x1e4   :  { %v2606_v51 = vpop.eup %2605 }
 0x1e5   :  { %402 = vrot.lane.b32.xlu1 %v2606_v51, %s2723_s10  ;;  %v2184_v51 = vld [vmem:[%s3159_s1 + $0x16] sm:$0x3] }
 0x1e6   :  { %113 = vst [vmem:[#allocation5 + $0xa] sm:$0x3] %v2184_v51 }
 0x253   :  { %v370_v52 = vpop.permute.xlu0 %369 }
 0x254   :  { %v372_v53 = vmul.f32 %v2600_v36, %v370_v52  ;;  %v832_v52 = vld [vmem:[#allocation4 + $0x4] sm:$0x3] }
 0x256   :  { %407 = vrot.lane.b32.xlu0 %v372_v53, %s2722_s7 }
 0x257   :  { %v403_v55 = vpop.permute.xlu1 %402 }
 0x258   :  { %v405_v56 = vmul.f32 %v2602_v39, %v403_v55 }
 0x25a   :  { %413 = vrot.lane.b32.xlu1 %v405_v56, %s2722_s7  ;;  %419 = vrot.lane.b32.xlu0 %v366_v46, %s2724_s13  ;;  %v864_v56 = vld [vmem:[#allocation5 + $0xa] sm:$0x3] }
 0x25e   :  { %424 = vrot.lane.b32.xlu1 %v399_v49, %s2724_s13 }
 0x2c8   :  { %v408_v57 = vpop.permute.xlu0 %407 }
 0x2c9   :  { %411 = vst.msk [vmem:[#allocation2] sm:$0x3] %vm180_vm0, %v408_v57  ;;  %428 = vst.msk [vmem:[%s3161_s3] sm:$0x3] %vm180_vm0, %v408_v57 }
 0x2cc   :  { %v414_v58 = vpop.permute.xlu1 %413  ;;  %v420_v59 = vpop.permute.xlu0 %419 }
 0x2cd   :  { %417 = vst.msk [vmem:[#allocation2 + $0x2] sm:$0x3] %vm180_vm0, %v414_v58  ;;  %2191 = vst.msk [vmem:[%s3162_s4 + $0xe] sm:$0x3] %vm180_vm0, %v414_v58 }
 0x2ce   :  { %422 = vst.msk [vmem:[#allocation3] sm:$0x3] %vm180_vm0, %v420_v59 }
 0x2d0   :  { %v425_v60 = vpop.permute.xlu1 %424  ;;  %v431_v61 = vld [vmem:[#allocation2] sm:$0x3] }
 0x2d1   :  { %427 = vst.msk [vmem:[#allocation3 + $0x2] sm:$0x3] %vm180_vm0, %v425_v60  ;;  %2344 = vmatmul.mubr.msk.f32.vlgmr.msra.gmra.mrb[2].mxu0 %vm195_vm2, %v431_v61 }
 0x2d2   :  { %2515 = vmatpush3.bf16.msra.mxu0 %v2760_v4  ;;  %2365 = vmatprep.mubr.msk.f32.mxu0 %vm2720_vm1, %v2721_v9 }
 0x2d3   :  { %2516 = vmatprep.subr.bf16.mxu0 %v2719_v3 }
 0x2d4   :  { %v432_v62 = vld [vmem:[#allocation2 + $0x2] sm:$0x3] }
 0x2d5   :  { %2355 = vmatmul.mubr.msk.f32.vlgmr.msra.gmra.mrb[2].mxu1 %vm195_vm2, %v432_v62  ;;  %v590_v16 = vld [vmem:[#allocation3] sm:$0x3] }
 0x2d6   :  { %2518 = vmatpush3.bf16.msra.mxu0 %v2796_v13  ;;  %2521 = vmatpush3.bf16.msra.mxu1 %v2772_v8 }
 0x2d7   :  { %2522 = vmatprep.subr.bf16.mxu1 %v2719_v3  ;;  %2376 = vmatprep.mubr.msk.f32.mxu1 %vm2720_vm1, %v2721_v9 }
 0x2d8   :  { %2525 = vmatprep.subr.bf16.mxu0 %v2719_v3  ;;  %v622_v17 = vld [vmem:[#allocation3 + $0x2] sm:$0x3] }
 0x2da   :  { %2524 = vmatpush3.bf16.msra.mxu1 %v2800_v14 }
 0x2db   :  { %2531 = vmatprep.subr.bf16.mxu1 %v2719_v3 }
 0x3a4   :  { %v510_v1 = vpop.f32.mrb[2].mxu0 }
 0x3a5   :  { %v589_v2 = vadd.f32 %v588_v0, %v510_v1  ;;  %v2345_v5 = vpop.f32.mrb[3].mxu0 }
 0x3a7   :  { %2607 = vtanh.f32 %v589_v2  ;;  %v2194_v18 = vmul.f32 -1.442695, %v589_v2 }
 0x3a8   :  { %v583_v7 = vpop.f32.mrb[2].mxu1 }
 0x3a9   :  { %v621_v10 = vadd.f32 %v620_v6, %v583_v7  ;;  %v2356_v11 = vpop.f32.mrb[3].mxu1 }
 0x3ab   :  { %2609 = vtanh.f32 %v621_v10  ;;  %v2195_v19 = vmul.f32 -1.442695, %v621_v10 }
 0x3ac   :  { %2611 = vpow2.f32 %v2194_v18 }
 0x3ad   :  { %2613 = vpow2.f32 %v2195_v19 }
 0x3b1   :  { %v2608_v12 = vpop.eup %2607 }
 0x3b2   :  { %604 = vrot.lane.b32.xlu0 %v2608_v12, %s2723_s10 }
 0x3b5   :  { %v2610_v15 = vpop.eup %2609 }
 0x3b6   :  { %636 = vrot.lane.b32.xlu1 %v2610_v15, %s2723_s10  ;;  %599 = vrot.lane.b32.xlu0 %v590_v16, %s2722_s7  ;;  %v2612_v20 = vpop.eup %2611 }
 0x3b7   :  { %v594_v21 = vadd.f32 1.0, %v2612_v20  ;;  %v2614_v22 = vpop.eup %2613 }
 0x3b8   :  { %v626_v23 = vadd.f32 1.0, %v2614_v22 }
 0x3b9   :  { %2615 = vrcp.f32 %v594_v21 }
 0x3ba   :  { %631 = vrot.lane.b32.xlu1 %v622_v17, %s2722_s7  ;;  %2617 = vrcp.f32 %v626_v23 }
 0x3c3   :  { %v2616_v24 = vpop.eup %2615 }
 0x3c4   :  { %v2618_v27 = vpop.eup %2617 }
 0x424   :  { %v605_v25 = vpop.permute.xlu0 %604 }
 0x425   :  { %v607_v26 = vmul.f32 %v2616_v24, %v605_v25 }
 0x427   :  { %609 = vrot.lane.b32.xlu0 %v607_v26, %s2722_s7 }
 0x428   :  { %v637_v28 = vpop.permute.xlu1 %636  ;;  %v600_v30 = vpop.permute.xlu0 %599 }
 0x429   :  { %v639_v29 = vmul.f32 %v2618_v27, %v637_v28  ;;  %v602_v31 = vmul.f32 %v2616_v24, %v600_v30  ;;  %v33_v30 = vld [vmem:[%s3158_s0 + $0xc] sm:$0x3] }
 0x42a   :  { %34 = vst [vmem:[#allocation4 + $0x6] sm:$0x3] %v33_v30 }
 0x42b   :  { %641 = vrot.lane.b32.xlu1 %v639_v29, %s2722_s7 }
 0x42c   :  { %v632_v32 = vpop.permute.xlu1 %631 }
 0x42d   :  { %v634_v35 = vmul.f32 %v2618_v27, %v632_v32 }
 0x499   :  { %v610_v33 = vpop.permute.xlu0 %609 }
 0x49a   :  { %v612_v34 = vadd.f32 %v610_v33, %v602_v31 }
 0x49c   :  { %2619 = vtanh.f32 %v612_v34 }
 0x49d   :  { %v642_v36 = vpop.permute.xlu1 %641 }
 0x49e   :  { %v644_v37 = vadd.f32 %v642_v36, %v634_v35 }
 0x4a0   :  { %2621 = vtanh.f32 %v644_v37 }
 0x4a6   :  { %v2620_v38 = vpop.eup %2619 }
 0x4a7   :  { %615 = vrot.lane.b32.xlu0 %v2620_v38, %s2723_s10 }
 0x4aa   :  { %v2622_v39 = vpop.eup %2621 }
 0x4ab   :  { %647 = vrot.lane.b32.xlu1 %v2622_v39, %s2723_s10  ;;  %v2183_v39 = vld [vmem:[%s3159_s1 + $0x12] sm:$0x3] }
 0x4ac   :  { %111 = vst [vmem:[#allocation5 + $0x8] sm:$0x3] %v2183_v39 }
 0x519   :  { %v616_v40 = vpop.permute.xlu0 %615 }
 0x51a   :  { %v618_v41 = vmul.f32 %v2616_v24, %v616_v40  ;;  %v1076_v40 = vld [vmem:[#allocation4 + $0x6] sm:$0x3] }
 0x51c   :  { %652 = vrot.lane.b32.xlu0 %v618_v41, %s2722_s7 }
 0x51d   :  { %v648_v43 = vpop.permute.xlu1 %647 }
 0x51e   :  { %v650_v44 = vmul.f32 %v2618_v27, %v648_v43 }
 0x520   :  { %657 = vrot.lane.b32.xlu1 %v650_v44, %s2722_s7  ;;  %662 = vrot.lane.b32.xlu0 %v612_v34, %s2724_s13  ;;  %v1108_v44 = vld [vmem:[#allocation5 + $0x8] sm:$0x3] }
 0x524   :  { %667 = vrot.lane.b32.xlu1 %v644_v37, %s2724_s13 }
 0x58e   :  { %v653_v45 = vpop.permute.xlu0 %652 }
 0x58f   :  { %655 = vst.msk [vmem:[#allocation2] sm:$0x3] %vm180_vm0, %v653_v45  ;;  %2196 = vst.msk [vmem:[%s3161_s3 + $0x2] sm:$0x3] %vm180_vm0, %v653_v45 }
 0x592   :  { %v658_v46 = vpop.permute.xlu1 %657  ;;  %v663_v47 = vpop.permute.xlu0 %662 }
 0x593   :  { %660 = vst.msk [vmem:[#allocation2 + $0x2] sm:$0x3] %vm180_vm0, %v658_v46  ;;  %2197 = vst.msk [vmem:[%s3162_s4 + $0xc] sm:$0x3] %vm180_vm0, %v658_v46 }
 0x594   :  { %665 = vst.msk [vmem:[#allocation3] sm:$0x3] %vm180_vm0, %v663_v47 }
 0x596   :  { %v668_v48 = vpop.permute.xlu1 %667  ;;  %v675_v49 = vld [vmem:[#allocation2] sm:$0x3] }
 0x597   :  { %670 = vst.msk [vmem:[#allocation3 + $0x2] sm:$0x3] %vm180_vm0, %v668_v48  ;;  %2366 = vmatmul.mubr.msk.f32.vlgmr.msra.gmra.mrb[4].mxu0 %vm195_vm2, %v675_v49 }
 0x598   :  { %2527 = vmatpush3.bf16.msra.mxu0 %v2760_v4  ;;  %2387 = vmatprep.mubr.msk.f32.mxu0 %vm2720_vm1, %v2721_v9 }
 0x599   :  { %2528 = vmatprep.subr.bf16.mxu0 %v2719_v3 }
 0x59a   :  { %v676_v50 = vld [vmem:[#allocation2 + $0x2] sm:$0x3] }
 0x59b   :  { %2377 = vmatmul.mubr.msk.f32.vlgmr.msra.gmra.mrb[4].mxu1 %vm195_vm2, %v676_v50  ;;  %v834_v62 = vld [vmem:[#allocation3] sm:$0x3] }
 0x59c   :  { %2530 = vmatpush3.bf16.msra.mxu0 %v2796_v13  ;;  %2533 = vmatpush3.bf16.msra.mxu1 %v2772_v8 }
 0x59d   :  { %2534 = vmatprep.subr.bf16.mxu1 %v2719_v3  ;;  %2398 = vmatprep.mubr.msk.f32.mxu1 %vm2720_vm1, %v2721_v9 }
 0x59e   :  { %2537 = vmatprep.subr.bf16.mxu0 %v2719_v3  ;;  %v866_v63 = vld [vmem:[#allocation3 + $0x2] sm:$0x3] }
 0x5a0   :  { %2536 = vmatpush3.bf16.msra.mxu1 %v2800_v14 }
 0x5a1   :  { %2543 = vmatprep.subr.bf16.mxu1 %v2719_v3 }
 0x66a   :  { %v754_v53 = vpop.f32.mrb[4].mxu0 }
 0x66b   :  { %v833_v54 = vadd.f32 %v832_v52, %v754_v53  ;;  %v2367_v55 = vpop.f32.mrb[5].mxu0 }
 0x66d   :  { %2623 = vtanh.f32 %v833_v54  ;;  %v2200_v0 = vmul.f32 -1.442695, %v833_v54 }
 0x66e   :  { %v827_v57 = vpop.f32.mrb[4].mxu1 }
 0x66f   :  { %v865_v58 = vadd.f32 %v864_v56, %v827_v57  ;;  %v2378_v59 = vpop.f32.mrb[5].mxu1 }
 0x671   :  { %2625 = vtanh.f32 %v865_v58  ;;  %v2201_v1 = vmul.f32 -1.442695, %v865_v58 }
 0x672   :  { %2627 = vpow2.f32 %v2200_v0 }
 0x673   :  { %2629 = vpow2.f32 %v2201_v1 }
 0x677   :  { %v2624_v60 = vpop.eup %2623 }
 0x678   :  { %848 = vrot.lane.b32.xlu0 %v2624_v60, %s2723_s10 }
 0x67b   :  { %v2626_v61 = vpop.eup %2625 }
 0x67c   :  { %880 = vrot.lane.b32.xlu1 %v2626_v61, %s2723_s10  ;;  %843 = vrot.lane.b32.xlu0 %v834_v62, %s2722_s7  ;;  %v2628_v2 = vpop.eup %2627 }
 0x67d   :  { %v838_v5 = vadd.f32 1.0, %v2628_v2  ;;  %v2630_v6 = vpop.eup %2629 }
 0x67e   :  { %v870_v7 = vadd.f32 1.0, %v2630_v6 }
 0x67f   :  { %2631 = vrcp.f32 %v838_v5 }
 0x680   :  { %875 = vrot.lane.b32.xlu1 %v866_v63, %s2722_s7  ;;  %2633 = vrcp.f32 %v870_v7 }
 0x689   :  { %v2632_v10 = vpop.eup %2631 }
 0x68a   :  { %v2634_v15 = vpop.eup %2633 }
 0x6ea   :  { %v849_v11 = vpop.permute.xlu0 %848 }
 0x6eb   :  { %v851_v12 = vmul.f32 %v2632_v10, %v849_v11 }
 0x6ed   :  { %853 = vrot.lane.b32.xlu0 %v851_v12, %s2722_s7 }
 0x6ee   :  { %v881_v16 = vpop.permute.xlu1 %880  ;;  %v844_v18 = vpop.permute.xlu0 %843 }
 0x6ef   :  { %v883_v17 = vmul.f32 %v2634_v15, %v881_v16  ;;  %v846_v19 = vmul.f32 %v2632_v10, %v844_v18  ;;  %v35_v18 = vld [vmem:[%s3158_s0 + $0x10] sm:$0x3] }
 0x6f0   :  { %36 = vst [vmem:[#allocation4 + $0x8] sm:$0x3] %v35_v18 }
 0x6f1   :  { %885 = vrot.lane.b32.xlu1 %v883_v17, %s2722_s7 }
 0x6f2   :  { %v876_v20 = vpop.permute.xlu1 %875 }
 0x6f3   :  { %v878_v23 = vmul.f32 %v2634_v15, %v876_v20 }
 0x75f   :  { %v854_v21 = vpop.permute.xlu0 %853 }
 0x760   :  { %v856_v22 = vadd.f32 %v854_v21, %v846_v19 }
 0x762   :  { %2635 = vtanh.f32 %v856_v22 }
 0x763   :  { %v886_v24 = vpop.permute.xlu1 %885 }
 0x764   :  { %v888_v25 = vadd.f32 %v886_v24, %v878_v23 }
 0x766   :  { %2637 = vtanh.f32 %v888_v25 }
 0x76c   :  { %v2636_v26 = vpop.eup %2635 }
 0x76d   :  { %859 = vrot.lane.b32.xlu0 %v2636_v26, %s2723_s10 }
 0x770   :  { %v2638_v27 = vpop.eup %2637 }
 0x771   :  { %891 = vrot.lane.b32.xlu1 %v2638_v27, %s2723_s10  ;;  %v1320_v27 = vld [vmem:[#allocation4 + $0x8] sm:$0x3] }
 0x7df   :  { %v860_v28 = vpop.permute.xlu0 %859 }
 0x7e0   :  { %v862_v29 = vmul.f32 %v2632_v10, %v860_v28 }
 0x7e2   :  { %896 = vrot.lane.b32.xlu0 %v862_v29, %s2722_s7 }
 0x7e3   :  { %v892_v31 = vpop.permute.xlu1 %891 }
 0x7e4   :  { %v894_v32 = vmul.f32 %v2634_v15, %v892_v31 }
 0x7e6   :  { %901 = vrot.lane.b32.xlu1 %v894_v32, %s2722_s7  ;;  %906 = vrot.lane.b32.xlu0 %v856_v22, %s2724_s13 }
 0x7ea   :  { %911 = vrot.lane.b32.xlu1 %v888_v25, %s2724_s13 }
 0x854   :  { %v897_v33 = vpop.permute.xlu0 %896 }
 0x855   :  { %899 = vst.msk [vmem:[#allocation2] sm:$0x3] %vm180_vm0, %v897_v33  ;;  %2202 = vst.msk [vmem:[%s3161_s3 + $0x4] sm:$0x3] %vm180_vm0, %v897_v33 }
 0x858   :  { %v902_v34 = vpop.permute.xlu1 %901  ;;  %v907_v35 = vpop.permute.xlu0 %906 }
 0x859   :  { %904 = vst.msk [vmem:[#allocation2 + $0x2] sm:$0x3] %vm180_vm0, %v902_v34  ;;  %2203 = vst.msk [vmem:[%s3162_s4 + $0xa] sm:$0x3] %vm180_vm0, %v902_v34 }
 0x85a   :  { %909 = vst.msk [vmem:[#allocation3] sm:$0x3] %vm180_vm0, %v907_v35 }
 0x85c   :  { %v912_v36 = vpop.permute.xlu1 %911  ;;  %v919_v37 = vld [vmem:[#allocation2] sm:$0x3] }
 0x85d   :  { %914 = vst.msk [vmem:[#allocation3 + $0x2] sm:$0x3] %vm180_vm0, %v912_v36  ;;  %2388 = vmatmul.mubr.msk.f32.vlgmr.msra.gmra.mrb[6].mxu0 %vm195_vm2, %v919_v37 }
 0x85e   :  { %2539 = vmatpush3.bf16.msra.mxu0 %v2760_v4  ;;  %2409 = vmatprep.mubr.msk.f32.mxu0 %vm2720_vm1, %v2721_v9 }
 0x85f   :  { %2540 = vmatprep.subr.bf16.mxu0 %v2719_v3 }
 0x860   :  { %v920_v38 = vld [vmem:[#allocation2 + $0x2] sm:$0x3] }
 0x861   :  { %2399 = vmatmul.mubr.msk.f32.vlgmr.msra.gmra.mrb[6].mxu1 %vm195_vm2, %v920_v38  ;;  %v1078_v50 = vld [vmem:[#allocation3] sm:$0x3] }
 0x862   :  { %2542 = vmatpush3.bf16.msra.mxu0 %v2796_v13  ;;  %2545 = vmatpush3.bf16.msra.mxu1 %v2772_v8 }
 0x863   :  { %2546 = vmatprep.subr.bf16.mxu1 %v2719_v3  ;;  %2420 = vmatprep.mubr.msk.f32.mxu1 %vm2720_vm1, %v2721_v9 }
 0x864   :  { %2549 = vmatprep.subr.bf16.mxu0 %v2719_v3  ;;  %v1110_v51 = vld [vmem:[#allocation3 + $0x2] sm:$0x3] }
 0x866   :  { %2548 = vmatpush3.bf16.msra.mxu1 %v2800_v14 }
 0x867   :  { %2555 = vmatprep.subr.bf16.mxu1 %v2719_v3 }
 0x930   :  { %v998_v41 = vpop.f32.mrb[6].mxu0 }
 0x931   :  { %v1077_v42 = vadd.f32 %v1076_v40, %v998_v41  ;;  %v2389_v43 = vpop.f32.mrb[7].mxu0 }
 0x933   :  { %2639 = vtanh.f32 %v1077_v42  ;;  %v2206_v52 = vmul.f32 -1.442695, %v1077_v42 }
 0x934   :  { %v1071_v45 = vpop.f32.mrb[6].mxu1 }
 0x935   :  { %v1109_v46 = vadd.f32 %v1108_v44, %v1071_v45  ;;  %v2400_v47 = vpop.f32.mrb[7].mxu1 }
 0x937   :  { %2641 = vtanh.f32 %v1109_v46  ;;  %v2207_v53 = vmul.f32 -1.442695, %v1109_v46 }
 0x938   :  { %2643 = vpow2.f32 %v2206_v52 }
 0x939   :  { %2645 = vpow2.f32 %v2207_v53 }
 0x93d   :  { %v2640_v48 = vpop.eup %2639 }
 0x93e   :  { %1092 = vrot.lane.b32.xlu0 %v2640_v48, %s2723_s10 }
 0x941   :  { %v2642_v49 = vpop.eup %2641 }
 0x942   :  { %1124 = vrot.lane.b32.xlu1 %v2642_v49, %s2723_s10  ;;  %1087 = vrot.lane.b32.xlu0 %v1078_v50, %s2722_s7  ;;  %v2644_v54 = vpop.eup %2643 }
 0x943   :  { %v1082_v55 = vadd.f32 1.0, %v2644_v54  ;;  %v2646_v56 = vpop.eup %2645 }
 0x944   :  { %v1114_v57 = vadd.f32 1.0, %v2646_v56 }
 0x945   :  { %2647 = vrcp.f32 %v1082_v55 }
 0x946   :  { %1119 = vrot.lane.b32.xlu1 %v1110_v51, %s2722_s7  ;;  %2649 = vrcp.f32 %v1114_v57 }
 0x94f   :  { %v2648_v58 = vpop.eup %2647 }
 0x950   :  { %v2650_v61 = vpop.eup %2649 }
 0x9b0   :  { %v1093_v59 = vpop.permute.xlu0 %1092 }
 0x9b1   :  { %v1095_v60 = vmul.f32 %v2648_v58, %v1093_v59 }
 0x9b3   :  { %1097 = vrot.lane.b32.xlu0 %v1095_v60, %s2722_s7  ;;  %v37_v60 = vld [vmem:[%s3158_s0 + $0x14] sm:$0x3] }
 0x9b4   :  { %v1125_v62 = vpop.permute.xlu1 %1124  ;;  %v1088_v0 = vpop.permute.xlu0 %1087  ;;  %38 = vst [vmem:[#allocation4 + $0xa] sm:$0x3] %v37_v60 }
 0x9b5   :  { %v1127_v63 = vmul.f32 %v2650_v61, %v1125_v62  ;;  %v1090_v1 = vmul.f32 %v2648_v58, %v1088_v0 }
 0x9b7   :  { %1129 = vrot.lane.b32.xlu1 %v1127_v63, %s2722_s7 }
 0x9b8   :  { %v1120_v2 = vpop.permute.xlu1 %1119 }
 0x9b9   :  { %v1122_v7 = vmul.f32 %v2650_v61, %v1120_v2 }
 0xa25   :  { %v1098_v5 = vpop.permute.xlu0 %1097 }
 0xa26   :  { %v1100_v6 = vadd.f32 %v1098_v5, %v1090_v1 }
 0xa28   :  { %2651 = vtanh.f32 %v1100_v6 }
 0xa29   :  { %v1130_v10 = vpop.permute.xlu1 %1129 }
 0xa2a   :  { %v1132_v11 = vadd.f32 %v1130_v10, %v1122_v7  ;;  %v2181_v7 = vld [vmem:[%s3159_s1 + $0xa] sm:$0x3]  ;;  %v1564_v10 = vld [vmem:[#allocation4 + $0xa] sm:$0x3] }
 0xa2b   :  { %107 = vst [vmem:[#allocation5 + $0x4] sm:$0x3] %v2181_v7 }
 0xa2c   :  { %2653 = vtanh.f32 %v1132_v11 }
 0xa32   :  { %v2652_v12 = vpop.eup %2651 }
 0xa33   :  { %1103 = vrot.lane.b32.xlu0 %v2652_v12, %s2723_s10 }
 0xa36   :  { %v2654_v15 = vpop.eup %2653 }
 0xa37   :  { %1135 = vrot.lane.b32.xlu1 %v2654_v15, %s2723_s10 }
 0xaa5   :  { %v1104_v16 = vpop.permute.xlu0 %1103 }
 0xaa6   :  { %v1106_v17 = vmul.f32 %v2648_v58, %v1104_v16  ;;  %v1596_v16 = vld [vmem:[#allocation5 + $0x4] sm:$0x3] }
 0xaa8   :  { %1140 = vrot.lane.b32.xlu0 %v1106_v17, %s2722_s7 }
 0xaa9   :  { %v1136_v19 = vpop.permute.xlu1 %1135 }
 0xaaa   :  { %v1138_v20 = vmul.f32 %v2650_v61, %v1136_v19 }
 0xaac   :  { %1145 = vrot.lane.b32.xlu1 %v1138_v20, %s2722_s7  ;;  %1150 = vrot.lane.b32.xlu0 %v1100_v6, %s2724_s13 }
 0xab0   :  { %1155 = vrot.lane.b32.xlu1 %v1132_v11, %s2724_s13 }
 0xb1a   :  { %v1141_v21 = vpop.permute.xlu0 %1140 }
 0xb1b   :  { %1143 = vst.msk [vmem:[#allocation2] sm:$0x3] %vm180_vm0, %v1141_v21  ;;  %2208 = vst.msk [vmem:[%s3161_s3 + $0x6] sm:$0x3] %vm180_vm0, %v1141_v21 }
 0xb1e   :  { %v1146_v22 = vpop.permute.xlu1 %1145  ;;  %v1151_v23 = vpop.permute.xlu0 %1150 }
 0xb1f   :  { %1148 = vst.msk [vmem:[#allocation2 + $0x2] sm:$0x3] %vm180_vm0, %v1146_v22  ;;  %2209 = vst.msk [vmem:[%s3162_s4 + $0x8] sm:$0x3] %vm180_vm0, %v1146_v22 }
 0xb20   :  { %1153 = vst.msk [vmem:[#allocation3] sm:$0x3] %vm180_vm0, %v1151_v23 }
 0xb22   :  { %v1156_v24 = vpop.permute.xlu1 %1155  ;;  %v1163_v25 = vld [vmem:[#allocation2] sm:$0x3] }
 0xb23   :  { %1158 = vst.msk [vmem:[#allocation3 + $0x2] sm:$0x3] %vm180_vm0, %v1156_v24  ;;  %2410 = vmatmul.mubr.msk.f32.vlgmr.msra.gmra.mrb[8].mxu0 %vm195_vm2, %v1163_v25 }
 0xb24   :  { %2551 = vmatpush3.bf16.msra.mxu0 %v2760_v4  ;;  %2431 = vmatprep.mubr.msk.f32.mxu0 %vm2720_vm1, %v2721_v9  ;;  %v2182_v4 = vld [vmem:[%s3159_s1 + $0xe] sm:$0x3] }
 0xb25   :  { %2552 = vmatprep.subr.bf16.mxu0 %v2719_v3  ;;  %109 = vst [vmem:[#allocation5 + $0x6] sm:$0x3] %v2182_v4 }
 0xb26   :  { %v1164_v26 = vld [vmem:[#allocation2 + $0x2] sm:$0x3] }
 0xb27   :  { %2421 = vmatmul.mubr.msk.f32.vlgmr.msra.gmra.mrb[8].mxu1 %vm195_vm2, %v1164_v26  ;;  %v1322_v34 = vld [vmem:[#allocation3] sm:$0x3] }
 0xb28   :  { %2554 = vmatpush3.bf16.msra.mxu0 %v2796_v13  ;;  %2557 = vmatpush3.bf16.msra.mxu1 %v2772_v8 }
 0xb29   :  { %2558 = vmatprep.subr.bf16.mxu1 %v2719_v3  ;;  %2442 = vmatprep.mubr.msk.f32.mxu1 %vm2720_vm1, %v2721_v9 }
 0xb2a   :  { %2561 = vmatprep.subr.bf16.mxu0 %v2719_v3  ;;  %v1354_v35 = vld [vmem:[#allocation3 + $0x2] sm:$0x3] }
 0xb2c   :  { %2560 = vmatpush3.bf16.msra.mxu1 %v2800_v14  ;;  %v1352_v29 = vld [vmem:[#allocation5 + $0x6] sm:$0x3] }
 0xb2d   :  { %2567 = vmatprep.subr.bf16.mxu1 %v2719_v3 }
 0xbf6   :  { %v1242_v13 = vpop.f32.mrb[8].mxu0 }
 0xbf7   :  { %v1321_v28 = vadd.f32 %v1320_v27, %v1242_v13  ;;  %v2411_v8 = vpop.f32.mrb[9].mxu0 }
 0xbf9   :  { %2655 = vtanh.f32 %v1321_v28  ;;  %v2212_v36 = vmul.f32 -1.442695, %v1321_v28 }
 0xbfa   :  { %v1315_v30 = vpop.f32.mrb[8].mxu1 }
 0xbfb   :  { %v1353_v31 = vadd.f32 %v1352_v29, %v1315_v30  ;;  %v2422_v32 = vpop.f32.mrb[9].mxu1 }
 0xbfd   :  { %2657 = vtanh.f32 %v1353_v31  ;;  %v2213_v37 = vmul.f32 -1.442695, %v1353_v31 }
 0xbfe   :  { %2659 = vpow2.f32 %v2212_v36 }
 0xbff   :  { %2661 = vpow2.f32 %v2213_v37 }
 0xc03   :  { %v2656_v33 = vpop.eup %2655 }
 0xc04   :  { %1336 = vrot.lane.b32.xlu0 %v2656_v33, %s2723_s10 }
 0xc07   :  { %v2658_v14 = vpop.eup %2657 }
 0xc08   :  { %1368 = vrot.lane.b32.xlu1 %v2658_v14, %s2723_s10  ;;  %1331 = vrot.lane.b32.xlu0 %v1322_v34, %s2722_s7  ;;  %v2660_v38 = vpop.eup %2659 }
 0xc09   :  { %v1326_v39 = vadd.f32 1.0, %v2660_v38  ;;  %v2662_v40 = vpop.eup %2661 }
 0xc0a   :  { %v1358_v41 = vadd.f32 1.0, %v2662_v40 }
 0xc0b   :  { %2663 = vrcp.f32 %v1326_v39 }
 0xc0c   :  { %1363 = vrot.lane.b32.xlu1 %v1354_v35, %s2722_s7  ;;  %2665 = vrcp.f32 %v1358_v41 }
 0xc15   :  { %v2664_v42 = vpop.eup %2663 }
 0xc16   :  { %v2666_v45 = vpop.eup %2665 }
 0xc76   :  { %v1337_v43 = vpop.permute.xlu0 %1336 }
 0xc77   :  { %v1339_v44 = vmul.f32 %v2664_v42, %v1337_v43  ;;  %v1654_v43 = vld [vmem:[%s3160_s2 + $0x8] sm:$0xff] }
 0xc79   :  { %1341 = vrot.lane.b32.xlu0 %v1339_v44, %s2722_s7 }
 0xc7a   :  { %v1369_v46 = vpop.permute.xlu1 %1368  ;;  %v1332_v48 = vpop.permute.xlu0 %1331 }
 0xc7b   :  { %v1371_v47 = vmul.f32 %v2666_v45, %v1369_v46  ;;  %v1334_v49 = vmul.f32 %v2664_v42, %v1332_v48  ;;  %v1656_v46 = vld [vmem:[%s3160_s2 + $0x18] sm:$0xff] }
 0xc7d   :  { %1373 = vrot.lane.b32.xlu1 %v1371_v47, %s2722_s7  ;;  %v1657_v47 = vld [vmem:[%s3160_s2 + $0x20] sm:$0xff] }
 0xc7e   :  { %v1364_v50 = vpop.permute.xlu1 %1363 }
 0xc7f   :  { %v1366_v53 = vmul.f32 %v2666_v45, %v1364_v50 }
 0xceb   :  { %v1342_v51 = vpop.permute.xlu0 %1341 }
 0xcec   :  { %v1344_v52 = vadd.f32 %v1342_v51, %v1334_v49  ;;  %v1658_v49 = vld [vmem:[%s3160_s2 + $0x28] sm:$0xff]  ;;  %v1659_v51 = vld [vmem:[%s3160_s2 + $0x30] sm:$0xff] }
 0xced   :  { %v2568_v50 = vpack.c.bf16 %v1658_v49, %v1657_v47  ;;  %v2179_v47 = vld [vmem:[%s3159_s1 + $0x2] sm:$0x3] }
 0xcee   :  { %2667 = vtanh.f32 %v1344_v52  ;;  %103 = vst [vmem:[#allocation5] sm:$0x3] %v2179_v47 }
 0xcef   :  { %v1374_v54 = vpop.permute.xlu1 %1373 }
 0xcf0   :  { %v1376_v55 = vadd.f32 %v1374_v54, %v1366_v53 }
 0xcf2   :  { %2669 = vtanh.f32 %v1376_v55 }
 0xcf8   :  { %v2668_v56 = vpop.eup %2667 }
 0xcf9   :  { %1347 = vrot.lane.b32.xlu0 %v2668_v56, %s2723_s10  ;;  %v39_v56 = vld [vmem:[%s3158_s0 + $0x18] sm:$0x3] }
 0xcfa   :  { %40 = vst [vmem:[#allocation4 + $0xc] sm:$0x3] %v39_v56 }
 0xcfc   :  { %v2670_v57 = vpop.eup %2669 }
 0xcfd   :  { %1379 = vrot.lane.b32.xlu1 %v2670_v57, %s2723_s10 }
 0xd6b   :  { %v1348_v58 = vpop.permute.xlu0 %1347 }
 0xd6c   :  { %v1350_v59 = vmul.f32 %v2664_v42, %v1348_v58  ;;  %v1653_v42 = vld [vmem:[%s3160_s2] sm:$0xff] }
 0xd6d   :  { %v2562_v44 = vpack.c.bf16 %v1654_v43, %v1653_v42 }
 0xd6e   :  { %1384 = vrot.lane.b32.xlu0 %v1350_v59, %s2722_s7 }
 0xd6f   :  { %v1380_v61 = vpop.permute.xlu1 %1379 }
 0xd70   :  { %v1382_v62 = vmul.f32 %v2666_v45, %v1380_v61  ;;  %v1655_v45 = vld [vmem:[%s3160_s2 + $0x10] sm:$0xff] }
 0xd71   :  { %v2565_v48 = vpack.c.bf16 %v1656_v46, %v1655_v45 }
 0xd72   :  { %1389 = vrot.lane.b32.xlu1 %v1382_v62, %s2722_s7  ;;  %1394 = vrot.lane.b32.xlu0 %v1344_v52, %s2724_s13  ;;  %v1660_v52 = vld [vmem:[%s3160_s2 + $0x38] sm:$0xff] }
 0xd73   :  { %v2571_v53 = vpack.c.bf16 %v1660_v52, %v1659_v51  ;;  %v2083_v52 = vld [vmem:[#allocation5] sm:$0x3] }
 0xd76   :  { %1399 = vrot.lane.b32.xlu1 %v1376_v55, %s2724_s13 }
 0xde0   :  { %v1385_v63 = vpop.permute.xlu0 %1384 }
 0xde1   :  { %1387 = vst.msk [vmem:[#allocation2] sm:$0x3] %vm180_vm0, %v1385_v63  ;;  %2214 = vst.msk [vmem:[%s3161_s3 + $0x8] sm:$0x3] %vm180_vm0, %v1385_v63 }
 0xde4   :  { %v1390_v0 = vpop.permute.xlu1 %1389  ;;  %v1395_v1 = vpop.permute.xlu0 %1394 }
 0xde5   :  { %1392 = vst.msk [vmem:[#allocation2 + $0x2] sm:$0x3] %vm180_vm0, %v1390_v0  ;;  %2215 = vst.msk [vmem:[%s3162_s4 + $0x6] sm:$0x3] %vm180_vm0, %v1390_v0 }
 0xde6   :  { %1397 = vst.msk [vmem:[#allocation3] sm:$0x3] %vm180_vm0, %v1395_v1  ;;  %v2180_v1 = vld [vmem:[%s3159_s1 + $0x6] sm:$0x3] }
 0xde7   :  { %105 = vst [vmem:[#allocation5 + $0x2] sm:$0x3] %v2180_v1 }
 0xde8   :  { %v1400_v2 = vpop.permute.xlu1 %1399  ;;  %v1407_v5 = vld [vmem:[#allocation2] sm:$0x3] }
 0xde9   :  { %1402 = vst.msk [vmem:[#allocation3 + $0x2] sm:$0x3] %vm180_vm0, %v1400_v2  ;;  %2432 = vmatmul.mubr.msk.f32.vlgmr.msra.gmra.mrb[10].mxu0 %vm195_vm2, %v1407_v5  ;;  %v1808_v2 = vld [vmem:[#allocation4 + $0xc] sm:$0x3] }
 0xdea   :  { %2453 = vmatprep.mubr.msk.f32.mxu0 %vm2720_vm1, %v2721_v9  ;;  %2563 = vmatpush3.bf16.msra.mxu0 %v2562_v44 }
 0xdeb   :  { %2564 = vmatprep.subr.bf16.mxu0 %v2719_v3 }
 0xdec   :  { %v1408_v6 = vld [vmem:[#allocation2 + $0x2] sm:$0x3] }
 0xded   :  { %2443 = vmatmul.mubr.msk.f32.vlgmr.msra.gmra.mrb[10].mxu1 %vm195_vm2, %v1408_v6  ;;  %v1566_v22 = vld [vmem:[#allocation3] sm:$0x3] }
 0xdee   :  { %2464 = vmatprep.mubr.msk.f32.mxu1 %vm2720_vm1, %v2721_v9  ;;  %2566 = vmatpush3.bf16.msra.mxu0 %v2565_v48 }
 0xdef   :  { %2569 = vmatpush3.bf16.msra.mxu1 %v2568_v50  ;;  %2573 = vmatprep.subr.bf16.mxu0 %v2719_v3 }
 0xdf0   :  { %v1598_v23 = vld [vmem:[#allocation3 + $0x2] sm:$0x3]  ;;  %2570 = vmatprep.subr.bf16.mxu1 %v2719_v3 }
 0xdf3   :  { %2572 = vmatpush3.bf16.msra.mxu1 %v2571_v53 }
 0xdf4   :  { %2579 = vmatprep.subr.bf16.mxu1 %v2719_v3 }
 0xebc   :  { %v1486_v11 = vpop.f32.mrb[10].mxu0 }
 0xebd   :  { %v1565_v12 = vadd.f32 %v1564_v10, %v1486_v11  ;;  %v2433_v15 = vpop.f32.mrb[11].mxu0  ;;  %v1840_v10 = vld [vmem:[#allocation5 + $0x2] sm:$0x3] }
 0xebf   :  { %2671 = vtanh.f32 %v1565_v12  ;;  %v2218_v24 = vmul.f32 -1.442695, %v1565_v12 }
 0xec0   :  { %v1559_v17 = vpop.f32.mrb[10].mxu1 }
 0xec1   :  { %v1597_v18 = vadd.f32 %v1596_v16, %v1559_v17  ;;  %v2444_v19 = vpop.f32.mrb[11].mxu1 }
 0xec3   :  { %2673 = vtanh.f32 %v1597_v18  ;;  %v2219_v25 = vmul.f32 -1.442695, %v1597_v18 }
 0xec4   :  { %2675 = vpow2.f32 %v2218_v24 }
 0xec5   :  { %2677 = vpow2.f32 %v2219_v25 }
 0xec9   :  { %v2672_v20 = vpop.eup %2671 }
 0xeca   :  { %1580 = vrot.lane.b32.xlu0 %v2672_v20, %s2723_s10 }
 0xecd   :  { %v2674_v21 = vpop.eup %2673 }
 0xece   :  { %1612 = vrot.lane.b32.xlu1 %v2674_v21, %s2723_s10  ;;  %1575 = vrot.lane.b32.xlu0 %v1566_v22, %s2722_s7  ;;  %v2676_v26 = vpop.eup %2675 }
 0xecf   :  { %v1570_v4 = vadd.f32 1.0, %v2676_v26  ;;  %v2678_v27 = vpop.eup %2677 }
 0xed0   :  { %v1602_v13 = vadd.f32 1.0, %v2678_v27 }
 0xed1   :  { %2679 = vrcp.f32 %v1570_v4 }
 0xed2   :  { %1607 = vrot.lane.b32.xlu1 %v1598_v23, %s2722_s7  ;;  %2681 = vrcp.f32 %v1602_v13 }
 0xedb   :  { %v2680_v28 = vpop.eup %2679 }
 0xedc   :  { %v2682_v30 = vpop.eup %2681 }
 0xf3c   :  { %v1581_v8 = vpop.permute.xlu0 %1580 }
 0xf3d   :  { %v1583_v29 = vmul.f32 %v2680_v28, %v1581_v8 }
 0xf3f   :  { %1585 = vrot.lane.b32.xlu0 %v1583_v29, %s2722_s7 }
 0xf40   :  { %v1613_v31 = vpop.permute.xlu1 %1612  ;;  %v1576_v33 = vpop.permute.xlu0 %1575 }
 0xf41   :  { %v1615_v32 = vmul.f32 %v2682_v30, %v1613_v31  ;;  %v1578_v14 = vmul.f32 %v2680_v28, %v1576_v33 }
 0xf43   :  { %1617 = vrot.lane.b32.xlu1 %v1615_v32, %s2722_s7 }
 0xf44   :  { %v1608_v34 = vpop.permute.xlu1 %1607 }
 0xf45   :  { %v1610_v37 = vmul.f32 %v2682_v30, %v1608_v34 }
 0xfb1   :  { %v1586_v35 = vpop.permute.xlu0 %1585 }
 0xfb2   :  { %v1588_v36 = vadd.f32 %v1586_v35, %v1578_v14 }
 0xfb4   :  { %2683 = vtanh.f32 %v1588_v36 }
 0xfb5   :  { %v1618_v38 = vpop.permute.xlu1 %1617 }
 0xfb6   :  { %v1620_v39 = vadd.f32 %v1618_v38, %v1610_v37  ;;  %v41_v38 = vld [vmem:[%s3158_s0 + $0x1c] sm:$0x3] }
 0xfb7   :  { %42 = vst [vmem:[#allocation4 + $0xe] sm:$0x3] %v41_v38 }
 0xfb8   :  { %2685 = vtanh.f32 %v1620_v39 }
 0xfbe   :  { %v2684_v40 = vpop.eup %2683 }
 0xfbf   :  { %1591 = vrot.lane.b32.xlu0 %v2684_v40, %s2723_s10 }
 0xfc2   :  { %v2686_v41 = vpop.eup %2685 }
 0xfc3   :  { %1623 = vrot.lane.b32.xlu1 %v2686_v41, %s2723_s10 }
0x1031   :  { %v1592_v54 = vpop.permute.xlu0 %1591 }
0x1032   :  { %v1594_v55 = vmul.f32 %v2680_v28, %v1592_v54 }
0x1034   :  { %1628 = vrot.lane.b32.xlu0 %v1594_v55, %s2722_s7 }
0x1035   :  { %v1624_v57 = vpop.permute.xlu1 %1623 }
0x1036   :  { %v1626_v58 = vmul.f32 %v2682_v30, %v1624_v57 }
0x1038   :  { %1633 = vrot.lane.b32.xlu1 %v1626_v58, %s2722_s7  ;;  %1638 = vrot.lane.b32.xlu0 %v1588_v36, %s2724_s13 }
0x103c   :  { %1643 = vrot.lane.b32.xlu1 %v1620_v39, %s2724_s13 }
0x10a6   :  { %v1629_v59 = vpop.permute.xlu0 %1628 }
0x10a7   :  { %1631 = vst.msk [vmem:[#allocation2] sm:$0x3] %vm180_vm0, %v1629_v59  ;;  %2220 = vst.msk [vmem:[%s3161_s3 + $0xa] sm:$0x3] %vm180_vm0, %v1629_v59 }
0x10aa   :  { %v1634_v60 = vpop.permute.xlu1 %1633  ;;  %v1639_v61 = vpop.permute.xlu0 %1638 }
0x10ab   :  { %1636 = vst.msk [vmem:[#allocation2 + $0x2] sm:$0x3] %vm180_vm0, %v1634_v60  ;;  %2221 = vst.msk [vmem:[%s3162_s4 + $0x4] sm:$0x3] %vm180_vm0, %v1634_v60 }
0x10ac   :  { %1641 = vst.msk [vmem:[#allocation3] sm:$0x3] %vm180_vm0, %v1639_v61 }
0x10ae   :  { %v1644_v62 = vpop.permute.xlu1 %1643  ;;  %v1651_v63 = vld [vmem:[#allocation2] sm:$0x3] }
0x10af   :  { %1646 = vst.msk [vmem:[#allocation3 + $0x2] sm:$0x3] %vm180_vm0, %v1644_v62  ;;  %2454 = vmatmul.mubr.msk.f32.vlgmr.msra.gmra.mrb[12].mxu0 %vm195_vm2, %v1651_v63 }
0x10b0   :  { %2575 = vmatpush3.bf16.msra.mxu0 %v2562_v44  ;;  %2475 = vmatprep.mubr.msk.f32.mxu0 %vm2720_vm1, %v2721_v9 }
0x10b1   :  { %2576 = vmatprep.subr.bf16.mxu0 %v2719_v3 }
0x10b2   :  { %v1652_v0 = vld [vmem:[#allocation2 + $0x2] sm:$0x3] }
0x10b3   :  { %2465 = vmatmul.mubr.msk.f32.vlgmr.msra.gmra.mrb[12].mxu1 %vm195_vm2, %v1652_v0  ;;  %v1810_v16 = vld [vmem:[#allocation3] sm:$0x3] }
0x10b4   :  { %2578 = vmatpush3.bf16.msra.mxu0 %v2565_v48  ;;  %2581 = vmatpush3.bf16.msra.mxu1 %v2568_v50  ;;  %v2052_v48 = vld [vmem:[#allocation4 + $0xe] sm:$0x3] }
0x10b5   :  { %2582 = vmatprep.subr.bf16.mxu1 %v2719_v3  ;;  %2486 = vmatprep.mubr.msk.f32.mxu1 %vm2720_vm1, %v2721_v9 }
0x10b6   :  { %v1842_v17 = vld [vmem:[#allocation3 + $0x2] sm:$0x3] }
0x10b8   :  { %2584 = vmatpush3.bf16.msra.mxu1 %v2571_v53 }
0x1182   :  { %v1730_v5 = vpop.f32.mrb[12].mxu0 }
0x1183   :  { %v1809_v6 = vadd.f32 %v1808_v2, %v1730_v5  ;;  %v2455_v7 = vpop.f32.mrb[13].mxu0 }
0x1185   :  { %2687 = vtanh.f32 %v1809_v6  ;;  %v2224_v18 = vmul.f32 -1.442695, %v1809_v6 }
0x1186   :  { %v1803_v11 = vpop.f32.mrb[12].mxu1 }
0x1187   :  { %v1841_v12 = vadd.f32 %v1840_v10, %v1803_v11  ;;  %v2466_v15 = vpop.f32.mrb[13].mxu1 }
0x1189   :  { %2689 = vtanh.f32 %v1841_v12  ;;  %v2225_v19 = vmul.f32 -1.442695, %v1841_v12 }
0x118a   :  { %2691 = vpow2.f32 %v2224_v18 }
0x118b   :  { %2693 = vpow2.f32 %v2225_v19 }
0x118f   :  { %v2688_v3 = vpop.eup %2687 }
0x1190   :  { %1824 = vrot.lane.b32.xlu0 %v2688_v3, %s2723_s10 }
0x1193   :  { %v2690_v9 = vpop.eup %2689 }
0x1194   :  { %1856 = vrot.lane.b32.xlu1 %v2690_v9, %s2723_s10  ;;  %1819 = vrot.lane.b32.xlu0 %v1810_v16, %s2722_s7  ;;  %v2692_v20 = vpop.eup %2691 }
0x1195   :  { %v1814_v21 = vadd.f32 1.0, %v2692_v20  ;;  %v2694_v22 = vpop.eup %2693 }
0x1196   :  { %v1846_v23 = vadd.f32 1.0, %v2694_v22 }
0x1197   :  { %2695 = vrcp.f32 %v1814_v21 }
0x1198   :  { %1851 = vrot.lane.b32.xlu1 %v1842_v17, %s2722_s7  ;;  %2697 = vrcp.f32 %v1846_v23 }
0x11a1   :  { %v2696_v24 = vpop.eup %2695 }
0x11a2   :  { %v2698_v4 = vpop.eup %2697 }
0x1202   :  { %v1825_v25 = vpop.permute.xlu0 %1824 }
0x1203   :  { %v1827_v26 = vmul.f32 %v2696_v24, %v1825_v25 }
0x1205   :  { %1829 = vrot.lane.b32.xlu0 %v1827_v26, %s2722_s7 }
0x1206   :  { %v1857_v27 = vpop.permute.xlu1 %1856  ;;  %v1820_v28 = vpop.permute.xlu0 %1819 }
0x1207   :  { %v1859_v13 = vmul.f32 %v2698_v4, %v1857_v27  ;;  %v1822_v8 = vmul.f32 %v2696_v24, %v1820_v28 }
0x1209   :  { %1861 = vrot.lane.b32.xlu1 %v1859_v13, %s2722_s7 }
0x120a   :  { %v1852_v29 = vpop.permute.xlu1 %1851 }
0x120b   :  { %v1854_v32 = vmul.f32 %v2698_v4, %v1852_v29 }
0x1277   :  { %v1830_v30 = vpop.permute.xlu0 %1829 }
0x1278   :  { %v1832_v31 = vadd.f32 %v1830_v30, %v1822_v8 }
0x127a   :  { %2699 = vtanh.f32 %v1832_v31 }
0x127b   :  { %v1862_v33 = vpop.permute.xlu1 %1861 }
0x127c   :  { %v1864_v14 = vadd.f32 %v1862_v33, %v1854_v32 }
0x127e   :  { %2701 = vtanh.f32 %v1864_v14 }
0x1284   :  { %v2700_v34 = vpop.eup %2699 }
0x1285   :  { %1835 = vrot.lane.b32.xlu0 %v2700_v34, %s2723_s10 }
0x1288   :  { %v2702_v35 = vpop.eup %2701 }
0x1289   :  { %1867 = vrot.lane.b32.xlu1 %v2702_v35, %s2723_s10 }
0x12f7   :  { %v1836_v36 = vpop.permute.xlu0 %1835 }
0x12f8   :  { %v1838_v37 = vmul.f32 %v2696_v24, %v1836_v36 }
0x12fa   :  { %1872 = vrot.lane.b32.xlu0 %v1838_v37, %s2722_s7 }
0x12fb   :  { %v1868_v39 = vpop.permute.xlu1 %1867 }
0x12fc   :  { %v1870_v40 = vmul.f32 %v2698_v4, %v1868_v39 }
0x12fe   :  { %1877 = vrot.lane.b32.xlu1 %v1870_v40, %s2722_s7  ;;  %1882 = vrot.lane.b32.xlu0 %v1832_v31, %s2724_s13 }
0x1302   :  { %1887 = vrot.lane.b32.xlu1 %v1864_v14, %s2724_s13 }
0x136c   :  { %v1873_v41 = vpop.permute.xlu0 %1872 }
0x136d   :  { %1875 = vst.msk [vmem:[#allocation2] sm:$0x3] %vm180_vm0, %v1873_v41  ;;  %2226 = vst.msk [vmem:[%s3161_s3 + $0xc] sm:$0x3] %vm180_vm0, %v1873_v41 }
0x1370   :  { %v1878_v42 = vpop.permute.xlu1 %1877  ;;  %v1883_v43 = vpop.permute.xlu0 %1882 }
0x1371   :  { %1880 = vst.msk [vmem:[#allocation2 + $0x2] sm:$0x3] %vm180_vm0, %v1878_v42  ;;  %2227 = vst.msk [vmem:[%s3162_s4 + $0x2] sm:$0x3] %vm180_vm0, %v1878_v42 }
0x1372   :  { %1885 = vst.msk [vmem:[#allocation3] sm:$0x3] %vm180_vm0, %v1883_v43 }
0x1374   :  { %v1888_v44 = vpop.permute.xlu1 %1887  ;;  %v1895_v45 = vld [vmem:[#allocation2] sm:$0x3] }
0x1375   :  { %1890 = vst.msk [vmem:[#allocation3 + $0x2] sm:$0x3] %vm180_vm0, %v1888_v44  ;;  %2476 = vmatmul.mubr.msk.f32.vlgmr.msra.gmra.mrb[14].mxu0 %vm195_vm2, %v1895_v45 }
0x1378   :  { %v1896_v46 = vld [vmem:[#allocation2 + $0x2] sm:$0x3] }
0x1379   :  { %2487 = vmatmul.mubr.msk.f32.vlgmr.msra.gmra.mrb[14].mxu1 %vm195_vm2, %v1896_v46  ;;  %v2054_v58 = vld [vmem:[#allocation3] sm:$0x3] }
0x137c   :  { %v2085_v59 = vld [vmem:[#allocation3 + $0x2] sm:$0x3] }
0x1448   :  { %v1974_v49 = vpop.f32.mrb[14].mxu0 }
0x1449   :  { %v2053_v50 = vadd.f32 %v2052_v48, %v1974_v49  ;;  %v2477_v51 = vpop.f32.mrb[15].mxu0 }
0x144b   :  { %2703 = vtanh.f32 %v2053_v50  ;;  %v2230_v60 = vmul.f32 -1.442695, %v2053_v50 }
0x144c   :  { %v2047_v53 = vpop.f32.mrb[14].mxu1 }
0x144d   :  { %v2084_v54 = vadd.f32 %v2083_v52, %v2047_v53  ;;  %v2488_v55 = vpop.f32.mrb[15].mxu1 }
0x144f   :  { %2705 = vtanh.f32 %v2084_v54  ;;  %v2231_v61 = vmul.f32 -1.442695, %v2084_v54 }
0x1450   :  { %2707 = vpow2.f32 %v2230_v60 }
0x1451   :  { %2709 = vpow2.f32 %v2231_v61 }
0x1455   :  { %v2704_v56 = vpop.eup %2703 }
0x1456   :  { %2068 = vrot.lane.b32.xlu0 %v2704_v56, %s2723_s10 }
0x1459   :  { %v2706_v57 = vpop.eup %2705 }
0x145a   :  { %2099 = vrot.lane.b32.xlu1 %v2706_v57, %s2723_s10  ;;  %2063 = vrot.lane.b32.xlu0 %v2054_v58, %s2722_s7  ;;  %v2708_v62 = vpop.eup %2707 }
0x145b   :  { %v2058_v63 = vadd.f32 1.0, %v2708_v62  ;;  %v2710_v0 = vpop.eup %2709 }
0x145c   :  { %v2089_v1 = vadd.f32 1.0, %v2710_v0 }
0x145d   :  { %2711 = vrcp.f32 %v2058_v63 }
0x145e   :  { %2094 = vrot.lane.b32.xlu1 %v2085_v59, %s2722_s7  ;;  %2713 = vrcp.f32 %v2089_v1 }
0x1467   :  { %v2712_v2 = vpop.eup %2711 }
0x1468   :  { %v2714_v7 = vpop.eup %2713 }
0x14c8   :  { %v2069_v5 = vpop.permute.xlu0 %2068 }
0x14c9   :  { %v2071_v6 = vmul.f32 %v2712_v2, %v2069_v5 }
0x14cb   :  { %2073 = vrot.lane.b32.xlu0 %v2071_v6, %s2722_s7 }
0x14cc   :  { %v2100_v10 = vpop.permute.xlu1 %2099  ;;  %v2064_v12 = vpop.permute.xlu0 %2063 }
0x14cd   :  { %v2102_v11 = vmul.f32 %v2714_v7, %v2100_v10  ;;  %v2066_v15 = vmul.f32 %v2712_v2, %v2064_v12 }
0x14cf   :  { %2104 = vrot.lane.b32.xlu1 %v2102_v11, %s2722_s7 }
0x14d0   :  { %v2095_v3 = vpop.permute.xlu1 %2094 }
0x14d1   :  { %v2097_v17 = vmul.f32 %v2714_v7, %v2095_v3 }
0x153d   :  { %v2074_v9 = vpop.permute.xlu0 %2073 }
0x153e   :  { %v2076_v16 = vadd.f32 %v2074_v9, %v2066_v15 }
0x1540   :  { %2715 = vtanh.f32 %v2076_v16 }
0x1541   :  { %v2105_v18 = vpop.permute.xlu1 %2104 }
0x1542   :  { %v2107_v19 = vadd.f32 %v2105_v18, %v2097_v17 }
0x1544   :  { %2717 = vtanh.f32 %v2107_v19 }
0x154a   :  { %v2716_v20 = vpop.eup %2715 }
0x154b   :  { %2079 = vrot.lane.b32.xlu0 %v2716_v20, %s2723_s10 }
0x154e   :  { %v2718_v21 = vpop.eup %2717 }
0x154f   :  { %2110 = vrot.lane.b32.xlu1 %v2718_v21, %s2723_s10 }
0x15bd   :  { %v2080_v22 = vpop.permute.xlu0 %2079 }
0x15be   :  { %v2082_v23 = vmul.f32 %v2712_v2, %v2080_v22 }
0x15c0   :  { %2115 = vrot.lane.b32.xlu0 %v2082_v23, %s2722_s7 }
0x15c1   :  { %v2111_v24 = vpop.permute.xlu1 %2110 }
0x15c2   :  { %v2113_v25 = vmul.f32 %v2714_v7, %v2111_v24 }
0x15c4   :  { %2120 = vrot.lane.b32.xlu1 %v2113_v25, %s2722_s7  ;;  %2125 = vrot.lane.b32.xlu0 %v2076_v16, %s2724_s13 }
0x15c8   :  { %2130 = vrot.lane.b32.xlu1 %v2107_v19, %s2724_s13 }
0x1632   :  { %v2116_v26 = vpop.permute.xlu0 %2115 }
0x1633   :  { %2118 = vst.msk [vmem:[#allocation2] sm:$0x3] %vm180_vm0, %v2116_v26  ;;  %2232 = vst.msk [vmem:[%s3161_s3 + $0xe] sm:$0x3] %vm180_vm0, %v2116_v26 }
0x1636   :  { %v2121_v4 = vpop.permute.xlu1 %2120  ;;  %v2126_v27 = vpop.permute.xlu0 %2125 }
0x1637   :  { %2123 = vst.msk [vmem:[#allocation2 + $0x2] sm:$0x3] %vm180_vm0, %v2121_v4  ;;  %2136 = vst.msk [vmem:[%s3162_s4] sm:$0x3] %vm180_vm0, %v2121_v4 }
0x1638   :  { %2128 = vst.msk [vmem:[#allocation3] sm:$0x3] %vm180_vm0, %v2126_v27 }
0x163a   :  { %v2131_v13 = vpop.permute.xlu1 %2130 }
0x163b   :  { %2133 = vst.msk [vmem:[#allocation3 + $0x2] sm:$0x3] %vm180_vm0, %v2131_v13 }

</bundles_post_ra>
